<compile_context>
chip_gen: v7x
topology: tpu7x:2x2x1
jax: 0.10.0
libtpu: 0.0.40
codegen_flags: <defaults>
</compile_context>

<pallas_src>
import jax
import jax.numpy as jnp
from jax.experimental import pallas as pl
from jax.experimental.pallas import tpu as pltpu


def _make_kernel(num_layers, T, B, H, G, compute_dtype):
    """B = sublane-padded batch; G = per-gate lane block (multiple of 128, >= H).

    Gate order matches PyTorch nn.LSTM: i, f, g, o.  The i/f/o weight columns and
    bias entries are pre-scaled by 0.5 in the wrapper so one tanh over the full
    (B, 4G) pre-activation yields every gate (sigmoid(x) = 0.5*tanh(x/2) + 0.5).
    """
    L = num_layers
    Hp = G  # lane width of h/c inside the kernel (== per-gate block)

    def kernel(*refs):
        idx = 0
        x_ref = refs[idx]; idx += 1
        wih0_ref, whh0_ref, b0_ref = refs[idx], refs[idx + 1], refs[idx + 2]; idx += 3
        wstack_refs, bias_refs = [], []
        for _ in range(L - 1):
            wstack_refs.append(refs[idx]); bias_refs.append(refs[idx + 1]); idx += 2
        wout_ref, bout_ref = refs[idx], refs[idx + 1]; idx += 2
        out_ref = refs[idx]; idx += 1
        proj_ref, seq_ref = refs[idx], refs[idx + 1]   # VMEM scratches (f32)

        # ---- Phase 1: layer-0 input-to-hidden projection for ALL time steps as
        #      one MXU GEMM (bias folded in once); completely off the recurrent
        #      critical path.  Written once to VMEM, sliced per step below.
        proj_ref[...] = (
            jnp.dot(x_ref[...], wih0_ref[...], preferred_element_type=jnp.float32)
            + b0_ref[...])

        # Small loop-invariant operands hoisted out of the unrolled recurrence.
        # (Big weight loads stay at their point of use so Mosaic streams them
        #  VMEM -> vregs -> MXU instead of pinning ~64 vregs per weight.)
        bias_vals = [bias_refs[i][...] for i in range(L - 1)]     # (B, 4G) f32

        # ---- Phase 2: wavefront recurrence.  Carried state per layer: h[l]
        #      (compute_dtype copy fed to the MXU) and c[l] (f32).  Layer->layer
        #      handoff is purely in registers; only the top layer touches seq_ref.
        h = [jnp.zeros((B, Hp), compute_dtype) for _ in range(L)]
        c = [jnp.zeros((B, Hp), jnp.float32) for _ in range(L)]

        def lstm_cell(pre, l, t):
            # pre: (B, 4G) f32 pre-activations; i/f/o blocks pre-scaled by 0.5.
            th = jnp.tanh(pre)                        # ONE elementwise tanh pass
            i_act = 0.5 * th[:, 0 * G:1 * G] + 0.5    # 128-lane-aligned slices:
            f_act = 0.5 * th[:, 1 * G:2 * G] + 0.5    # full vregs, no sub-vreg
            g_act =       th[:, 2 * G:3 * G]          # relayouts / rotates
            o_act = 0.5 * th[:, 3 * G:4 * G] + 0.5
            c[l] = f_act * c[l] + i_act * g_act                    # f32 cell state
            h_f32 = o_act * jnp.tanh(c[l])                         # f32 hidden
            h[l] = h_f32.astype(compute_dtype)                     # next MXU input
            if l == L - 1:
                # Deferred ReLU + output projection: store the ReLU'd top-layer
                # hidden state.  f32 keeps this a native (8,128)-tile aligned
                # store; nothing reads seq_ref until the final GEMM (no hazard).
                seq_ref[t * B:(t + 1) * B, :] = jnp.maximum(h_f32, 0.0)

        # Wavefront over s = t + l: layer-l/step-t is independent of
        # layer-(l-1)/step-(t+1), so the serial chain is T + L - 1 matmul steps
        # (not L*T) and the independent per-wave pushes pipeline through the MXU.
        for s in range(T + L - 1):
            # Descending l: h[l-1] still holds the *previous* wave's value, i.e.
            # layer (l-1)'s output at time t = s - l — exactly what layer l needs.
            for l in range(min(L - 1, s), -1, -1):
                t = s - l
                if t >= T:
                    continue
                if l == 0:
                    pre = proj_ref[t * B:(t + 1) * B, :] + jnp.dot(
                        h[0], whh0_ref[...], preferred_element_type=jnp.float32)
                else:
                    # Fused input+recurrent projection: ONE (B, 2*Hp) x (2*Hp, 4G)
                    # MXU push per layer per step against stacked [W_ih; W_hh].
                    inp = jnp.concatenate([h[l - 1], h[l]], axis=1)
                    pre = jnp.dot(inp, wstack_refs[l - 1][...],
                                  preferred_element_type=jnp.float32) + bias_vals[l - 1]
                lstm_cell(pre, l, t)

        # ---- Phase 3: single lane-dense output GEMM over all time steps.
        out_ref[...] = (
            jnp.dot(seq_ref[...].astype(compute_dtype), wout_ref[...],
                    preferred_element_type=jnp.float32)
            + bout_ref[...]).astype(out_ref.dtype)

    return kernel


def _pack_gate_cols(w, H, G, dtype):
    """(K, 4H) -> (K, 4G): gate g occupies columns [g*G, g*G+H); the i/f/o gate
    columns are scaled by 0.5 so the kernel computes every gate with one tanh."""
    K = w.shape[0]
    out = jnp.zeros((K, 4 * G), dtype)
    for gi, scale in enumerate((0.5, 0.5, 1.0, 0.5)):          # i, f, g, o
        out = out.at[:, gi * G: gi * G + H].set(
            (scale * w[:, gi * H:(gi + 1) * H]).astype(dtype))
    return out


def recognizer_forward(conv_f, layer_weights, w_out, b_out, *, flag=True,
                       compute_dtype=jnp.bfloat16):
    """Pallas implementation of Recognizer.forward (eval mode).

    conv_f: (B, F, 1, T) if flag else (B, F, T)
    layer_weights: list of (w_ih: (in, 4H), w_hh: (H, 4H), b: (4H,)) per layer,
                   with b = b_ih + b_hh pre-folded (PyTorch keeps two biases).
    w_out: (H, V2), b_out: (V2,)
    compute_dtype: MXU-input dtype (bf16 default: full rate on v5e/v6e/v7x);
                   gate math / cell state / accumulation stay float32.
    returns: (T, B, V2) float32
    """
    x = conv_f
    if flag:
        # torch.squeeze(conv_f) in the module; drop only the singleton spatial
        # dim so batch-1 inputs keep their batch axis.
        x = jnp.squeeze(x, axis=2)
        # nn.Dropout(p=0.2) is identity in eval mode.
    x = jnp.transpose(x, (2, 0, 1)).astype(jnp.float32)        # (T, B, F)

    T, B, F = x.shape
    num_layers = len(layer_weights)
    H = layer_weights[0][1].shape[0]
    V2 = w_out.shape[1]
    f32 = jnp.float32

    SUB, LANE = 8, 128
    B_pad = ((B + SUB - 1) // SUB) * SUB               # sublane-aligned batch
    Fp = ((F + LANE - 1) // LANE) * LANE               # lane-padded input features
    G = ((H + LANE - 1) // LANE) * LANE                # per-gate lane block
    Hp = G                                             # in-kernel hidden lane width
    Vp = ((V2 + LANE - 1) // LANE) * LANE              # lane-dense output width

    # Input: pad batch to a sublane multiple, features to a lane multiple, and
    # flatten time*batch into the GEMM M dimension.
    x_pad = jnp.zeros((T, B_pad, Fp), f32).at[:, :B, :F].set(x)
    x_flat = x_pad.reshape(T * B_pad, Fp).astype(compute_dtype)

    full2d = lambda i: (0, 0)

    # Layer 0: hoisted input-projection weights + gate-padded recurrent weights.
    w_ih0, w_hh0, b0 = layer_weights[0]
    wih0_p = jnp.zeros((Fp, 4 * G), compute_dtype).at[:F, :].set(
        _pack_gate_cols(w_ih0.astype(f32), H, G, compute_dtype))          # (Fp, 4G)
    whh0_p = jnp.zeros((Hp, 4 * G), compute_dtype).at[:H, :].set(
        _pack_gate_cols(w_hh0.astype(f32), H, G, compute_dtype))          # (Hp, 4G)
    b0_p = _pack_gate_cols(b0.reshape(1, 4 * H).astype(f32), H, G, f32)   # (1, 4G)

    flat_inputs = [x_flat, wih0_p, whh0_p, b0_p]
    in_specs = [pl.BlockSpec(a.shape, full2d) for a in flat_inputs]

    # Layers >= 1: stacked [W_ih; W_hh] for the fused per-step MXU push; bias
    # pre-broadcast over the padded batch sublanes (no in-kernel broadcasts).
    for (w_ih, w_hh, b) in layer_weights[1:]:
        wstack = jnp.zeros((2 * Hp, 4 * G), compute_dtype)
        wstack = wstack.at[:H, :].set(_pack_gate_cols(w_ih.astype(f32), H, G, compute_dtype))
        wstack = wstack.at[Hp:Hp + H, :].set(_pack_gate_cols(w_hh.astype(f32), H, G, compute_dtype))
        b_p = jnp.broadcast_to(
            _pack_gate_cols(b.reshape(1, 4 * H).astype(f32), H, G, f32), (B_pad, 4 * G))
        flat_inputs += [wstack, b_p]
        in_specs += [pl.BlockSpec(wstack.shape, full2d), pl.BlockSpec(b_p.shape, full2d)]

    w_out_p = jnp.zeros((Hp, Vp), compute_dtype).at[:H, :V2].set(w_out.astype(compute_dtype))
    b_out_p = jnp.zeros((1, Vp), f32).at[:, :V2].set(b_out.astype(f32)[None, :])
    flat_inputs += [w_out_p, b_out_p]
    in_specs += [pl.BlockSpec(w_out_p.shape, full2d), pl.BlockSpec(b_out_p.shape, full2d)]

    kernel = _make_kernel(num_layers, T, B_pad, H, G, compute_dtype)

    out = pl.pallas_call(
        kernel,
        out_shape=jax.ShapeDtypeStruct((T * B_pad, Vp), jnp.float32),
        grid_spec=pltpu.PrefetchScalarGridSpec(
            num_scalar_prefetch=0,
            grid=(1,),                                         # single invocation
            in_specs=in_specs,
            out_specs=pl.BlockSpec((T * B_pad, Vp), full2d),
            scratch_shapes=[
                pltpu.VMEM((T * B_pad, 4 * G), jnp.float32),   # layer-0 projection
                pltpu.VMEM((T * B_pad, Hp), jnp.float32),      # ReLU'd top-layer h
            ],
        ),
        compiler_params=pltpu.CompilerParams(
            dimension_semantics=("arbitrary",),
        ),
    )(*flat_inputs)

    # Strip batch / lane padding outside the kernel; reshape to (T, B, V2).
    return out.reshape(T, B_pad, Vp)[:, :B, :V2]


def _ref_forward(conv_f, layer_weights, w_out, b_out, *, flag=True):
    """Pure-jnp reference (PyTorch LSTM semantics, eval mode)."""
    x = conv_f
    if flag:
        x = jnp.squeeze(x, axis=2)
    x = jnp.transpose(x, (2, 0, 1)).astype(jnp.float32)
    T, B, F = x.shape
    L = len(layer_weights)
    H = layer_weights[0][1].shape[0]
    h = [jnp.zeros((B, H), jnp.float32) for _ in range(L)]
    c = [jnp.zeros((B, H), jnp.float32) for _ in range(L)]
    outs = []
    for t in range(T):
        inp = x[t]
        for l, (wih, whh, b) in enumerate(layer_weights):
            gates = inp @ wih + h[l] @ whh + b
            i = jax.nn.sigmoid(gates[:, :H])
            f = jax.nn.sigmoid(gates[:, H:2 * H])
            g = jnp.tanh(gates[:, 2 * H:3 * H])
            o = jax.nn.sigmoid(gates[:, 3 * H:4 * H])
            c[l] = f * c[l] + i * g
            h[l] = o * jnp.tanh(c[l])
            inp = h[l]
        outs.append(jnp.maximum(inp, 0.0) @ w_out + b_out)
    return jnp.stack(outs)


if __name__ == "__main__":
    # Small shapes consistent with the module:
    #   batch=2, feature_layers=4, hidden_dim=32, num_layers=2, vocab_size=10, seq=8
    B, F, H, L, V, T = 2, 4, 32, 2, 10, 8
    V2 = V + 2

    key = jax.random.PRNGKey(0)
    keys = jax.random.split(key, 3 * L + 3)

    layer_weights = []
    kidx = 0
    for l in range(L):
        in_dim = F if l == 0 else H
        w_ih = 0.1 * jax.random.normal(keys[kidx], (in_dim, 4 * H), jnp.float32); kidx += 1
        w_hh = 0.1 * jax.random.normal(keys[kidx], (H, 4 * H), jnp.float32); kidx += 1
        b = 0.1 * jax.random.normal(keys[kidx], (4 * H,), jnp.float32); kidx += 1  # b_ih + b_hh
        layer_weights.append((w_ih, w_hh, b))
    w_out = 0.1 * jax.random.normal(keys[kidx], (H, V2), jnp.float32); kidx += 1
    b_out = 0.1 * jax.random.normal(keys[kidx], (V2,), jnp.float32); kidx += 1

    conv_f = jax.random.normal(keys[kidx], (B, F, 1, T), jnp.float32)  # NCHW conv feature map

    ref = _ref_forward(conv_f, layer_weights, w_out, b_out, flag=True)

    # 1) Exact-semantics check with f32 MXU inputs (tight tolerance).
    out_f32 = jax.block_until_ready(
        recognizer_forward(conv_f, layer_weights, w_out, b_out, flag=True,
                           compute_dtype=jnp.float32))
    assert out_f32.shape == (T, B, V2), out_f32.shape
    assert jnp.allclose(out_f32, ref, atol=1e-4, rtol=1e-4), \
        float(jnp.max(jnp.abs(out_f32 - ref)))

    # 2) Default configuration (bf16 MXU inputs, f32 gate/cell math); bf16
    #    re-quantization of h compounds over T, so tolerance is loosened.
    out_bf16 = jax.block_until_ready(
        recognizer_forward(conv_f, layer_weights, w_out, b_out, flag=True))
    assert out_bf16.shape == (T, B, V2), out_bf16.shape
    assert jnp.allclose(out_bf16, ref, atol=3e-2, rtol=3e-2), \
        float(jnp.max(jnp.abs(out_bf16 - ref)))

    print("KERNEL_OK")
</pallas_src>

<mosaic_0001>
module attributes {stable_mosaic.version = 11 : i64} {
  func.func @kernel(%arg0: i32, %arg1: memref<64x128xf32, #tpu.memory_space<vmem>>, %arg2: memref<128x512xf32, #tpu.memory_space<vmem>>, %arg3: memref<128x512xf32, #tpu.memory_space<vmem>>, %arg4: memref<1x512xf32, #tpu.memory_space<vmem>>, %arg5: memref<256x512xf32, #tpu.memory_space<vmem>>, %arg6: memref<8x512xf32, #tpu.memory_space<vmem>>, %arg7: memref<128x128xf32, #tpu.memory_space<vmem>>, %arg8: memref<1x128xf32, #tpu.memory_space<vmem>>, %arg9: memref<64x128xf32, #tpu.memory_space<vmem>>, %arg10: memref<64x512xf32, #tpu.memory_space<vmem>>, %arg11: memref<64x128xf32, #tpu.memory_space<vmem>>) attributes {dimension_semantics = [#tpu.dimension_semantics<arbitrary>], iteration_bounds = array<i64: 1>, scalar_prefetch = 0 : i64, scratch_operands = 2 : i64, tpu.core_type = #tpu.core_type<tc>, window_params = [{pipeline_mode = #tpu.pipeline_mode<synchronous>, transform_indices = @transform_0, window_bounds = array<i64: 64, 128>}, {pipeline_mode = #tpu.pipeline_mode<synchronous>, transform_indices = @transform_1, window_bounds = array<i64: 128, 512>}, {pipeline_mode = #tpu.pipeline_mode<synchronous>, transform_indices = @transform_2, window_bounds = array<i64: 128, 512>}, {pipeline_mode = #tpu.pipeline_mode<synchronous>, transform_indices = @transform_3, window_bounds = array<i64: 1, 512>}, {pipeline_mode = #tpu.pipeline_mode<synchronous>, transform_indices = @transform_4, window_bounds = array<i64: 256, 512>}, {pipeline_mode = #tpu.pipeline_mode<synchronous>, transform_indices = @transform_5, window_bounds = array<i64: 8, 512>}, {pipeline_mode = #tpu.pipeline_mode<synchronous>, transform_indices = @transform_6, window_bounds = array<i64: 128, 128>}, {pipeline_mode = #tpu.pipeline_mode<synchronous>, transform_indices = @transform_7, window_bounds = array<i64: 1, 128>}, {pipeline_mode = #tpu.pipeline_mode<synchronous>, transform_indices = @transform_8, window_bounds = array<i64: 64, 128>}]} {
    %c0 = arith.constant 0 : index
    %c0_0 = arith.constant 0 : index
    %0 = vector.load %arg1[%c0, %c0_0] : memref<64x128xf32, #tpu.memory_space<vmem>>, vector<64x128xf32>
    %c0_1 = arith.constant 0 : index
    %c0_2 = arith.constant 0 : index
    %1 = vector.load %arg2[%c0_1, %c0_2] : memref<128x512xf32, #tpu.memory_space<vmem>>, vector<128x512xf32>
    %cst = arith.constant dense<0.000000e+00> : vector<64x512xf32>
    %2 = tpu.matmul %0, %1, %cst {dimension_numbers = #tpu.dot_dimension_numbers<[1], [0], [0], [1], [0, 0, 1, 1], [], []>} : vector<64x128xf32>, vector<128x512xf32>, vector<64x512xf32> -> vector<64x512xf32>
    %c0_3 = arith.constant 0 : index
    %c0_4 = arith.constant 0 : index
    %3 = vector.load %arg4[%c0_3, %c0_4] : memref<1x512xf32, #tpu.memory_space<vmem>>, vector<1x512xf32>
    %4 = vector.broadcast %3 : vector<1x512xf32> to vector<64x512xf32>
    %5 = arith.addf %2, %4 : vector<64x512xf32>
    %c0_5 = arith.constant 0 : index
    %c0_6 = arith.constant 0 : index
    %6 = vector.load %arg10[%c0_5, %c0_6] : memref<64x512xf32, #tpu.memory_space<vmem>>, vector<64x512xf32>
    tpu.vector_store %arg10[%c0_5, %c0_6], %5 {strides = array<i32>} : memref<64x512xf32, #tpu.memory_space<vmem>>, vector<64x512xf32>,
    %c0_7 = arith.constant 0 : index
    %c0_8 = arith.constant 0 : index
    %7 = vector.load %arg6[%c0_7, %c0_8] : memref<8x512xf32, #tpu.memory_space<vmem>>, vector<8x512xf32>
    %cst_9 = arith.constant 0.000000e+00 : f32
    %8 = vector.broadcast %cst_9 : f32 to vector<8x128xf32>
    %cst_10 = arith.constant 0.000000e+00 : f32
    %9 = vector.broadcast %cst_10 : f32 to vector<8x128xf32>
    %cst_11 = arith.constant 0.000000e+00 : f32
    %10 = vector.broadcast %cst_11 : f32 to vector<8x128xf32>
    %cst_12 = arith.constant 0.000000e+00 : f32
    %11 = vector.broadcast %cst_12 : f32 to vector<8x128xf32>
    %c0_13 = arith.constant 0 : index
    %c0_14 = arith.constant 0 : index
    %12 = vector.load %arg10[%c0_13, %c0_14] : memref<64x512xf32, #tpu.memory_space<vmem>>, vector<8x512xf32>
    %c0_15 = arith.constant 0 : index
    %c0_16 = arith.constant 0 : index
    %13 = vector.load %arg3[%c0_15, %c0_16] : memref<128x512xf32, #tpu.memory_space<vmem>>, vector<128x512xf32>
    %cst_17 = arith.constant dense<0.000000e+00> : vector<8x512xf32>
    %14 = tpu.matmul %8, %13, %cst_17 {dimension_numbers = #tpu.dot_dimension_numbers<[1], [0], [0], [1], [0, 0, 1, 1], [], []>} : vector<8x128xf32>, vector<128x512xf32>, vector<8x512xf32> -> vector<8x512xf32>
    %15 = arith.addf %12, %14 : vector<8x512xf32>
    %16 = math.tanh %15 : vector<8x512xf32>
    %17 = vector.extract_strided_slice %16 {offsets = [0, 0], sizes = [8, 128], strides = [1, 1]} : vector<8x512xf32> to vector<8x128xf32>
    %cst_18 = arith.constant 5.000000e-01 : f32
    %18 = vector.broadcast %cst_18 : f32 to vector<8x128xf32>
    %19 = arith.mulf %18, %17 : vector<8x128xf32>
    %cst_19 = arith.constant 5.000000e-01 : f32
    %20 = vector.broadcast %cst_19 : f32 to vector<8x128xf32>
    %21 = arith.addf %19, %20 : vector<8x128xf32>
    %22 = vector.extract_strided_slice %16 {offsets = [0, 128], sizes = [8, 128], strides = [1, 1]} : vector<8x512xf32> to vector<8x128xf32>
    %cst_20 = arith.constant 5.000000e-01 : f32
    %23 = vector.broadcast %cst_20 : f32 to vector<8x128xf32>
    %24 = arith.mulf %23, %22 : vector<8x128xf32>
    %cst_21 = arith.constant 5.000000e-01 : f32
    %25 = vector.broadcast %cst_21 : f32 to vector<8x128xf32>
    %26 = arith.addf %24, %25 : vector<8x128xf32>
    %27 = vector.extract_strided_slice %16 {offsets = [0, 256], sizes = [8, 128], strides = [1, 1]} : vector<8x512xf32> to vector<8x128xf32>
    %28 = vector.extract_strided_slice %16 {offsets = [0, 384], sizes = [8, 128], strides = [1, 1]} : vector<8x512xf32> to vector<8x128xf32>
    %cst_22 = arith.constant 5.000000e-01 : f32
    %29 = vector.broadcast %cst_22 : f32 to vector<8x128xf32>
    %30 = arith.mulf %29, %28 : vector<8x128xf32>
    %cst_23 = arith.constant 5.000000e-01 : f32
    %31 = vector.broadcast %cst_23 : f32 to vector<8x128xf32>
    %32 = arith.addf %30, %31 : vector<8x128xf32>
    %33 = arith.mulf %26, %10 : vector<8x128xf32>
    %34 = arith.mulf %21, %27 : vector<8x128xf32>
    %35 = arith.addf %33, %34 : vector<8x128xf32>
    %36 = math.tanh %35 : vector<8x128xf32>
    %37 = arith.mulf %32, %36 : vector<8x128xf32>
    %38 = tpu.concatenate %37, %9 in 1 : vector<8x128xf32>, vector<8x128xf32> -> vector<8x256xf32>
    %c0_24 = arith.constant 0 : index
    %c0_25 = arith.constant 0 : index
    %39 = vector.load %arg5[%c0_24, %c0_25] : memref<256x512xf32, #tpu.memory_space<vmem>>, vector<256x512xf32>
    %cst_26 = arith.constant dense<0.000000e+00> : vector<8x512xf32>
    %40 = tpu.matmul %38, %39, %cst_26 {dimension_numbers = #tpu.dot_dimension_numbers<[1], [0], [0], [1], [0, 0, 1, 1], [], []>} : vector<8x256xf32>, vector<256x512xf32>, vector<8x512xf32> -> vector<8x512xf32>
    %41 = arith.addf %40, %7 : vector<8x512xf32>
    %42 = math.tanh %41 : vector<8x512xf32>
    %43 = vector.extract_strided_slice %42 {offsets = [0, 0], sizes = [8, 128], strides = [1, 1]} : vector<8x512xf32> to vector<8x128xf32>
    %cst_27 = arith.constant 5.000000e-01 : f32
    %44 = vector.broadcast %cst_27 : f32 to vector<8x128xf32>
    %45 = arith.mulf %44, %43 : vector<8x128xf32>
    %cst_28 = arith.constant 5.000000e-01 : f32
    %46 = vector.broadcast %cst_28 : f32 to vector<8x128xf32>
    %47 = arith.addf %45, %46 : vector<8x128xf32>
    %48 = vector.extract_strided_slice %42 {offsets = [0, 128], sizes = [8, 128], strides = [1, 1]} : vector<8x512xf32> to vector<8x128xf32>
    %cst_29 = arith.constant 5.000000e-01 : f32
    %49 = vector.broadcast %cst_29 : f32 to vector<8x128xf32>
    %50 = arith.mulf %49, %48 : vector<8x128xf32>
    %cst_30 = arith.constant 5.000000e-01 : f32
    %51 = vector.broadcast %cst_30 : f32 to vector<8x128xf32>
    %52 = arith.addf %50, %51 : vector<8x128xf32>
    %53 = vector.extract_strided_slice %42 {offsets = [0, 256], sizes = [8, 128], strides = [1, 1]} : vector<8x512xf32> to vector<8x128xf32>
    %54 = vector.extract_strided_slice %42 {offsets = [0, 384], sizes = [8, 128], strides = [1, 1]} : vector<8x512xf32> to vector<8x128xf32>
    %cst_31 = arith.constant 5.000000e-01 : f32
    %55 = vector.broadcast %cst_31 : f32 to vector<8x128xf32>
    %56 = arith.mulf %55, %54 : vector<8x128xf32>
    %cst_32 = arith.constant 5.000000e-01 : f32
    %57 = vector.broadcast %cst_32 : f32 to vector<8x128xf32>
    %58 = arith.addf %56, %57 : vector<8x128xf32>
    %59 = arith.mulf %52, %11 : vector<8x128xf32>
    %60 = arith.mulf %47, %53 : vector<8x128xf32>
    %61 = arith.addf %59, %60 : vector<8x128xf32>
    %62 = math.tanh %61 : vector<8x128xf32>
    %63 = arith.mulf %58, %62 : vector<8x128xf32>
    %cst_33 = arith.constant 0.000000e+00 : f32
    %64 = vector.broadcast %cst_33 : f32 to vector<8x128xf32>
    %65 = arith.maximumf %63, %64 : vector<8x128xf32>
    %c0_34 = arith.constant 0 : index
    %c0_35 = arith.constant 0 : index
    %66 = vector.load %arg11[%c0_34, %c0_35] : memref<64x128xf32, #tpu.memory_space<vmem>>, vector<8x128xf32>
    tpu.vector_store %arg11[%c0_34, %c0_35], %65 {strides = array<i32>} : memref<64x128xf32, #tpu.memory_space<vmem>>, vector<8x128xf32>,
    %c8 = arith.constant 8 : index
    %c0_36 = arith.constant 0 : index
    %67 = vector.load %arg10[%c8, %c0_36] : memref<64x512xf32, #tpu.memory_space<vmem>>, vector<8x512xf32>
    %c0_37 = arith.constant 0 : index
    %c0_38 = arith.constant 0 : index
    %68 = vector.load %arg3[%c0_37, %c0_38] : memref<128x512xf32, #tpu.memory_space<vmem>>, vector<128x512xf32>
    %cst_39 = arith.constant dense<0.000000e+00> : vector<8x512xf32>
    %69 = tpu.matmul %37, %68, %cst_39 {dimension_numbers = #tpu.dot_dimension_numbers<[1], [0], [0], [1], [0, 0, 1, 1], [], []>} : vector<8x128xf32>, vector<128x512xf32>, vector<8x512xf32> -> vector<8x512xf32>
    %70 = arith.addf %67, %69 : vector<8x512xf32>
    %71 = math.tanh %70 : vector<8x512xf32>
    %72 = vector.extract_strided_slice %71 {offsets = [0, 0], sizes = [8, 128], strides = [1, 1]} : vector<8x512xf32> to vector<8x128xf32>
    %cst_40 = arith.constant 5.000000e-01 : f32
    %73 = vector.broadcast %cst_40 : f32 to vector<8x128xf32>
    %74 = arith.mulf %73, %72 : vector<8x128xf32>
    %cst_41 = arith.constant 5.000000e-01 : f32
    %75 = vector.broadcast %cst_41 : f32 to vector<8x128xf32>
    %76 = arith.addf %74, %75 : vector<8x128xf32>
    %77 = vector.extract_strided_slice %71 {offsets = [0, 128], sizes = [8, 128], strides = [1, 1]} : vector<8x512xf32> to vector<8x128xf32>
    %cst_42 = arith.constant 5.000000e-01 : f32
    %78 = vector.broadcast %cst_42 : f32 to vector<8x128xf32>
    %79 = arith.mulf %78, %77 : vector<8x128xf32>
    %cst_43 = arith.constant 5.000000e-01 : f32
    %80 = vector.broadcast %cst_43 : f32 to vector<8x128xf32>
    %81 = arith.addf %79, %80 : vector<8x128xf32>
    %82 = vector.extract_strided_slice %71 {offsets = [0, 256], sizes = [8, 128], strides = [1, 1]} : vector<8x512xf32> to vector<8x128xf32>
    %83 = vector.extract_strided_slice %71 {offsets = [0, 384], sizes = [8, 128], strides = [1, 1]} : vector<8x512xf32> to vector<8x128xf32>
    %cst_44 = arith.constant 5.000000e-01 : f32
    %84 = vector.broadcast %cst_44 : f32 to vector<8x128xf32>
    %85 = arith.mulf %84, %83 : vector<8x128xf32>
    %cst_45 = arith.constant 5.000000e-01 : f32
    %86 = vector.broadcast %cst_45 : f32 to vector<8x128xf32>
    %87 = arith.addf %85, %86 : vector<8x128xf32>
    %88 = arith.mulf %81, %35 : vector<8x128xf32>
    %89 = arith.mulf %76, %82 : vector<8x128xf32>
    %90 = arith.addf %88, %89 : vector<8x128xf32>
    %91 = math.tanh %90 : vector<8x128xf32>
    %92 = arith.mulf %87, %91 : vector<8x128xf32>
    %93 = tpu.concatenate %92, %63 in 1 : vector<8x128xf32>, vector<8x128xf32> -> vector<8x256xf32>
    %c0_46 = arith.constant 0 : index
    %c0_47 = arith.constant 0 : index
    %94 = vector.load %arg5[%c0_46, %c0_47] : memref<256x512xf32, #tpu.memory_space<vmem>>, vector<256x512xf32>
    %cst_48 = arith.constant dense<0.000000e+00> : vector<8x512xf32>
    %95 = tpu.matmul %93, %94, %cst_48 {dimension_numbers = #tpu.dot_dimension_numbers<[1], [0], [0], [1], [0, 0, 1, 1], [], []>} : vector<8x256xf32>, vector<256x512xf32>, vector<8x512xf32> -> vector<8x512xf32>
    %96 = arith.addf %95, %7 : vector<8x512xf32>
    %97 = math.tanh %96 : vector<8x512xf32>
    %98 = vector.extract_strided_slice %97 {offsets = [0, 0], sizes = [8, 128], strides = [1, 1]} : vector<8x512xf32> to vector<8x128xf32>
    %cst_49 = arith.constant 5.000000e-01 : f32
    %99 = vector.broadcast %cst_49 : f32 to vector<8x128xf32>
    %100 = arith.mulf %99, %98 : vector<8x128xf32>
    %cst_50 = arith.constant 5.000000e-01 : f32
    %101 = vector.broadcast %cst_50 : f32 to vector<8x128xf32>
    %102 = arith.addf %100, %101 : vector<8x128xf32>
    %103 = vector.extract_strided_slice %97 {offsets = [0, 128], sizes = [8, 128], strides = [1, 1]} : vector<8x512xf32> to vector<8x128xf32>
    %cst_51 = arith.constant 5.000000e-01 : f32
    %104 = vector.broadcast %cst_51 : f32 to vector<8x128xf32>
    %105 = arith.mulf %104, %103 : vector<8x128xf32>
    %cst_52 = arith.constant 5.000000e-01 : f32
    %106 = vector.broadcast %cst_52 : f32 to vector<8x128xf32>
    %107 = arith.addf %105, %106 : vector<8x128xf32>
    %108 = vector.extract_strided_slice %97 {offsets = [0, 256], sizes = [8, 128], strides = [1, 1]} : vector<8x512xf32> to vector<8x128xf32>
    %109 = vector.extract_strided_slice %97 {offsets = [0, 384], sizes = [8, 128], strides = [1, 1]} : vector<8x512xf32> to vector<8x128xf32>
    %cst_53 = arith.constant 5.000000e-01 : f32
    %110 = vector.broadcast %cst_53 : f32 to vector<8x128xf32>
    %111 = arith.mulf %110, %109 : vector<8x128xf32>
    %cst_54 = arith.constant 5.000000e-01 : f32
    %112 = vector.broadcast %cst_54 : f32 to vector<8x128xf32>
    %113 = arith.addf %111, %112 : vector<8x128xf32>
    %114 = arith.mulf %107, %61 : vector<8x128xf32>
    %115 = arith.mulf %102, %108 : vector<8x128xf32>
    %116 = arith.addf %114, %115 : vector<8x128xf32>
    %117 = math.tanh %116 : vector<8x128xf32>
    %118 = arith.mulf %113, %117 : vector<8x128xf32>
    %cst_55 = arith.constant 0.000000e+00 : f32
    %119 = vector.broadcast %cst_55 : f32 to vector<8x128xf32>
    %120 = arith.maximumf %118, %119 : vector<8x128xf32>
    %c8_56 = arith.constant 8 : index
    %c0_57 = arith.constant 0 : index
    %121 = vector.load %arg11[%c8_56, %c0_57] : memref<64x128xf32, #tpu.memory_space<vmem>>, vector<8x128xf32>
    tpu.vector_store %arg11[%c8_56, %c0_57], %120 {strides = array<i32>} : memref<64x128xf32, #tpu.memory_space<vmem>>, vector<8x128xf32>,
    %c16 = arith.constant 16 : index
    %c0_58 = arith.constant 0 : index
    %122 = vector.load %arg10[%c16, %c0_58] : memref<64x512xf32, #tpu.memory_space<vmem>>, vector<8x512xf32>
    %c0_59 = arith.constant 0 : index
    %c0_60 = arith.constant 0 : index
    %123 = vector.load %arg3[%c0_59, %c0_60] : memref<128x512xf32, #tpu.memory_space<vmem>>, vector<128x512xf32>
    %cst_61 = arith.constant dense<0.000000e+00> : vector<8x512xf32>
    %124 = tpu.matmul %92, %123, %cst_61 {dimension_numbers = #tpu.dot_dimension_numbers<[1], [0], [0], [1], [0, 0, 1, 1], [], []>} : vector<8x128xf32>, vector<128x512xf32>, vector<8x512xf32> -> vector<8x512xf32>
    %125 = arith.addf %122, %124 : vector<8x512xf32>
    %126 = math.tanh %125 : vector<8x512xf32>
    %127 = vector.extract_strided_slice %126 {offsets = [0, 0], sizes = [8, 128], strides = [1, 1]} : vector<8x512xf32> to vector<8x128xf32>
    %cst_62 = arith.constant 5.000000e-01 : f32
    %128 = vector.broadcast %cst_62 : f32 to vector<8x128xf32>
    %129 = arith.mulf %128, %127 : vector<8x128xf32>
    %cst_63 = arith.constant 5.000000e-01 : f32
    %130 = vector.broadcast %cst_63 : f32 to vector<8x128xf32>
    %131 = arith.addf %129, %130 : vector<8x128xf32>
    %132 = vector.extract_strided_slice %126 {offsets = [0, 128], sizes = [8, 128], strides = [1, 1]} : vector<8x512xf32> to vector<8x128xf32>
    %cst_64 = arith.constant 5.000000e-01 : f32
    %133 = vector.broadcast %cst_64 : f32 to vector<8x128xf32>
    %134 = arith.mulf %133, %132 : vector<8x128xf32>
    %cst_65 = arith.constant 5.000000e-01 : f32
    %135 = vector.broadcast %cst_65 : f32 to vector<8x128xf32>
    %136 = arith.addf %134, %135 : vector<8x128xf32>
    %137 = vector.extract_strided_slice %126 {offsets = [0, 256], sizes = [8, 128], strides = [1, 1]} : vector<8x512xf32> to vector<8x128xf32>
    %138 = vector.extract_strided_slice %126 {offsets = [0, 384], sizes = [8, 128], strides = [1, 1]} : vector<8x512xf32> to vector<8x128xf32>
    %cst_66 = arith.constant 5.000000e-01 : f32
    %139 = vector.broadcast %cst_66 : f32 to vector<8x128xf32>
    %140 = arith.mulf %139, %138 : vector<8x128xf32>
    %cst_67 = arith.constant 5.000000e-01 : f32
    %141 = vector.broadcast %cst_67 : f32 to vector<8x128xf32>
    %142 = arith.addf %140, %141 : vector<8x128xf32>
    %143 = arith.mulf %136, %90 : vector<8x128xf32>
    %144 = arith.mulf %131, %137 : vector<8x128xf32>
    %145 = arith.addf %143, %144 : vector<8x128xf32>
    %146 = math.tanh %145 : vector<8x128xf32>
    %147 = arith.mulf %142, %146 : vector<8x128xf32>
    %148 = tpu.concatenate %147, %118 in 1 : vector<8x128xf32>, vector<8x128xf32> -> vector<8x256xf32>
    %c0_68 = arith.constant 0 : index
    %c0_69 = arith.constant 0 : index
    %149 = vector.load %arg5[%c0_68, %c0_69] : memref<256x512xf32, #tpu.memory_space<vmem>>, vector<256x512xf32>
    %cst_70 = arith.constant dense<0.000000e+00> : vector<8x512xf32>
    %150 = tpu.matmul %148, %149, %cst_70 {dimension_numbers = #tpu.dot_dimension_numbers<[1], [0], [0], [1], [0, 0, 1, 1], [], []>} : vector<8x256xf32>, vector<256x512xf32>, vector<8x512xf32> -> vector<8x512xf32>
    %151 = arith.addf %150, %7 : vector<8x512xf32>
    %152 = math.tanh %151 : vector<8x512xf32>
    %153 = vector.extract_strided_slice %152 {offsets = [0, 0], sizes = [8, 128], strides = [1, 1]} : vector<8x512xf32> to vector<8x128xf32>
    %cst_71 = arith.constant 5.000000e-01 : f32
    %154 = vector.broadcast %cst_71 : f32 to vector<8x128xf32>
    %155 = arith.mulf %154, %153 : vector<8x128xf32>
    %cst_72 = arith.constant 5.000000e-01 : f32
    %156 = vector.broadcast %cst_72 : f32 to vector<8x128xf32>
    %157 = arith.addf %155, %156 : vector<8x128xf32>
    %158 = vector.extract_strided_slice %152 {offsets = [0, 128], sizes = [8, 128], strides = [1, 1]} : vector<8x512xf32> to vector<8x128xf32>
    %cst_73 = arith.constant 5.000000e-01 : f32
    %159 = vector.broadcast %cst_73 : f32 to vector<8x128xf32>
    %160 = arith.mulf %159, %158 : vector<8x128xf32>
    %cst_74 = arith.constant 5.000000e-01 : f32
    %161 = vector.broadcast %cst_74 : f32 to vector<8x128xf32>
    %162 = arith.addf %160, %161 : vector<8x128xf32>
    %163 = vector.extract_strided_slice %152 {offsets = [0, 256], sizes = [8, 128], strides = [1, 1]} : vector<8x512xf32> to vector<8x128xf32>
    %164 = vector.extract_strided_slice %152 {offsets = [0, 384], sizes = [8, 128], strides = [1, 1]} : vector<8x512xf32> to vector<8x128xf32>
    %cst_75 = arith.constant 5.000000e-01 : f32
    %165 = vector.broadcast %cst_75 : f32 to vector<8x128xf32>
    %166 = arith.mulf %165, %164 : vector<8x128xf32>
    %cst_76 = arith.constant 5.000000e-01 : f32
    %167 = vector.broadcast %cst_76 : f32 to vector<8x128xf32>
    %168 = arith.addf %166, %167 : vector<8x128xf32>
    %169 = arith.mulf %162, %116 : vector<8x128xf32>
    %170 = arith.mulf %157, %163 : vector<8x128xf32>
    %171 = arith.addf %169, %170 : vector<8x128xf32>
    %172 = math.tanh %171 : vector<8x128xf32>
    %173 = arith.mulf %168, %172 : vector<8x128xf32>
    %cst_77 = arith.constant 0.000000e+00 : f32
    %174 = vector.broadcast %cst_77 : f32 to vector<8x128xf32>
    %175 = arith.maximumf %173, %174 : vector<8x128xf32>
    %c16_78 = arith.constant 16 : index
    %c0_79 = arith.constant 0 : index
    %176 = vector.load %arg11[%c16_78, %c0_79] : memref<64x128xf32, #tpu.memory_space<vmem>>, vector<8x128xf32>
    tpu.vector_store %arg11[%c16_78, %c0_79], %175 {strides = array<i32>} : memref<64x128xf32, #tpu.memory_space<vmem>>, vector<8x128xf32>,
    %c24 = arith.constant 24 : index
    %c0_80 = arith.constant 0 : index
    %177 = vector.load %arg10[%c24, %c0_80] : memref<64x512xf32, #tpu.memory_space<vmem>>, vector<8x512xf32>
    %c0_81 = arith.constant 0 : index
    %c0_82 = arith.constant 0 : index
    %178 = vector.load %arg3[%c0_81, %c0_82] : memref<128x512xf32, #tpu.memory_space<vmem>>, vector<128x512xf32>
    %cst_83 = arith.constant dense<0.000000e+00> : vector<8x512xf32>
    %179 = tpu.matmul %147, %178, %cst_83 {dimension_numbers = #tpu.dot_dimension_numbers<[1], [0], [0], [1], [0, 0, 1, 1], [], []>} : vector<8x128xf32>, vector<128x512xf32>, vector<8x512xf32> -> vector<8x512xf32>
    %180 = arith.addf %177, %179 : vector<8x512xf32>
    %181 = math.tanh %180 : vector<8x512xf32>
    %182 = vector.extract_strided_slice %181 {offsets = [0, 0], sizes = [8, 128], strides = [1, 1]} : vector<8x512xf32> to vector<8x128xf32>
    %cst_84 = arith.constant 5.000000e-01 : f32
    %183 = vector.broadcast %cst_84 : f32 to vector<8x128xf32>
    %184 = arith.mulf %183, %182 : vector<8x128xf32>
    %cst_85 = arith.constant 5.000000e-01 : f32
    %185 = vector.broadcast %cst_85 : f32 to vector<8x128xf32>
    %186 = arith.addf %184, %185 : vector<8x128xf32>
    %187 = vector.extract_strided_slice %181 {offsets = [0, 128], sizes = [8, 128], strides = [1, 1]} : vector<8x512xf32> to vector<8x128xf32>
    %cst_86 = arith.constant 5.000000e-01 : f32
    %188 = vector.broadcast %cst_86 : f32 to vector<8x128xf32>
    %189 = arith.mulf %188, %187 : vector<8x128xf32>
    %cst_87 = arith.constant 5.000000e-01 : f32
    %190 = vector.broadcast %cst_87 : f32 to vector<8x128xf32>
    %191 = arith.addf %189, %190 : vector<8x128xf32>
    %192 = vector.extract_strided_slice %181 {offsets = [0, 256], sizes = [8, 128], strides = [1, 1]} : vector<8x512xf32> to vector<8x128xf32>
    %193 = vector.extract_strided_slice %181 {offsets = [0, 384], sizes = [8, 128], strides = [1, 1]} : vector<8x512xf32> to vector<8x128xf32>
    %cst_88 = arith.constant 5.000000e-01 : f32
    %194 = vector.broadcast %cst_88 : f32 to vector<8x128xf32>
    %195 = arith.mulf %194, %193 : vector<8x128xf32>
    %cst_89 = arith.constant 5.000000e-01 : f32
    %196 = vector.broadcast %cst_89 : f32 to vector<8x128xf32>
    %197 = arith.addf %195, %196 : vector<8x128xf32>
    %198 = arith.mulf %191, %145 : vector<8x128xf32>
    %199 = arith.mulf %186, %192 : vector<8x128xf32>
    %200 = arith.addf %198, %199 : vector<8x128xf32>
    %201 = math.tanh %200 : vector<8x128xf32>
    %202 = arith.mulf %197, %201 : vector<8x128xf32>
    %203 = tpu.concatenate %202, %173 in 1 : vector<8x128xf32>, vector<8x128xf32> -> vector<8x256xf32>
    %c0_90 = arith.constant 0 : index
    %c0_91 = arith.constant 0 : index
    %204 = vector.load %arg5[%c0_90, %c0_91] : memref<256x512xf32, #tpu.memory_space<vmem>>, vector<256x512xf32>
    %cst_92 = arith.constant dense<0.000000e+00> : vector<8x512xf32>
    %205 = tpu.matmul %203, %204, %cst_92 {dimension_numbers = #tpu.dot_dimension_numbers<[1], [0], [0], [1], [0, 0, 1, 1], [], []>} : vector<8x256xf32>, vector<256x512xf32>, vector<8x512xf32> -> vector<8x512xf32>
    %206 = arith.addf %205, %7 : vector<8x512xf32>
    %207 = math.tanh %206 : vector<8x512xf32>
    %208 = vector.extract_strided_slice %207 {offsets = [0, 0], sizes = [8, 128], strides = [1, 1]} : vector<8x512xf32> to vector<8x128xf32>
    %cst_93 = arith.constant 5.000000e-01 : f32
    %209 = vector.broadcast %cst_93 : f32 to vector<8x128xf32>
    %210 = arith.mulf %209, %208 : vector<8x128xf32>
    %cst_94 = arith.constant 5.000000e-01 : f32
    %211 = vector.broadcast %cst_94 : f32 to vector<8x128xf32>
    %212 = arith.addf %210, %211 : vector<8x128xf32>
    %213 = vector.extract_strided_slice %207 {offsets = [0, 128], sizes = [8, 128], strides = [1, 1]} : vector<8x512xf32> to vector<8x128xf32>
    %cst_95 = arith.constant 5.000000e-01 : f32
    %214 = vector.broadcast %cst_95 : f32 to vector<8x128xf32>
    %215 = arith.mulf %214, %213 : vector<8x128xf32>
    %cst_96 = arith.constant 5.000000e-01 : f32
    %216 = vector.broadcast %cst_96 : f32 to vector<8x128xf32>
    %217 = arith.addf %215, %216 : vector<8x128xf32>
    %218 = vector.extract_strided_slice %207 {offsets = [0, 256], sizes = [8, 128], strides = [1, 1]} : vector<8x512xf32> to vector<8x128xf32>
    %219 = vector.extract_strided_slice %207 {offsets = [0, 384], sizes = [8, 128], strides = [1, 1]} : vector<8x512xf32> to vector<8x128xf32>
    %cst_97 = arith.constant 5.000000e-01 : f32
    %220 = vector.broadcast %cst_97 : f32 to vector<8x128xf32>
    %221 = arith.mulf %220, %219 : vector<8x128xf32>
    %cst_98 = arith.constant 5.000000e-01 : f32
    %222 = vector.broadcast %cst_98 : f32 to vector<8x128xf32>
    %223 = arith.addf %221, %222 : vector<8x128xf32>
    %224 = arith.mulf %217, %171 : vector<8x128xf32>
    %225 = arith.mulf %212, %218 : vector<8x128xf32>
    %226 = arith.addf %224, %225 : vector<8x128xf32>
    %227 = math.tanh %226 : vector<8x128xf32>
    %228 = arith.mulf %223, %227 : vector<8x128xf32>
    %cst_99 = arith.constant 0.000000e+00 : f32
    %229 = vector.broadcast %cst_99 : f32 to vector<8x128xf32>
    %230 = arith.maximumf %228, %229 : vector<8x128xf32>
    %c24_100 = arith.constant 24 : index
    %c0_101 = arith.constant 0 : index
    %231 = vector.load %arg11[%c24_100, %c0_101] : memref<64x128xf32, #tpu.memory_space<vmem>>, vector<8x128xf32>
    tpu.vector_store %arg11[%c24_100, %c0_101], %230 {strides = array<i32>} : memref<64x128xf32, #tpu.memory_space<vmem>>, vector<8x128xf32>,
    %c32 = arith.constant 32 : index
    %c0_102 = arith.constant 0 : index
    %232 = vector.load %arg10[%c32, %c0_102] : memref<64x512xf32, #tpu.memory_space<vmem>>, vector<8x512xf32>
    %c0_103 = arith.constant 0 : index
    %c0_104 = arith.constant 0 : index
    %233 = vector.load %arg3[%c0_103, %c0_104] : memref<128x512xf32, #tpu.memory_space<vmem>>, vector<128x512xf32>
    %cst_105 = arith.constant dense<0.000000e+00> : vector<8x512xf32>
    %234 = tpu.matmul %202, %233, %cst_105 {dimension_numbers = #tpu.dot_dimension_numbers<[1], [0], [0], [1], [0, 0, 1, 1], [], []>} : vector<8x128xf32>, vector<128x512xf32>, vector<8x512xf32> -> vector<8x512xf32>
    %235 = arith.addf %232, %234 : vector<8x512xf32>
    %236 = math.tanh %235 : vector<8x512xf32>
    %237 = vector.extract_strided_slice %236 {offsets = [0, 0], sizes = [8, 128], strides = [1, 1]} : vector<8x512xf32> to vector<8x128xf32>
    %cst_106 = arith.constant 5.000000e-01 : f32
    %238 = vector.broadcast %cst_106 : f32 to vector<8x128xf32>
    %239 = arith.mulf %238, %237 : vector<8x128xf32>
    %cst_107 = arith.constant 5.000000e-01 : f32
    %240 = vector.broadcast %cst_107 : f32 to vector<8x128xf32>
    %241 = arith.addf %239, %240 : vector<8x128xf32>
    %242 = vector.extract_strided_slice %236 {offsets = [0, 128], sizes = [8, 128], strides = [1, 1]} : vector<8x512xf32> to vector<8x128xf32>
    %cst_108 = arith.constant 5.000000e-01 : f32
    %243 = vector.broadcast %cst_108 : f32 to vector<8x128xf32>
    %244 = arith.mulf %243, %242 : vector<8x128xf32>
    %cst_109 = arith.constant 5.000000e-01 : f32
    %245 = vector.broadcast %cst_109 : f32 to vector<8x128xf32>
    %246 = arith.addf %244, %245 : vector<8x128xf32>
    %247 = vector.extract_strided_slice %236 {offsets = [0, 256], sizes = [8, 128], strides = [1, 1]} : vector<8x512xf32> to vector<8x128xf32>
    %248 = vector.extract_strided_slice %236 {offsets = [0, 384], sizes = [8, 128], strides = [1, 1]} : vector<8x512xf32> to vector<8x128xf32>
    %cst_110 = arith.constant 5.000000e-01 : f32
    %249 = vector.broadcast %cst_110 : f32 to vector<8x128xf32>
    %250 = arith.mulf %249, %248 : vector<8x128xf32>
    %cst_111 = arith.constant 5.000000e-01 : f32
    %251 = vector.broadcast %cst_111 : f32 to vector<8x128xf32>
    %252 = arith.addf %250, %251 : vector<8x128xf32>
    %253 = arith.mulf %246, %200 : vector<8x128xf32>
    %254 = arith.mulf %241, %247 : vector<8x128xf32>
    %255 = arith.addf %253, %254 : vector<8x128xf32>
    %256 = math.tanh %255 : vector<8x128xf32>
    %257 = arith.mulf %252, %256 : vector<8x128xf32>
    %258 = tpu.concatenate %257, %228 in 1 : vector<8x128xf32>, vector<8x128xf32> -> vector<8x256xf32>
    %c0_112 = arith.constant 0 : index
    %c0_113 = arith.constant 0 : index
    %259 = vector.load %arg5[%c0_112, %c0_113] : memref<256x512xf32, #tpu.memory_space<vmem>>, vector<256x512xf32>
    %cst_114 = arith.constant dense<0.000000e+00> : vector<8x512xf32>
    %260 = tpu.matmul %258, %259, %cst_114 {dimension_numbers = #tpu.dot_dimension_numbers<[1], [0], [0], [1], [0, 0, 1, 1], [], []>} : vector<8x256xf32>, vector<256x512xf32>, vector<8x512xf32> -> vector<8x512xf32>
    %261 = arith.addf %260, %7 : vector<8x512xf32>
    %262 = math.tanh %261 : vector<8x512xf32>
    %263 = vector.extract_strided_slice %262 {offsets = [0, 0], sizes = [8, 128], strides = [1, 1]} : vector<8x512xf32> to vector<8x128xf32>
    %cst_115 = arith.constant 5.000000e-01 : f32
    %264 = vector.broadcast %cst_115 : f32 to vector<8x128xf32>
    %265 = arith.mulf %264, %263 : vector<8x128xf32>
    %cst_116 = arith.constant 5.000000e-01 : f32
    %266 = vector.broadcast %cst_116 : f32 to vector<8x128xf32>
    %267 = arith.addf %265, %266 : vector<8x128xf32>
    %268 = vector.extract_strided_slice %262 {offsets = [0, 128], sizes = [8, 128], strides = [1, 1]} : vector<8x512xf32> to vector<8x128xf32>
    %cst_117 = arith.constant 5.000000e-01 : f32
    %269 = vector.broadcast %cst_117 : f32 to vector<8x128xf32>
    %270 = arith.mulf %269, %268 : vector<8x128xf32>
    %cst_118 = arith.constant 5.000000e-01 : f32
    %271 = vector.broadcast %cst_118 : f32 to vector<8x128xf32>
    %272 = arith.addf %270, %271 : vector<8x128xf32>
    %273 = vector.extract_strided_slice %262 {offsets = [0, 256], sizes = [8, 128], strides = [1, 1]} : vector<8x512xf32> to vector<8x128xf32>
    %274 = vector.extract_strided_slice %262 {offsets = [0, 384], sizes = [8, 128], strides = [1, 1]} : vector<8x512xf32> to vector<8x128xf32>
    %cst_119 = arith.constant 5.000000e-01 : f32
    %275 = vector.broadcast %cst_119 : f32 to vector<8x128xf32>
    %276 = arith.mulf %275, %274 : vector<8x128xf32>
    %cst_120 = arith.constant 5.000000e-01 : f32
    %277 = vector.broadcast %cst_120 : f32 to vector<8x128xf32>
    %278 = arith.addf %276, %277 : vector<8x128xf32>
    %279 = arith.mulf %272, %226 : vector<8x128xf32>
    %280 = arith.mulf %267, %273 : vector<8x128xf32>
    %281 = arith.addf %279, %280 : vector<8x128xf32>
    %282 = math.tanh %281 : vector<8x128xf32>
    %283 = arith.mulf %278, %282 : vector<8x128xf32>
    %cst_121 = arith.constant 0.000000e+00 : f32
    %284 = vector.broadcast %cst_121 : f32 to vector<8x128xf32>
    %285 = arith.maximumf %283, %284 : vector<8x128xf32>
    %c32_122 = arith.constant 32 : index
    %c0_123 = arith.constant 0 : index
    %286 = vector.load %arg11[%c32_122, %c0_123] : memref<64x128xf32, #tpu.memory_space<vmem>>, vector<8x128xf32>
    tpu.vector_store %arg11[%c32_122, %c0_123], %285 {strides = array<i32>} : memref<64x128xf32, #tpu.memory_space<vmem>>, vector<8x128xf32>,
    %c40 = arith.constant 40 : index
    %c0_124 = arith.constant 0 : index
    %287 = vector.load %arg10[%c40, %c0_124] : memref<64x512xf32, #tpu.memory_space<vmem>>, vector<8x512xf32>
    %c0_125 = arith.constant 0 : index
    %c0_126 = arith.constant 0 : index
    %288 = vector.load %arg3[%c0_125, %c0_126] : memref<128x512xf32, #tpu.memory_space<vmem>>, vector<128x512xf32>
    %cst_127 = arith.constant dense<0.000000e+00> : vector<8x512xf32>
    %289 = tpu.matmul %257, %288, %cst_127 {dimension_numbers = #tpu.dot_dimension_numbers<[1], [0], [0], [1], [0, 0, 1, 1], [], []>} : vector<8x128xf32>, vector<128x512xf32>, vector<8x512xf32> -> vector<8x512xf32>
    %290 = arith.addf %287, %289 : vector<8x512xf32>
    %291 = math.tanh %290 : vector<8x512xf32>
    %292 = vector.extract_strided_slice %291 {offsets = [0, 0], sizes = [8, 128], strides = [1, 1]} : vector<8x512xf32> to vector<8x128xf32>
    %cst_128 = arith.constant 5.000000e-01 : f32
    %293 = vector.broadcast %cst_128 : f32 to vector<8x128xf32>
    %294 = arith.mulf %293, %292 : vector<8x128xf32>
    %cst_129 = arith.constant 5.000000e-01 : f32
    %295 = vector.broadcast %cst_129 : f32 to vector<8x128xf32>
    %296 = arith.addf %294, %295 : vector<8x128xf32>
    %297 = vector.extract_strided_slice %291 {offsets = [0, 128], sizes = [8, 128], strides = [1, 1]} : vector<8x512xf32> to vector<8x128xf32>
    %cst_130 = arith.constant 5.000000e-01 : f32
    %298 = vector.broadcast %cst_130 : f32 to vector<8x128xf32>
    %299 = arith.mulf %298, %297 : vector<8x128xf32>
    %cst_131 = arith.constant 5.000000e-01 : f32
    %300 = vector.broadcast %cst_131 : f32 to vector<8x128xf32>
    %301 = arith.addf %299, %300 : vector<8x128xf32>
    %302 = vector.extract_strided_slice %291 {offsets = [0, 256], sizes = [8, 128], strides = [1, 1]} : vector<8x512xf32> to vector<8x128xf32>
    %303 = vector.extract_strided_slice %291 {offsets = [0, 384], sizes = [8, 128], strides = [1, 1]} : vector<8x512xf32> to vector<8x128xf32>
    %cst_132 = arith.constant 5.000000e-01 : f32
    %304 = vector.broadcast %cst_132 : f32 to vector<8x128xf32>
    %305 = arith.mulf %304, %303 : vector<8x128xf32>
    %cst_133 = arith.constant 5.000000e-01 : f32
    %306 = vector.broadcast %cst_133 : f32 to vector<8x128xf32>
    %307 = arith.addf %305, %306 : vector<8x128xf32>
    %308 = arith.mulf %301, %255 : vector<8x128xf32>
    %309 = arith.mulf %296, %302 : vector<8x128xf32>
    %310 = arith.addf %308, %309 : vector<8x128xf32>
    %311 = math.tanh %310 : vector<8x128xf32>
    %312 = arith.mulf %307, %311 : vector<8x128xf32>
    %313 = tpu.concatenate %312, %283 in 1 : vector<8x128xf32>, vector<8x128xf32> -> vector<8x256xf32>
    %c0_134 = arith.constant 0 : index
    %c0_135 = arith.constant 0 : index
    %314 = vector.load %arg5[%c0_134, %c0_135] : memref<256x512xf32, #tpu.memory_space<vmem>>, vector<256x512xf32>
    %cst_136 = arith.constant dense<0.000000e+00> : vector<8x512xf32>
    %315 = tpu.matmul %313, %314, %cst_136 {dimension_numbers = #tpu.dot_dimension_numbers<[1], [0], [0], [1], [0, 0, 1, 1], [], []>} : vector<8x256xf32>, vector<256x512xf32>, vector<8x512xf32> -> vector<8x512xf32>
    %316 = arith.addf %315, %7 : vector<8x512xf32>
    %317 = math.tanh %316 : vector<8x512xf32>
    %318 = vector.extract_strided_slice %317 {offsets = [0, 0], sizes = [8, 128], strides = [1, 1]} : vector<8x512xf32> to vector<8x128xf32>
    %cst_137 = arith.constant 5.000000e-01 : f32
    %319 = vector.broadcast %cst_137 : f32 to vector<8x128xf32>
    %320 = arith.mulf %319, %318 : vector<8x128xf32>
    %cst_138 = arith.constant 5.000000e-01 : f32
    %321 = vector.broadcast %cst_138 : f32 to vector<8x128xf32>
    %322 = arith.addf %320, %321 : vector<8x128xf32>
    %323 = vector.extract_strided_slice %317 {offsets = [0, 128], sizes = [8, 128], strides = [1, 1]} : vector<8x512xf32> to vector<8x128xf32>
    %cst_139 = arith.constant 5.000000e-01 : f32
    %324 = vector.broadcast %cst_139 : f32 to vector<8x128xf32>
    %325 = arith.mulf %324, %323 : vector<8x128xf32>
    %cst_140 = arith.constant 5.000000e-01 : f32
    %326 = vector.broadcast %cst_140 : f32 to vector<8x128xf32>
    %327 = arith.addf %325, %326 : vector<8x128xf32>
    %328 = vector.extract_strided_slice %317 {offsets = [0, 256], sizes = [8, 128], strides = [1, 1]} : vector<8x512xf32> to vector<8x128xf32>
    %329 = vector.extract_strided_slice %317 {offsets = [0, 384], sizes = [8, 128], strides = [1, 1]} : vector<8x512xf32> to vector<8x128xf32>
    %cst_141 = arith.constant 5.000000e-01 : f32
    %330 = vector.broadcast %cst_141 : f32 to vector<8x128xf32>
    %331 = arith.mulf %330, %329 : vector<8x128xf32>
    %cst_142 = arith.constant 5.000000e-01 : f32
    %332 = vector.broadcast %cst_142 : f32 to vector<8x128xf32>
    %333 = arith.addf %331, %332 : vector<8x128xf32>
    %334 = arith.mulf %327, %281 : vector<8x128xf32>
    %335 = arith.mulf %322, %328 : vector<8x128xf32>
    %336 = arith.addf %334, %335 : vector<8x128xf32>
    %337 = math.tanh %336 : vector<8x128xf32>
    %338 = arith.mulf %333, %337 : vector<8x128xf32>
    %cst_143 = arith.constant 0.000000e+00 : f32
    %339 = vector.broadcast %cst_143 : f32 to vector<8x128xf32>
    %340 = arith.maximumf %338, %339 : vector<8x128xf32>
    %c40_144 = arith.constant 40 : index
    %c0_145 = arith.constant 0 : index
    %341 = vector.load %arg11[%c40_144, %c0_145] : memref<64x128xf32, #tpu.memory_space<vmem>>, vector<8x128xf32>
    tpu.vector_store %arg11[%c40_144, %c0_145], %340 {strides = array<i32>} : memref<64x128xf32, #tpu.memory_space<vmem>>, vector<8x128xf32>,
    %c48 = arith.constant 48 : index
    %c0_146 = arith.constant 0 : index
    %342 = vector.load %arg10[%c48, %c0_146] : memref<64x512xf32, #tpu.memory_space<vmem>>, vector<8x512xf32>
    %c0_147 = arith.constant 0 : index
    %c0_148 = arith.constant 0 : index
    %343 = vector.load %arg3[%c0_147, %c0_148] : memref<128x512xf32, #tpu.memory_space<vmem>>, vector<128x512xf32>
    %cst_149 = arith.constant dense<0.000000e+00> : vector<8x512xf32>
    %344 = tpu.matmul %312, %343, %cst_149 {dimension_numbers = #tpu.dot_dimension_numbers<[1], [0], [0], [1], [0, 0, 1, 1], [], []>} : vector<8x128xf32>, vector<128x512xf32>, vector<8x512xf32> -> vector<8x512xf32>
    %345 = arith.addf %342, %344 : vector<8x512xf32>
    %346 = math.tanh %345 : vector<8x512xf32>
    %347 = vector.extract_strided_slice %346 {offsets = [0, 0], sizes = [8, 128], strides = [1, 1]} : vector<8x512xf32> to vector<8x128xf32>
    %cst_150 = arith.constant 5.000000e-01 : f32
    %348 = vector.broadcast %cst_150 : f32 to vector<8x128xf32>
    %349 = arith.mulf %348, %347 : vector<8x128xf32>
    %cst_151 = arith.constant 5.000000e-01 : f32
    %350 = vector.broadcast %cst_151 : f32 to vector<8x128xf32>
    %351 = arith.addf %349, %350 : vector<8x128xf32>
    %352 = vector.extract_strided_slice %346 {offsets = [0, 128], sizes = [8, 128], strides = [1, 1]} : vector<8x512xf32> to vector<8x128xf32>
    %cst_152 = arith.constant 5.000000e-01 : f32
    %353 = vector.broadcast %cst_152 : f32 to vector<8x128xf32>
    %354 = arith.mulf %353, %352 : vector<8x128xf32>
    %cst_153 = arith.constant 5.000000e-01 : f32
    %355 = vector.broadcast %cst_153 : f32 to vector<8x128xf32>
    %356 = arith.addf %354, %355 : vector<8x128xf32>
    %357 = vector.extract_strided_slice %346 {offsets = [0, 256], sizes = [8, 128], strides = [1, 1]} : vector<8x512xf32> to vector<8x128xf32>
    %358 = vector.extract_strided_slice %346 {offsets = [0, 384], sizes = [8, 128], strides = [1, 1]} : vector<8x512xf32> to vector<8x128xf32>
    %cst_154 = arith.constant 5.000000e-01 : f32
    %359 = vector.broadcast %cst_154 : f32 to vector<8x128xf32>
    %360 = arith.mulf %359, %358 : vector<8x128xf32>
    %cst_155 = arith.constant 5.000000e-01 : f32
    %361 = vector.broadcast %cst_155 : f32 to vector<8x128xf32>
    %362 = arith.addf %360, %361 : vector<8x128xf32>
    %363 = arith.mulf %356, %310 : vector<8x128xf32>
    %364 = arith.mulf %351, %357 : vector<8x128xf32>
    %365 = arith.addf %363, %364 : vector<8x128xf32>
    %366 = math.tanh %365 : vector<8x128xf32>
    %367 = arith.mulf %362, %366 : vector<8x128xf32>
    %368 = tpu.concatenate %367, %338 in 1 : vector<8x128xf32>, vector<8x128xf32> -> vector<8x256xf32>
    %c0_156 = arith.constant 0 : index
    %c0_157 = arith.constant 0 : index
    %369 = vector.load %arg5[%c0_156, %c0_157] : memref<256x512xf32, #tpu.memory_space<vmem>>, vector<256x512xf32>
    %cst_158 = arith.constant dense<0.000000e+00> : vector<8x512xf32>
    %370 = tpu.matmul %368, %369, %cst_158 {dimension_numbers = #tpu.dot_dimension_numbers<[1], [0], [0], [1], [0, 0, 1, 1], [], []>} : vector<8x256xf32>, vector<256x512xf32>, vector<8x512xf32> -> vector<8x512xf32>
    %371 = arith.addf %370, %7 : vector<8x512xf32>
    %372 = math.tanh %371 : vector<8x512xf32>
    %373 = vector.extract_strided_slice %372 {offsets = [0, 0], sizes = [8, 128], strides = [1, 1]} : vector<8x512xf32> to vector<8x128xf32>
    %cst_159 = arith.constant 5.000000e-01 : f32
    %374 = vector.broadcast %cst_159 : f32 to vector<8x128xf32>
    %375 = arith.mulf %374, %373 : vector<8x128xf32>
    %cst_160 = arith.constant 5.000000e-01 : f32
    %376 = vector.broadcast %cst_160 : f32 to vector<8x128xf32>
    %377 = arith.addf %375, %376 : vector<8x128xf32>
    %378 = vector.extract_strided_slice %372 {offsets = [0, 128], sizes = [8, 128], strides = [1, 1]} : vector<8x512xf32> to vector<8x128xf32>
    %cst_161 = arith.constant 5.000000e-01 : f32
    %379 = vector.broadcast %cst_161 : f32 to vector<8x128xf32>
    %380 = arith.mulf %379, %378 : vector<8x128xf32>
    %cst_162 = arith.constant 5.000000e-01 : f32
    %381 = vector.broadcast %cst_162 : f32 to vector<8x128xf32>
    %382 = arith.addf %380, %381 : vector<8x128xf32>
    %383 = vector.extract_strided_slice %372 {offsets = [0, 256], sizes = [8, 128], strides = [1, 1]} : vector<8x512xf32> to vector<8x128xf32>
    %384 = vector.extract_strided_slice %372 {offsets = [0, 384], sizes = [8, 128], strides = [1, 1]} : vector<8x512xf32> to vector<8x128xf32>
    %cst_163 = arith.constant 5.000000e-01 : f32
    %385 = vector.broadcast %cst_163 : f32 to vector<8x128xf32>
    %386 = arith.mulf %385, %384 : vector<8x128xf32>
    %cst_164 = arith.constant 5.000000e-01 : f32
    %387 = vector.broadcast %cst_164 : f32 to vector<8x128xf32>
    %388 = arith.addf %386, %387 : vector<8x128xf32>
    %389 = arith.mulf %382, %336 : vector<8x128xf32>
    %390 = arith.mulf %377, %383 : vector<8x128xf32>
    %391 = arith.addf %389, %390 : vector<8x128xf32>
    %392 = math.tanh %391 : vector<8x128xf32>
    %393 = arith.mulf %388, %392 : vector<8x128xf32>
    %cst_165 = arith.constant 0.000000e+00 : f32
    %394 = vector.broadcast %cst_165 : f32 to vector<8x128xf32>
    %395 = arith.maximumf %393, %394 : vector<8x128xf32>
    %c48_166 = arith.constant 48 : index
    %c0_167 = arith.constant 0 : index
    %396 = vector.load %arg11[%c48_166, %c0_167] : memref<64x128xf32, #tpu.memory_space<vmem>>, vector<8x128xf32>
    tpu.vector_store %arg11[%c48_166, %c0_167], %395 {strides = array<i32>} : memref<64x128xf32, #tpu.memory_space<vmem>>, vector<8x128xf32>,
    %c56 = arith.constant 56 : index
    %c0_168 = arith.constant 0 : index
    %397 = vector.load %arg10[%c56, %c0_168] : memref<64x512xf32, #tpu.memory_space<vmem>>, vector<8x512xf32>
    %c0_169 = arith.constant 0 : index
    %c0_170 = arith.constant 0 : index
    %398 = vector.load %arg3[%c0_169, %c0_170] : memref<128x512xf32, #tpu.memory_space<vmem>>, vector<128x512xf32>
    %cst_171 = arith.constant dense<0.000000e+00> : vector<8x512xf32>
    %399 = tpu.matmul %367, %398, %cst_171 {dimension_numbers = #tpu.dot_dimension_numbers<[1], [0], [0], [1], [0, 0, 1, 1], [], []>} : vector<8x128xf32>, vector<128x512xf32>, vector<8x512xf32> -> vector<8x512xf32>
    %400 = arith.addf %397, %399 : vector<8x512xf32>
    %401 = math.tanh %400 : vector<8x512xf32>
    %402 = vector.extract_strided_slice %401 {offsets = [0, 0], sizes = [8, 128], strides = [1, 1]} : vector<8x512xf32> to vector<8x128xf32>
    %cst_172 = arith.constant 5.000000e-01 : f32
    %403 = vector.broadcast %cst_172 : f32 to vector<8x128xf32>
    %404 = arith.mulf %403, %402 : vector<8x128xf32>
    %cst_173 = arith.constant 5.000000e-01 : f32
    %405 = vector.broadcast %cst_173 : f32 to vector<8x128xf32>
    %406 = arith.addf %404, %405 : vector<8x128xf32>
    %407 = vector.extract_strided_slice %401 {offsets = [0, 128], sizes = [8, 128], strides = [1, 1]} : vector<8x512xf32> to vector<8x128xf32>
    %cst_174 = arith.constant 5.000000e-01 : f32
    %408 = vector.broadcast %cst_174 : f32 to vector<8x128xf32>
    %409 = arith.mulf %408, %407 : vector<8x128xf32>
    %cst_175 = arith.constant 5.000000e-01 : f32
    %410 = vector.broadcast %cst_175 : f32 to vector<8x128xf32>
    %411 = arith.addf %409, %410 : vector<8x128xf32>
    %412 = vector.extract_strided_slice %401 {offsets = [0, 256], sizes = [8, 128], strides = [1, 1]} : vector<8x512xf32> to vector<8x128xf32>
    %413 = vector.extract_strided_slice %401 {offsets = [0, 384], sizes = [8, 128], strides = [1, 1]} : vector<8x512xf32> to vector<8x128xf32>
    %cst_176 = arith.constant 5.000000e-01 : f32
    %414 = vector.broadcast %cst_176 : f32 to vector<8x128xf32>
    %415 = arith.mulf %414, %413 : vector<8x128xf32>
    %cst_177 = arith.constant 5.000000e-01 : f32
    %416 = vector.broadcast %cst_177 : f32 to vector<8x128xf32>
    %417 = arith.addf %415, %416 : vector<8x128xf32>
    %418 = arith.mulf %411, %365 : vector<8x128xf32>
    %419 = arith.mulf %406, %412 : vector<8x128xf32>
    %420 = arith.addf %418, %419 : vector<8x128xf32>
    %421 = math.tanh %420 : vector<8x128xf32>
    %422 = arith.mulf %417, %421 : vector<8x128xf32>
    %423 = tpu.concatenate %422, %393 in 1 : vector<8x128xf32>, vector<8x128xf32> -> vector<8x256xf32>
    %c0_178 = arith.constant 0 : index
    %c0_179 = arith.constant 0 : index
    %424 = vector.load %arg5[%c0_178, %c0_179] : memref<256x512xf32, #tpu.memory_space<vmem>>, vector<256x512xf32>
    %cst_180 = arith.constant dense<0.000000e+00> : vector<8x512xf32>
    %425 = tpu.matmul %423, %424, %cst_180 {dimension_numbers = #tpu.dot_dimension_numbers<[1], [0], [0], [1], [0, 0, 1, 1], [], []>} : vector<8x256xf32>, vector<256x512xf32>, vector<8x512xf32> -> vector<8x512xf32>
    %426 = arith.addf %425, %7 : vector<8x512xf32>
    %427 = math.tanh %426 : vector<8x512xf32>
    %428 = vector.extract_strided_slice %427 {offsets = [0, 0], sizes = [8, 128], strides = [1, 1]} : vector<8x512xf32> to vector<8x128xf32>
    %cst_181 = arith.constant 5.000000e-01 : f32
    %429 = vector.broadcast %cst_181 : f32 to vector<8x128xf32>
    %430 = arith.mulf %429, %428 : vector<8x128xf32>
    %cst_182 = arith.constant 5.000000e-01 : f32
    %431 = vector.broadcast %cst_182 : f32 to vector<8x128xf32>
    %432 = arith.addf %430, %431 : vector<8x128xf32>
    %433 = vector.extract_strided_slice %427 {offsets = [0, 128], sizes = [8, 128], strides = [1, 1]} : vector<8x512xf32> to vector<8x128xf32>
    %cst_183 = arith.constant 5.000000e-01 : f32
    %434 = vector.broadcast %cst_183 : f32 to vector<8x128xf32>
    %435 = arith.mulf %434, %433 : vector<8x128xf32>
    %cst_184 = arith.constant 5.000000e-01 : f32
    %436 = vector.broadcast %cst_184 : f32 to vector<8x128xf32>
    %437 = arith.addf %435, %436 : vector<8x128xf32>
    %438 = vector.extract_strided_slice %427 {offsets = [0, 256], sizes = [8, 128], strides = [1, 1]} : vector<8x512xf32> to vector<8x128xf32>
    %439 = vector.extract_strided_slice %427 {offsets = [0, 384], sizes = [8, 128], strides = [1, 1]} : vector<8x512xf32> to vector<8x128xf32>
    %cst_185 = arith.constant 5.000000e-01 : f32
    %440 = vector.broadcast %cst_185 : f32 to vector<8x128xf32>
    %441 = arith.mulf %440, %439 : vector<8x128xf32>
    %cst_186 = arith.constant 5.000000e-01 : f32
    %442 = vector.broadcast %cst_186 : f32 to vector<8x128xf32>
    %443 = arith.addf %441, %442 : vector<8x128xf32>
    %444 = arith.mulf %437, %391 : vector<8x128xf32>
    %445 = arith.mulf %432, %438 : vector<8x128xf32>
    %446 = arith.addf %444, %445 : vector<8x128xf32>
    %447 = math.tanh %446 : vector<8x128xf32>
    %448 = arith.mulf %443, %447 : vector<8x128xf32>
    %cst_187 = arith.constant 0.000000e+00 : f32
    %449 = vector.broadcast %cst_187 : f32 to vector<8x128xf32>
    %450 = arith.maximumf %448, %449 : vector<8x128xf32>
    %c56_188 = arith.constant 56 : index
    %c0_189 = arith.constant 0 : index
    %451 = vector.load %arg11[%c56_188, %c0_189] : memref<64x128xf32, #tpu.memory_space<vmem>>, vector<8x128xf32>
    tpu.vector_store %arg11[%c56_188, %c0_189], %450 {strides = array<i32>} : memref<64x128xf32, #tpu.memory_space<vmem>>, vector<8x128xf32>,
    %c0_190 = arith.constant 0 : index
    %c0_191 = arith.constant 0 : index
    %452 = vector.load %arg11[%c0_190, %c0_191] : memref<64x128xf32, #tpu.memory_space<vmem>>, vector<64x128xf32>
    %c0_192 = arith.constant 0 : index
    %c0_193 = arith.constant 0 : index
    %453 = vector.load %arg7[%c0_192, %c0_193] : memref<128x128xf32, #tpu.memory_space<vmem>>, vector<128x128xf32>
    %cst_194 = arith.constant dense<0.000000e+00> : vector<64x128xf32>
    %454 = tpu.matmul %452, %453, %cst_194 {dimension_numbers = #tpu.dot_dimension_numbers<[1], [0], [0], [1], [0, 0, 1, 1], [], []>} : vector<64x128xf32>, vector<128x128xf32>, vector<64x128xf32> -> vector<64x128xf32>
    %c0_195 = arith.constant 0 : index
    %c0_196 = arith.constant 0 : index
    %455 = vector.load %arg8[%c0_195, %c0_196] : memref<1x128xf32, #tpu.memory_space<vmem>>, vector<1x128xf32>
    %456 = vector.broadcast %455 : vector<1x128xf32> to vector<64x128xf32>
    %457 = arith.addf %454, %456 : vector<64x128xf32>
    %c0_197 = arith.constant 0 : index
    %c0_198 = arith.constant 0 : index
    %458 = vector.load %arg9[%c0_197, %c0_198] : memref<64x128xf32, #tpu.memory_space<vmem>>, vector<64x128xf32>
    tpu.vector_store %arg9[%c0_197, %c0_198], %457 {strides = array<i32>} : memref<64x128xf32, #tpu.memory_space<vmem>>, vector<64x128xf32>,
    return
  }
  func.func @transform_0(%arg0: i32) -> (i32, i32) {
    %c0_i32 = arith.constant 0 : i32
    %c0_i32_0 = arith.constant 0 : i32
    %c0_i32_1 = arith.constant 0 : i32
    return %c0_i32, %c0_i32_0 : i32, i32
  }
  func.func @transform_1(%arg0: i32) -> (i32, i32) {
    %c0_i32 = arith.constant 0 : i32
    %c0_i32_0 = arith.constant 0 : i32
    %c0_i32_1 = arith.constant 0 : i32
    return %c0_i32, %c0_i32_0 : i32, i32
  }
  func.func @transform_2(%arg0: i32) -> (i32, i32) {
    %c0_i32 = arith.constant 0 : i32
    %c0_i32_0 = arith.constant 0 : i32
    %c0_i32_1 = arith.constant 0 : i32
    return %c0_i32, %c0_i32_0 : i32, i32
  }
  func.func @transform_3(%arg0: i32) -> (i32, i32) {
    %c0_i32 = arith.constant 0 : i32
    %c0_i32_0 = arith.constant 0 : i32
    %c0_i32_1 = arith.constant 0 : i32
    return %c0_i32, %c0_i32_0 : i32, i32
  }
  func.func @transform_4(%arg0: i32) -> (i32, i32) {
    %c0_i32 = arith.constant 0 : i32
    %c0_i32_0 = arith.constant 0 : i32
    %c0_i32_1 = arith.constant 0 : i32
    return %c0_i32, %c0_i32_0 : i32, i32
  }
  func.func @transform_5(%arg0: i32) -> (i32, i32) {
    %c0_i32 = arith.constant 0 : i32
    %c0_i32_0 = arith.constant 0 : i32
    %c0_i32_1 = arith.constant 0 : i32
    return %c0_i32, %c0_i32_0 : i32, i32
  }
  func.func @transform_6(%arg0: i32) -> (i32, i32) {
    %c0_i32 = arith.constant 0 : i32
    %c0_i32_0 = arith.constant 0 : i32
    %c0_i32_1 = arith.constant 0 : i32
    return %c0_i32, %c0_i32_0 : i32, i32
  }
  func.func @transform_7(%arg0: i32) -> (i32, i32) {
    %c0_i32 = arith.constant 0 : i32
    %c0_i32_0 = arith.constant 0 : i32
    %c0_i32_1 = arith.constant 0 : i32
    return %c0_i32, %c0_i32_0 : i32, i32
  }
  func.func @transform_8(%arg0: i32) -> (i32, i32) {
    %c0_i32 = arith.constant 0 : i32
    %c0_i32_0 = arith.constant 0 : i32
    %c0_i32_1 = arith.constant 0 : i32
    return %c0_i32, %c0_i32_0 : i32, i32
  }
}

</mosaic_0001>

<bundles_post_ra>
// kernel: tpu_custom_call.1
= control target key start
LH: loop header
LB: loop body
LE: loop exit
PB: predicated region body
PF: predicated region fallthrough
CT: control target
= control target key end

     0   :  { %13 = vsyncpa [#allocation5], 0  ;;  %s8839_s0 = inlined_call_operand.hbm [shape: f32[64,128], index: 0, kind: input, shape index: {}]   ;;  %s8840_s1 = inlined_call_operand.hbm [shape: f32[128,512], index: 1, kind: input, shape index: {}]   ;;  %s8841_s2 = inlined_call_operand.hbm [shape: f32[128,512], index: 2, kind: input, shape index: {}]   ;;  %s8842_s3 = inlined_call_operand.vmem [shape: f32[1,512], index: 3, kind: input, shape index: {}]   ;;  %s8843_s4 = inlined_call_operand.hbm [shape: f32[256,512], index: 4, kind: input, shape index: {}]   ;;  %s8844_s5 = inlined_call_operand.hbm [shape: f32[8,512], index: 5, kind: input, shape index: {}]   ;;  %s8845_s6 = inlined_call_operand.hbm [shape: f32[128,128], index: 6, kind: input, shape index: {}]   ;;  %s8846_s7 = inlined_call_operand.vmem [shape: f32[1,128], index: 7, kind: input, shape index: {}]   ;;  %s8847_s8 = inlined_call_operand.hbm [shape: f32[64,128], index: 8, kind: output, shape index: {}]  }
   0x1   :  { %14 = vsyncpa [#allocation8], 0 }
   0x2   :  { %15 = vsyncpa [#allocation11], 0 }
   0x3   :  { %16 = vsyncpa [#allocation14], 0 }
   0x4   :  { %17 = vsyncpa [#allocation6], 0  ;;  %s6871_s27 = smov [#allocation7]   ;;  %s6707_s9 = scalar_lea.hbm %s8840_s1, 8192 }
   0x5   :  { %s35_s28 = sshll.u32 %s6871_s27, 4  ;;  %p6708_p0 = scmp.ne.s32.totalorder %s8840_s1, %s6707_s9  ;;  %s36_s28 = int_to_ptr.vmem [resolvable:$true] %s35_s28 }
   0x6   :  { %p6711_p1 = scmp.lt.u32.totalorder %s6707_s9, %s8840_s1 }
   0x8   :  { %p6713_p2 = pnand %p6711_p1, %p6708_p0 }
   0xa   :  { %6716 = shalt.err (!%p6713_p2)
}
   0xb   :  { %s6717_s14 = scalar_lea.vmem %s36_s28, 8192  ;;  %p6722_p4 = scmp.lt.s32.totalorder %s36_s28, %s36_s28 }
   0xc   :  { %p6718_p3 = scmp.ne.s32.totalorder %s36_s28, %s6717_s14  ;;  %p6723_p5 = scmp.lt.s32.totalorder %s6717_s14, %s6717_s14 }
   0xe   :  { %p6724_p6 = por %p6723_p5, %p6722_p4 }
  0x10   :  { %p6725_p7 = pnand %p6724_p6, %p6718_p3 }
  0x12   :  { %6728 = shalt.err (!%p6725_p7)
}
  0x13   :  { %s6872_s15 = smov 512   ;;  %s6873_s16 = smov 32  }
  0x14   :  { %41 = dma.hbm_to_vmem [thread:$0]  %s8840_s1, 8192, %s36_s28, [#allocation8], %s6872_s15, %s6872_s15, %s6873_s16  }
  0x15   :  { %s6874_s19 = smov [#allocation10]   ;;  %s6875_s21 = smov [#allocation4]  }
  0x16   :  { %s61_s20 = sshll.u32 %s6874_s19, 4  ;;  %s23_s22 = sshll.u32 %s6875_s21, 4  ;;  %s62_s20 = int_to_ptr.vmem [resolvable:$true] %s61_s20  ;;  %s24_s22 = int_to_ptr.vmem [resolvable:$true] %s23_s22 }
  0x17   :  { %s6729_s25 = scalar_lea.hbm %s8843_s4, 16384 }
  0x18   :  { %p6730_p8 = scmp.ne.s32.totalorder %s8843_s4, %s6729_s25  ;;  %p6733_p9 = scmp.lt.u32.totalorder %s6729_s25, %s8843_s4 }
  0x1a   :  { %p6735_p10 = pnand %p6733_p9, %p6730_p8 }
  0x1c   :  { %6738 = shalt.err (!%p6735_p10)
}
  0x1d   :  { %s6739_s1 = scalar_lea.vmem %s62_s20, 16384  ;;  %p6744_p12 = scmp.lt.s32.totalorder %s62_s20, %s62_s20 }
  0x1e   :  { %p6740_p11 = scmp.ne.s32.totalorder %s62_s20, %s6739_s1  ;;  %p6745_p13 = scmp.lt.s32.totalorder %s6739_s1, %s6739_s1 }
  0x20   :  { %p6746_p0 = por %p6745_p13, %p6744_p12 }
  0x22   :  { %p6747_p1 = pnand %p6746_p0, %p6740_p11 }
  0x24   :  { %6750 = shalt.err (!%p6747_p1)
}
  0x25   :  { %67 = dma.hbm_to_vmem [thread:$0]  %s8843_s4, 16384, %s62_s20, [#allocation11], %s6872_s15, %s6872_s15, %s6873_s16  }
  0x26   :  { %s6751_s12 = scalar_lea.hbm %s8839_s0, 1024 }
  0x27   :  { %p6752_p2 = scmp.ne.s32.totalorder %s8839_s0, %s6751_s12  ;;  %p6755_p3 = scmp.lt.u32.totalorder %s6751_s12, %s8839_s0 }
  0x29   :  { %p6757_p4 = pnand %p6755_p3, %p6752_p2 }
  0x2b   :  { %6760 = shalt.err (!%p6757_p4)
}
  0x2c   :  { %s6761_s19 = scalar_lea.vmem %s24_s22, 1024  ;;  %p6766_p6 = scmp.lt.s32.totalorder %s24_s22, %s24_s22 }
  0x2d   :  { %p6762_p5 = scmp.ne.s32.totalorder %s24_s22, %s6761_s19  ;;  %p6767_p7 = scmp.lt.s32.totalorder %s6761_s19, %s6761_s19 }
  0x2f   :  { %p6768_p8 = por %p6767_p7, %p6766_p6 }
  0x31   :  { %p6769_p9 = pnand %p6768_p8, %p6762_p5 }
  0x33   :  { %6772 = shalt.err (!%p6769_p9)
}
  0x34   :  { %s6876_s4 = smov 128   ;;  %s6877_s20 = smov 8  }
  0x35   :  { %29 = dma.hbm_to_vmem [thread:$0]  %s8839_s0, 1024, %s24_s22, [#allocation5], %s6876_s4, %s6876_s4, %s6877_s20  }
  0x36   :  { %s6878_s24 = smov [#allocation9]   ;;  %s6879_s26 = smov [#allocation12]  }
  0x37   :  { %s47_s25 = sshll.u32 %s6878_s24, 4  ;;  %s74_s27 = sshll.u32 %s6879_s26, 4  ;;  %s48_s25 = int_to_ptr.vmem [resolvable:$true] %s47_s25  ;;  %s75_s27 = int_to_ptr.vmem [resolvable:$true] %s74_s27 }
  0x38   :  { %s6773_s1 = scalar_lea.hbm %s8841_s2, 8192 }
  0x39   :  { %p6774_p10 = scmp.ne.s32.totalorder %s8841_s2, %s6773_s1  ;;  %p6777_p11 = scmp.lt.u32.totalorder %s6773_s1, %s8841_s2 }
  0x3b   :  { %p6779_p12 = pnand %p6777_p11, %p6774_p10 }
  0x3d   :  { %6782 = shalt.err (!%p6779_p12)
}
  0x3e   :  { %s6783_s0 = scalar_lea.vmem %s48_s25, 8192  ;;  %p6788_p0 = scmp.lt.s32.totalorder %s48_s25, %s48_s25 }
  0x3f   :  { %p6784_p13 = scmp.ne.s32.totalorder %s48_s25, %s6783_s0  ;;  %p6789_p1 = scmp.lt.s32.totalorder %s6783_s0, %s6783_s0 }
  0x41   :  { %p6790_p2 = por %p6789_p1, %p6788_p0 }
  0x43   :  { %p6791_p3 = pnand %p6790_p2, %p6784_p13 }
  0x45   :  { %6794 = shalt.err (!%p6791_p3)
}
  0x46   :  { %53 = dma.hbm_to_vmem [thread:$0]  %s8841_s2, 8192, %s48_s25, [#allocation8], %s6872_s15, %s6872_s15, %s6873_s16  }
  0x47   :  { %s6795_s17 = scalar_lea.hbm %s8844_s5, 512 }
  0x48   :  { %p6796_p4 = scmp.ne.s32.totalorder %s8844_s5, %s6795_s17  ;;  %p6799_p5 = scmp.lt.u32.totalorder %s6795_s17, %s8844_s5 }
  0x4a   :  { %p6801_p6 = pnand %p6799_p5, %p6796_p4 }
  0x4c   :  { %6804 = shalt.err (!%p6801_p6)
}
  0x4d   :  { %s6805_s24 = scalar_lea.vmem %s75_s27, 512  ;;  %p6810_p8 = scmp.lt.s32.totalorder %s75_s27, %s75_s27 }
  0x4e   :  { %p6806_p7 = scmp.ne.s32.totalorder %s75_s27, %s6805_s24  ;;  %p6811_p9 = scmp.lt.s32.totalorder %s6805_s24, %s6805_s24 }
  0x50   :  { %p6812_p10 = por %p6811_p9, %p6810_p8 }
  0x52   :  { %p6813_p11 = pnand %p6812_p10, %p6806_p7 }
  0x54   :  { %6816 = shalt.err (!%p6813_p11)
}
  0x55   :  { %77 = dma.hbm_to_vmem [thread:$0]  %s8844_s5, 512, %s75_s27, [#allocation11]  }
  0x56   :  { %s6880_s16 = smov [#allocation13]   ;;  %s6817_s30 = scalar_lea.hbm %s8845_s6, 2048 }
  0x57   :  { %s83_s25 = sshll.u32 %s6880_s16, 4  ;;  %p6818_p12 = scmp.ne.s32.totalorder %s8845_s6, %s6817_s30  ;;  %s84_s25 = int_to_ptr.vmem [resolvable:$true] %s83_s25 }
  0x58   :  { %p6821_p13 = scmp.lt.u32.totalorder %s6817_s30, %s8845_s6 }
  0x5a   :  { %p6823_p0 = pnand %p6821_p13, %p6818_p12 }
  0x5c   :  { %6826 = shalt.err (!%p6823_p0)
}
  0x5d   :  { %s6827_s11 = scalar_lea.vmem %s84_s25, 2048  ;;  %p6832_p2 = scmp.lt.s32.totalorder %s84_s25, %s84_s25 }
  0x5e   :  { %p6828_p1 = scmp.ne.s32.totalorder %s84_s25, %s6827_s11  ;;  %p6833_p3 = scmp.lt.s32.totalorder %s6827_s11, %s6827_s11 }
  0x60   :  { %p6834_p4 = por %p6833_p3, %p6832_p2 }
  0x62   :  { %p6835_p5 = pnand %p6834_p4, %p6828_p1 }
  0x64   :  { %6838 = shalt.err (!%p6835_p5)
}
  0x65   :  { %89 = dma.hbm_to_vmem [thread:$0]  %s8845_s6, 2048, %s84_s25, [#allocation14], %s6876_s4, %s6876_s4, %s6877_s20  }
  0x66   :  { %6861 = dma.done.wait [#allocation5], 1024  }
  0x67   :  { %6862 = vsyncadd [#allocation5], 4294966272 }
  0x68   :  { %6863 = dma.done.wait [#allocation8], 16384  }
  0x69   :  { %6864 = vsyncadd [#allocation8], 4294950912 }
  0x6a   :  { %6865 = dma.done.wait [#allocation11], 16896  }
  0x6b   :  { %6866 = vsyncadd [#allocation11], 4294950400 }
  0x6c   :  { %6867 = dma.done.wait [#allocation14], 2048  }
  0x6d   :  { %6868 = vsyncadd [#allocation14], 4294965248  ;;  %v8848_v0 = vmov 0.0   ;;  %v119_v1 = vld [vmem:[#allocation7 + $0x8] sm:$0xff]  ;;  %v118_v3 = vld [vmem:[#allocation7] sm:$0xff] }
  0x6e   :  { %268 = vmatprep.mubr.f32.mxu1 %v8848_v0  ;;  %598 = vmatprep.mubr.f32.mxu0 %v8848_v0  ;;  %v123_v2 = vld [vmem:[#allocation7 + $0x28] sm:$0xff]  ;;  %v122_v5 = vld [vmem:[#allocation7 + $0x20] sm:$0xff] }
  0x6f   :  { %v4827_v4 = vpack.c.bf16 %v123_v2, %v119_v1  ;;  %v471_v6 = vld [vmem:[#allocation9 + $0x8] sm:$0xff]  ;;  %v4829_v8 = vpack.c.bf16 %v122_v5, %v118_v3  ;;  %v470_v10 = vld [vmem:[#allocation9] sm:$0xff] }
  0x70   :  { %v475_v7 = vld [vmem:[#allocation9 + $0x28] sm:$0xff]  ;;  %v474_v11 = vld [vmem:[#allocation9 + $0x20] sm:$0xff] }
  0x71   :  { %v4891_v9 = vpack.c.bf16 %v475_v7, %v471_v6  ;;  %v127_v12 = vld [vmem:[#allocation7 + $0x48] sm:$0xff]  ;;  %4828 = vmatprep.subr.bf16.mxu1 %v4827_v4  ;;  %v4893_v13 = vpack.c.bf16 %v474_v11, %v470_v10  ;;  %v126_v15 = vld [vmem:[#allocation7 + $0x40] sm:$0xff] }
  0x72   :  { %v131_v14 = vld [vmem:[#allocation7 + $0x68] sm:$0xff]  ;;  %v130_v16 = vld [vmem:[#allocation7 + $0x60] sm:$0xff]  ;;  %4830 = vmatpush1.bf16.msra.mxu1 %v4829_v8 }
  0x73   :  { %4892 = vmatprep.subr.bf16.mxu0 %v4891_v9  ;;  %v4831_v17 = vpack.c.bf16 %v131_v14, %v127_v12  ;;  %v4833_v18 = vpack.c.bf16 %v130_v16, %v126_v15  ;;  %v479_v19 = vld [vmem:[#allocation9 + $0x48] sm:$0xff]  ;;  %v478_v21 = vld [vmem:[#allocation9 + $0x40] sm:$0xff] }
  0x74   :  { %v483_v20 = vld [vmem:[#allocation9 + $0x68] sm:$0xff]  ;;  %4894 = vmatpush1.bf16.msra.mxu0 %v4893_v13  ;;  %v482_v23 = vld [vmem:[#allocation9 + $0x60] sm:$0xff] }
  0x75   :  { %v4895_v22 = vpack.c.bf16 %v483_v20, %v479_v19  ;;  %v135_v24 = vld [vmem:[#allocation7 + $0x88] sm:$0xff]  ;;  %4832 = vmatprep.subr.bf16.mxu1 %v4831_v17  ;;  %v4897_v26 = vpack.c.bf16 %v482_v23, %v478_v21  ;;  %v134_v28 = vld [vmem:[#allocation7 + $0x80] sm:$0xff] }
  0x76   :  { %v139_v25 = vld [vmem:[#allocation7 + $0xa8] sm:$0xff]  ;;  %v138_v29 = vld [vmem:[#allocation7 + $0xa0] sm:$0xff]  ;;  %4834 = vmatpush1.bf16.msra.mxu1 %v4833_v18 }
  0x77   :  { %v4835_v27 = vpack.c.bf16 %v139_v25, %v135_v24  ;;  %v487_v30 = vld [vmem:[#allocation9 + $0x88] sm:$0xff]  ;;  %4896 = vmatprep.subr.bf16.mxu0 %v4895_v22  ;;  %v486_v32 = vld [vmem:[#allocation9 + $0x80] sm:$0xff]  ;;  %v4837_v34 = vpack.c.bf16 %v138_v29, %v134_v28 }
  0x78   :  { %v491_v31 = vld [vmem:[#allocation9 + $0xa8] sm:$0xff]  ;;  %v490_v33 = vld [vmem:[#allocation9 + $0xa0] sm:$0xff]  ;;  %4898 = vmatpush1.bf16.msra.mxu0 %v4897_v26 }
  0x79   :  { %v4899_v35 = vpack.c.bf16 %v491_v31, %v487_v30  ;;  %v143_v36 = vld [vmem:[#allocation7 + $0xc8] sm:$0xff]  ;;  %v142_v38 = vld [vmem:[#allocation7 + $0xc0] sm:$0xff]  ;;  %4836 = vmatprep.subr.bf16.mxu1 %v4835_v27  ;;  %v4901_v39 = vpack.c.bf16 %v490_v33, %v486_v32  ;;  %v121_v32 = vld [vmem:[#allocation7 + $0x18] sm:$0xff] }
  0x7a   :  { %v147_v37 = vld [vmem:[#allocation7 + $0xe8] sm:$0xff]  ;;  %v146_v41 = vld [vmem:[#allocation7 + $0xe0] sm:$0xff]  ;;  %4838 = vmatpush1.bf16.msra.mxu1 %v4837_v34  ;;  %v125_v33 = vld [vmem:[#allocation7 + $0x38] sm:$0xff] }
  0x7b   :  { %v4839_v40 = vpack.c.bf16 %v147_v37, %v143_v36  ;;  %v495_v42 = vld [vmem:[#allocation9 + $0xc8] sm:$0xff]  ;;  %4900 = vmatprep.subr.bf16.mxu0 %v4899_v35  ;;  %v494_v45 = vld [vmem:[#allocation9 + $0xc0] sm:$0xff]  ;;  %v4841_v49 = vpack.c.bf16 %v146_v41, %v142_v38  ;;  %v4859_v36 = vpack.c.bf16 %v125_v33, %v121_v32  ;;  %v120_v37 = vld [vmem:[#allocation7 + $0x10] sm:$0xff] }
  0x7c   :  { %v499_v43 = vld [vmem:[#allocation9 + $0xe8] sm:$0xff]  ;;  %v498_v46 = vld [vmem:[#allocation9 + $0xe0] sm:$0xff]  ;;  %4902 = vmatpush1.bf16.msra.mxu0 %v4901_v39  ;;  %v124_v38 = vld [vmem:[#allocation7 + $0x30] sm:$0xff] }
  0x7d   :  { %v4903_v44 = vpack.c.bf16 %v499_v43, %v495_v42  ;;  %v151_v47 = vld [vmem:[#allocation7 + $0x108] sm:$0xff]  ;;  %4840 = vmatprep.subr.bf16.mxu1 %v4839_v40  ;;  %v4905_v52 = vpack.c.bf16 %v498_v46, %v494_v45  ;;  %v150_v54 = vld [vmem:[#allocation7 + $0x100] sm:$0xff]  ;;  %v129_v39 = vld [vmem:[#allocation7 + $0x58] sm:$0xff]  ;;  %v4861_v42 = vpack.c.bf16 %v124_v38, %v120_v37 }
  0x7e   :  { %v155_v48 = vld [vmem:[#allocation7 + $0x128] sm:$0xff]  ;;  %v154_v55 = vld [vmem:[#allocation7 + $0x120] sm:$0xff]  ;;  %4842 = vmatpush1.bf16.msra.mxu1 %v4841_v49  ;;  %v133_v40 = vld [vmem:[#allocation7 + $0x78] sm:$0xff] }
  0x7f   :  { %v503_v50 = vld [vmem:[#allocation9 + $0x108] sm:$0xff]  ;;  %v4843_v53 = vpack.c.bf16 %v155_v48, %v151_v47  ;;  %v502_v56 = vld [vmem:[#allocation9 + $0x100] sm:$0xff]  ;;  %4904 = vmatprep.subr.bf16.mxu0 %v4903_v44  ;;  %v4845_v63 = vpack.c.bf16 %v154_v55, %v150_v54  ;;  %v4863_v43 = vpack.c.bf16 %v133_v40, %v129_v39  ;;  %v128_v44 = vld [vmem:[#allocation7 + $0x50] sm:$0xff] }
  0x80   :  { %v507_v51 = vld [vmem:[#allocation9 + $0x128] sm:$0xff]  ;;  %v506_v58 = vld [vmem:[#allocation9 + $0x120] sm:$0xff]  ;;  %4906 = vmatpush1.bf16.msra.mxu0 %v4905_v52  ;;  %v132_v45 = vld [vmem:[#allocation7 + $0x70] sm:$0xff] }
  0x81   :  { %v4907_v57 = vpack.c.bf16 %v507_v51, %v503_v50  ;;  %v159_v59 = vld [vmem:[#allocation7 + $0x148] sm:$0xff]  ;;  %4844 = vmatprep.subr.bf16.mxu1 %v4843_v53  ;;  %v4909_v1 = vpack.c.bf16 %v506_v58, %v502_v56  ;;  %v158_v3 = vld [vmem:[#allocation7 + $0x140] sm:$0xff]  ;;  %v137_v46 = vld [vmem:[#allocation7 + $0x98] sm:$0xff]  ;;  %v4865_v49 = vpack.c.bf16 %v132_v45, %v128_v44 }
  0x82   :  { %v163_v60 = vld [vmem:[#allocation7 + $0x168] sm:$0xff]  ;;  %v162_v4 = vld [vmem:[#allocation7 + $0x160] sm:$0xff]  ;;  %4846 = vmatpush1.bf16.msra.mxu1 %v4845_v63  ;;  %v141_v47 = vld [vmem:[#allocation7 + $0xb8] sm:$0xff] }
  0x83   :  { %v511_v61 = vld [vmem:[#allocation9 + $0x148] sm:$0xff]  ;;  %v4847_v2 = vpack.c.bf16 %v163_v60, %v159_v59  ;;  %v510_v5 = vld [vmem:[#allocation9 + $0x140] sm:$0xff]  ;;  %4908 = vmatprep.subr.bf16.mxu0 %v4907_v57  ;;  %v4849_v12 = vpack.c.bf16 %v162_v4, %v158_v3  ;;  %v4867_v50 = vpack.c.bf16 %v141_v47, %v137_v46  ;;  %v136_v51 = vld [vmem:[#allocation7 + $0x90] sm:$0xff] }
  0x84   :  { %v515_v62 = vld [vmem:[#allocation9 + $0x168] sm:$0xff]  ;;  %v514_v7 = vld [vmem:[#allocation9 + $0x160] sm:$0xff]  ;;  %4910 = vmatpush1.bf16.msra.mxu0 %v4909_v1  ;;  %v140_v52 = vld [vmem:[#allocation7 + $0xb0] sm:$0xff] }
  0x85   :  { %v4911_v6 = vpack.c.bf16 %v515_v62, %v511_v61  ;;  %v167_v8 = vld [vmem:[#allocation7 + $0x188] sm:$0xff]  ;;  %4848 = vmatprep.subr.bf16.mxu1 %v4847_v2  ;;  %v4913_v13 = vpack.c.bf16 %v514_v7, %v510_v5  ;;  %v166_v15 = vld [vmem:[#allocation7 + $0x180] sm:$0xff]  ;;  %v145_v53 = vld [vmem:[#allocation7 + $0xd8] sm:$0xff]  ;;  %v4869_v56 = vpack.c.bf16 %v140_v52, %v136_v51 }
  0x86   :  { %v171_v9 = vld [vmem:[#allocation7 + $0x1a8] sm:$0xff]  ;;  %v170_v16 = vld [vmem:[#allocation7 + $0x1a0] sm:$0xff]  ;;  %4850 = vmatpush1.bf16.msra.mxu1 %v4849_v12  ;;  %v149_v54 = vld [vmem:[#allocation7 + $0xf8] sm:$0xff] }
  0x87   :  { %v519_v10 = vld [vmem:[#allocation9 + $0x188] sm:$0xff]  ;;  %v4851_v14 = vpack.c.bf16 %v171_v9, %v167_v8  ;;  %v518_v17 = vld [vmem:[#allocation9 + $0x180] sm:$0xff]  ;;  %4912 = vmatprep.subr.bf16.mxu0 %v4911_v6  ;;  %v4853_v24 = vpack.c.bf16 %v170_v16, %v166_v15  ;;  %v7027_v55 = vld [vmem:[#allocation4 + $0x10] sm:$0xff]  ;;  %v4871_v57 = vpack.c.bf16 %v149_v54, %v145_v53 }
  0x88   :  { %v523_v11 = vld [vmem:[#allocation9 + $0x1a8] sm:$0xff]  ;;  %v522_v19 = vld [vmem:[#allocation9 + $0x1a0] sm:$0xff]  ;;  %4914 = vmatpush1.bf16.msra.mxu0 %v4913_v13  ;;  %v144_v58 = vld [vmem:[#allocation7 + $0xd0] sm:$0xff] }
  0x89   :  { %v4915_v18 = vpack.c.bf16 %v523_v11, %v519_v10  ;;  %v175_v20 = vld [vmem:[#allocation7 + $0x1c8] sm:$0xff]  ;;  %4852 = vmatprep.subr.bf16.mxu1 %v4851_v14  ;;  %v4917_v25 = vpack.c.bf16 %v522_v19, %v518_v17  ;;  %v174_v27 = vld [vmem:[#allocation7 + $0x1c0] sm:$0xff]  ;;  %v148_v59 = vld [vmem:[#allocation7 + $0xf0] sm:$0xff] }
  0x8a   :  { %v179_v21 = vld [vmem:[#allocation7 + $0x1e8] sm:$0xff]  ;;  %v178_v28 = vld [vmem:[#allocation7 + $0x1e0] sm:$0xff]  ;;  %4854 = vmatpush1.bf16.msra.mxu1 %v4853_v24  ;;  %v153_v60 = vld [vmem:[#allocation7 + $0x118] sm:$0xff]  ;;  %v4873_v63 = vpack.c.bf16 %v148_v59, %v144_v58 }
  0x8b   :  { %v527_v22 = vld [vmem:[#allocation9 + $0x1c8] sm:$0xff]  ;;  %v4855_v26 = vpack.c.bf16 %v179_v21, %v175_v20  ;;  %v526_v29 = vld [vmem:[#allocation9 + $0x1c0] sm:$0xff]  ;;  %4916 = vmatprep.subr.bf16.mxu0 %v4915_v18  ;;  %v4857_v34 = vpack.c.bf16 %v178_v28, %v174_v27  ;;  %v157_v61 = vld [vmem:[#allocation7 + $0x138] sm:$0xff] }
  0x8c   :  { %v531_v23 = vld [vmem:[#allocation9 + $0x1e8] sm:$0xff]  ;;  %v530_v31 = vld [vmem:[#allocation9 + $0x1e0] sm:$0xff]  ;;  %4918 = vmatpush1.bf16.msra.mxu0 %v4917_v25  ;;  %v7031_v62 = vld [vmem:[#allocation4 + $0x18] sm:$0xff]  ;;  %v4875_v1 = vpack.c.bf16 %v157_v61, %v153_v60 }
  0x8d   :  { %v4919_v30 = vpack.c.bf16 %v531_v23, %v527_v22  ;;  %4856 = vmatprep.subr.bf16.mxu1 %v4855_v26  ;;  %v4921_v35 = vpack.c.bf16 %v530_v31, %v526_v29  ;;  %v7017_v41 = vld [vmem:[#allocation4] sm:$0xff]  ;;  %v7021_v48 = vld [vmem:[#allocation4 + $0x8] sm:$0xff]  ;;  %v152_v2 = vld [vmem:[#allocation7 + $0x110] sm:$0xff] }
  0x8e   :  { %4858 = vmatpush1.bf16.msra.mxu1 %v4857_v34  ;;  %v156_v3 = vld [vmem:[#allocation7 + $0x130] sm:$0xff]  ;;  %v161_v4 = vld [vmem:[#allocation7 + $0x158] sm:$0xff]  ;;  %v7035_v6 = vld [vmem:[#allocation4 + $0x20] sm:$0xff] }
  0x8f   :  { %4920 = vmatprep.subr.bf16.mxu0 %v4919_v30  ;;  %4860 = vmatprep.subr.bf16.mxu1 %v4859_v36  ;;  %v165_v5 = vld [vmem:[#allocation7 + $0x178] sm:$0xff]  ;;  %v4877_v7 = vpack.c.bf16 %v156_v3, %v152_v2  ;;  %v160_v9 = vld [vmem:[#allocation7 + $0x150] sm:$0xff]  ;;  %v7039_v13 = vld [vmem:[#allocation4 + $0x28] sm:$0xff] }
  0x90   :  { %4922 = vmatpush1.bf16.msra.mxu0 %v4921_v35  ;;  %v4879_v8 = vpack.c.bf16 %v165_v5, %v161_v4  ;;  %v164_v10 = vld [vmem:[#allocation7 + $0x170] sm:$0xff]  ;;  %v169_v11 = vld [vmem:[#allocation7 + $0x198] sm:$0xff] }
  0x91   :  { %269 = vmatmul.mubr.f32.vlgmr.msra.gmra.mrb[0].mxu1 %v7017_v41  ;;  %v173_v12 = vld [vmem:[#allocation7 + $0x1b8] sm:$0xff]  ;;  %v4881_v14 = vpack.c.bf16 %v164_v10, %v160_v9  ;;  %v168_v16 = vld [vmem:[#allocation7 + $0x190] sm:$0xff] }
  0x92   :  { %4862 = vmatpush1.bf16.msra.mxu1 %v4861_v42  ;;  %274 = vmatprep.mubr.f32.mxu1 %v8848_v0  ;;  %v4883_v15 = vpack.c.bf16 %v173_v12, %v169_v11  ;;  %v172_v17 = vld [vmem:[#allocation7 + $0x1b0] sm:$0xff]  ;;  %v177_v18 = vld [vmem:[#allocation7 + $0x1d8] sm:$0xff]  ;;  %v696_v12 = vld [vmem:[#allocation10 + $0x8] sm:$0xff] }
  0x93   :  { %599 = vmatmul.mubr.f32.vlgmr.msra.gmra.mrb[0].mxu0 %v8848_v0  ;;  %4864 = vmatprep.subr.bf16.mxu1 %v4863_v43  ;;  %v181_v19 = vld [vmem:[#allocation7 + $0x1f8] sm:$0xff]  ;;  %v7043_v20 = vld [vmem:[#allocation4 + $0x30] sm:$0xff]  ;;  %v4885_v21 = vpack.c.bf16 %v172_v17, %v168_v16  ;;  %v695_v17 = vld [vmem:[#allocation10] sm:$0xff] }
  0x94   :  { %887 = vmatprep.mubr.f32.mxu0 %v8848_v0  ;;  %v4887_v22 = vpack.c.bf16 %v181_v19, %v177_v18  ;;  %v176_v23 = vld [vmem:[#allocation7 + $0x1d0] sm:$0xff]  ;;  %v473_v25 = vld [vmem:[#allocation9 + $0x18] sm:$0xff]  ;;  %v699_v18 = vld [vmem:[#allocation10 + $0x20] sm:$0xff] }
  0x95   :  { %275 = vmatmul.mubr.f32.gmra.mrb[2].mxu1 %v7021_v48  ;;  %v180_v24 = vld [vmem:[#allocation7 + $0x1f0] sm:$0xff]  ;;  %v477_v26 = vld [vmem:[#allocation9 + $0x38] sm:$0xff] }
  0x96   :  { %4866 = vmatpush1.bf16.msra.mxu1 %v4865_v49  ;;  %280 = vmatprep.mubr.f32.mxu1 %v8848_v0  ;;  %v7047_v27 = vld [vmem:[#allocation4 + $0x38] sm:$0xff]  ;;  %v4889_v28 = vpack.c.bf16 %v180_v24, %v176_v23  ;;  %v7049_v29 = vpack.c.bf16 %v477_v26, %v473_v25  ;;  %v472_v30 = vld [vmem:[#allocation9 + $0x10] sm:$0xff]  ;;  %v704_v24 = vld [vmem:[#allocation10 + $0x48] sm:$0xff] }
  0x97   :  { %4868 = vmatprep.subr.bf16.mxu1 %v4867_v50  ;;  %v476_v31 = vld [vmem:[#allocation9 + $0x30] sm:$0xff]  ;;  %v481_v32 = vld [vmem:[#allocation9 + $0x58] sm:$0xff]  ;;  %v708_v25 = vld [vmem:[#allocation10 + $0x68] sm:$0xff] }
  0x98   :  { %v485_v33 = vld [vmem:[#allocation9 + $0x78] sm:$0xff]  ;;  %v7053_v34 = vpack.c.bf16 %v476_v31, %v472_v30  ;;  %v480_v36 = vld [vmem:[#allocation9 + $0x50] sm:$0xff]  ;;  %v703_v30 = vld [vmem:[#allocation10 + $0x40] sm:$0xff] }
  0x99   :  { %281 = vmatmul.mubr.f32.gmra.mrb[4].mxu1 %v7027_v55  ;;  %v7056_v35 = vpack.c.bf16 %v485_v33, %v481_v32  ;;  %v484_v37 = vld [vmem:[#allocation9 + $0x70] sm:$0xff]  ;;  %v489_v38 = vld [vmem:[#allocation9 + $0x98] sm:$0xff]  ;;  %v707_v31 = vld [vmem:[#allocation10 + $0x60] sm:$0xff] }
  0x9a   :  { %4870 = vmatpush1.bf16.msra.mxu1 %v4869_v56  ;;  %286 = vmatprep.mubr.f32.mxu1 %v8848_v0  ;;  %v493_v39 = vld [vmem:[#allocation9 + $0xb8] sm:$0xff]  ;;  %v7061_v40 = vpack.c.bf16 %v484_v37, %v480_v36  ;;  %v488_v43 = vld [vmem:[#allocation9 + $0x90] sm:$0xff]  ;;  %v7133_v33 = vpack.c.bf16 %v707_v31, %v703_v30  ;;  %v740_v30 = vld [vmem:[#allocation10 + $0x168] sm:$0xff] }
  0x9b   :  { %4872 = vmatprep.subr.bf16.mxu1 %v4871_v57  ;;  %v7064_v42 = vpack.c.bf16 %v493_v39, %v489_v38  ;;  %v492_v44 = vld [vmem:[#allocation9 + $0xb0] sm:$0xff]  ;;  %v497_v45 = vld [vmem:[#allocation9 + $0xd8] sm:$0xff]  ;;  %v712_v38 = vld [vmem:[#allocation10 + $0x88] sm:$0xff] }
  0x9c   :  { %v501_v46 = vld [vmem:[#allocation9 + $0xf8] sm:$0xff]  ;;  %v496_v49 = vld [vmem:[#allocation9 + $0xd0] sm:$0xff] }
  0x9d   :  { %287 = vmatmul.mubr.f32.gmra.mrb[6].mxu1 %v7031_v62  ;;  %v7072_v47 = vpack.c.bf16 %v501_v46, %v497_v45  ;;  %v500_v50 = vld [vmem:[#allocation9 + $0xf0] sm:$0xff]  ;;  %v505_v51 = vld [vmem:[#allocation9 + $0x118] sm:$0xff] }
  0x9e   :  { %4874 = vmatpush1.bf16.msra.mxu1 %v4873_v63  ;;  %292 = vmatprep.mubr.f32.mxu1 %v8848_v0  ;;  %v509_v52 = vld [vmem:[#allocation9 + $0x138] sm:$0xff]  ;;  %v504_v54 = vld [vmem:[#allocation9 + $0x110] sm:$0xff] }
  0x9f   :  { %4876 = vmatprep.subr.bf16.mxu1 %v4875_v1  ;;  %v7080_v53 = vpack.c.bf16 %v509_v52, %v505_v51  ;;  %v508_v56 = vld [vmem:[#allocation9 + $0x130] sm:$0xff]  ;;  %v513_v57 = vld [vmem:[#allocation9 + $0x158] sm:$0xff]  ;;  %v715_v51 = vld [vmem:[#allocation10 + $0xa0] sm:$0xff] }
  0xa0   :  { %v517_v58 = vld [vmem:[#allocation9 + $0x178] sm:$0xff]  ;;  %v512_v60 = vld [vmem:[#allocation9 + $0x150] sm:$0xff] }
  0xa1   :  { %293 = vmatmul.mubr.f32.gmra.mrb[8].mxu1 %v7035_v6  ;;  %v7088_v59 = vpack.c.bf16 %v517_v58, %v513_v57  ;;  %v516_v61 = vld [vmem:[#allocation9 + $0x170] sm:$0xff]  ;;  %v521_v63 = vld [vmem:[#allocation9 + $0x198] sm:$0xff]  ;;  %v720_v57 = vld [vmem:[#allocation10 + $0xc8] sm:$0xff] }
  0xa2   :  { %4878 = vmatpush1.bf16.msra.mxu1 %v4877_v7  ;;  %298 = vmatprep.mubr.f32.mxu1 %v8848_v0  ;;  %v525_v1 = vld [vmem:[#allocation9 + $0x1b8] sm:$0xff]  ;;  %v520_v3 = vld [vmem:[#allocation9 + $0x190] sm:$0xff]  ;;  %v724_v58 = vld [vmem:[#allocation10 + $0xe8] sm:$0xff] }
  0xa3   :  { %4880 = vmatprep.subr.bf16.mxu1 %v4879_v8  ;;  %v7096_v2 = vpack.c.bf16 %v525_v1, %v521_v63  ;;  %v524_v4 = vld [vmem:[#allocation9 + $0x1b0] sm:$0xff]  ;;  %v529_v5 = vld [vmem:[#allocation9 + $0x1d8] sm:$0xff] }
  0xa4   :  { %v533_v7 = vld [vmem:[#allocation9 + $0x1f8] sm:$0xff]  ;;  %v528_v9 = vld [vmem:[#allocation9 + $0x1d0] sm:$0xff] }
  0xa5   :  { %299 = vmatmul.mubr.f32.gmra.mrb[10].mxu1 %v7039_v13  ;;  %v7104_v8 = vpack.c.bf16 %v533_v7, %v529_v5  ;;  %v532_v10 = vld [vmem:[#allocation9 + $0x1f0] sm:$0xff]  ;;  %v702_v16 = vld [vmem:[#allocation10 + $0x38] sm:$0xff]  ;;  %v723_v5 = vld [vmem:[#allocation10 + $0xe0] sm:$0xff] }
  0xa6   :  { %4882 = vmatpush1.bf16.msra.mxu1 %v4881_v14  ;;  %304 = vmatprep.mubr.f32.mxu1 %v8848_v0  ;;  %v7109_v11 = vpack.c.bf16 %v532_v10, %v528_v9  ;;  %v698_v14 = vld [vmem:[#allocation10 + $0x18] sm:$0xff]  ;;  %v705_v36 = vld [vmem:[#allocation10 + $0x50] sm:$0xff]  ;;  %v728_v10 = vld [vmem:[#allocation10 + $0x108] sm:$0xff] }
  0xa7   :  { %4884 = vmatprep.subr.bf16.mxu1 %v4883_v15  ;;  %v7119_v19 = vpack.c.bf16 %v702_v16, %v698_v14  ;;  %v706_v26 = vld [vmem:[#allocation10 + $0x58] sm:$0xff]  ;;  %v709_v37 = vld [vmem:[#allocation10 + $0x70] sm:$0xff] }
  0xa8   :  { %v7136_v39 = vpack.c.bf16 %v709_v37, %v705_v36  ;;  %v718_v45 = vld [vmem:[#allocation10 + $0xb8] sm:$0xff]  ;;  %v713_v52 = vld [vmem:[#allocation10 + $0x90] sm:$0xff] }
  0xa9   :  { %305 = vmatmul.mubr.f32.gmra.mrb[12].mxu1 %v7043_v20  ;;  %v722_v63 = vld [vmem:[#allocation10 + $0xd8] sm:$0xff]  ;;  %v721_v7 = vld [vmem:[#allocation10 + $0xd0] sm:$0xff] }
  0xaa   :  { %4886 = vmatpush1.bf16.msra.mxu1 %v4885_v21  ;;  %310 = vmatprep.mubr.f32.mxu1 %v8848_v0  ;;  %v697_v21 = vld [vmem:[#allocation10 + $0x10] sm:$0xff]  ;;  %v726_v1 = vld [vmem:[#allocation10 + $0xf8] sm:$0xff] }
  0xab   :  { %4888 = vmatprep.subr.bf16.mxu1 %v4887_v22  ;;  %v701_v22 = vld [vmem:[#allocation10 + $0x30] sm:$0xff]  ;;  %v734_v16 = vld [vmem:[#allocation10 + $0x138] sm:$0xff] }
  0xac   :  { %v7124_v23 = vpack.c.bf16 %v701_v22, %v697_v21  ;;  %v725_v9 = vld [vmem:[#allocation10 + $0xf0] sm:$0xff]  ;;  %v727_v21 = vld [vmem:[#allocation10 + $0x100] sm:$0xff]  ;;  %v738_v31 = vld [vmem:[#allocation10 + $0x158] sm:$0xff] }
  0xad   :  { %311 = vmatmul.mubr.f32.gmra.mrb[14].mxu1 %v7047_v27  ;;  %v731_v22 = vld [vmem:[#allocation10 + $0x120] sm:$0xff]  ;;  %v742_v36 = vld [vmem:[#allocation10 + $0x178] sm:$0xff] }
  0xae   :  { %4890 = vmatpush1.bf16.msra.mxu1 %v4889_v28  ;;  %381 = vmatprep.mubr.f32.mxu1 %v8848_v0  ;;  %v710_v28 = vld [vmem:[#allocation10 + $0x78] sm:$0xff]  ;;  %v7168_v37 = vpack.c.bf16 %v731_v22, %v727_v21  ;;  %v756_v21 = vld [vmem:[#allocation10 + $0x1e8] sm:$0xff] }
  0xaf   :  { %4924 = vmatprep.subr.bf16.mxu1 %v7049_v29  ;;  %v7131_v32 = vpack.c.bf16 %v710_v28, %v706_v26  ;;  %v733_v26 = vld [vmem:[#allocation10 + $0x130] sm:$0xff]  ;;  %v736_v28 = vld [vmem:[#allocation10 + $0x148] sm:$0xff]  ;;  %v754_v22 = vld [vmem:[#allocation10 + $0x1d8] sm:$0xff] }
  0xb1   :  { %382 = vmatmul.mubr.f32.vlgmr.msra.gmra.mrb[16].mxu1 %v7017_v41  ;;  %v7069_v41 = vpack.c.bf16 %v492_v44, %v488_v43  ;;  %v716_v43 = vld [vmem:[#allocation10 + $0xa8] sm:$0xff]  ;;  %v714_v44 = vld [vmem:[#allocation10 + $0x98] sm:$0xff] }
  0xb2   :  { %4926 = vmatpush1.bf16.msra.mxu1 %v7053_v34  ;;  %387 = vmatprep.mubr.f32.mxu1 %v8848_v0  ;;  %v7139_v46 = vpack.c.bf16 %v716_v43, %v712_v38  ;;  %v7174_v43 = vpack.c.bf16 %v740_v30, %v736_v28 }
  0xb3   :  { %4928 = vmatprep.subr.bf16.mxu1 %v7056_v35 }
  0xb5   :  { %388 = vmatmul.mubr.f32.gmra.mrb[18].mxu1 %v7021_v48  ;;  %v7077_v48 = vpack.c.bf16 %v500_v50, %v496_v49  ;;  %v7141_v49 = vpack.c.bf16 %v718_v45, %v714_v44  ;;  %v711_v50 = vld [vmem:[#allocation10 + $0x80] sm:$0xff] }
  0xb6   :  { %4930 = vmatpush1.bf16.msra.mxu1 %v7061_v40  ;;  %393 = vmatprep.mubr.f32.mxu1 %v8848_v0  ;;  %v735_v44 = vld [vmem:[#allocation10 + $0x140] sm:$0xff] }
  0xb7   :  { %4932 = vmatprep.subr.bf16.mxu1 %v7064_v42  ;;  %v739_v45 = vld [vmem:[#allocation10 + $0x160] sm:$0xff] }
  0xb9   :  { %394 = vmatmul.mubr.f32.gmra.mrb[20].mxu1 %v7027_v55  ;;  %v7085_v55 = vpack.c.bf16 %v508_v56, %v504_v54  ;;  %v7144_v54 = vpack.c.bf16 %v715_v51, %v711_v50  ;;  %v717_v56 = vld [vmem:[#allocation10 + $0xb0] sm:$0xff]  ;;  %v7177_v51 = vpack.c.bf16 %v742_v36, %v738_v31  ;;  %v751_v31 = vld [vmem:[#allocation10 + $0x1c0] sm:$0xff] }
  0xba   :  { %4934 = vmatpush1.bf16.msra.mxu1 %v7069_v41  ;;  %399 = vmatprep.mubr.f32.mxu1 %v8848_v0  ;;  %v737_v50 = vld [vmem:[#allocation10 + $0x150] sm:$0xff]  ;;  %v755_v36 = vld [vmem:[#allocation10 + $0x1e0] sm:$0xff] }
  0xbb   :  { %4936 = vmatprep.subr.bf16.mxu1 %v7072_v47 }
  0xbd   :  { %400 = vmatmul.mubr.f32.gmra.mrb[22].mxu1 %v7031_v62  ;;  %v7093_v62 = vpack.c.bf16 %v516_v61, %v512_v60  ;;  %v7148_v60 = vpack.c.bf16 %v717_v56, %v713_v52  ;;  %v7150_v61 = vpack.c.bf16 %v724_v58, %v720_v57  ;;  %v741_v52 = vld [vmem:[#allocation10 + $0x170] sm:$0xff]  ;;  %v744_v56 = vld [vmem:[#allocation10 + $0x188] sm:$0xff]  ;;  %v746_v58 = vld [vmem:[#allocation10 + $0x198] sm:$0xff] }
  0xbe   :  { %4938 = vmatpush1.bf16.msra.mxu1 %v7077_v48  ;;  %405 = vmatprep.mubr.f32.mxu1 %v8848_v0  ;;  %v748_v57 = vld [vmem:[#allocation10 + $0x1a8] sm:$0xff] }
  0xbf   :  { %4940 = vmatprep.subr.bf16.mxu1 %v7080_v53 }
  0xc1   :  { %406 = vmatmul.mubr.f32.gmra.mrb[24].mxu1 %v7035_v6  ;;  %v7101_v6 = vpack.c.bf16 %v524_v4, %v520_v3  ;;  %v719_v3 = vld [vmem:[#allocation10 + $0xc0] sm:$0xff]  ;;  %v7153_v4 = vpack.c.bf16 %v726_v1, %v722_v63  ;;  %v750_v63 = vld [vmem:[#allocation10 + $0x1b8] sm:$0xff]  ;;  %v7180_v1 = vpack.c.bf16 %v739_v45, %v735_v44  ;;  %v753_v44 = vld [vmem:[#allocation10 + $0x1d0] sm:$0xff] }
  0xc2   :  { %4942 = vmatpush1.bf16.msra.mxu1 %v7085_v55  ;;  %411 = vmatprep.mubr.f32.mxu1 %v8848_v0  ;;  %v7156_v14 = vpack.c.bf16 %v723_v5, %v719_v3  ;;  %v7184_v3 = vpack.c.bf16 %v741_v52, %v737_v50  ;;  %v7186_v5 = vpack.c.bf16 %v748_v57, %v744_v56  ;;  %v757_v50 = vld [vmem:[#allocation10 + $0x1f0] sm:$0xff]  ;;  %v760_v52 = vld [vmem:[#allocation10 + $0x208] sm:$0xff]  ;;  %v762_v57 = vld [vmem:[#allocation10 + $0x218] sm:$0xff] }
  0xc3   :  { %4944 = vmatprep.subr.bf16.mxu1 %v7088_v59  ;;  %v764_v56 = vld [vmem:[#allocation10 + $0x228] sm:$0xff] }
  0xc5   :  { %412 = vmatmul.mubr.f32.gmra.mrb[26].mxu1 %v7039_v13  ;;  %v700_v13 = vld [vmem:[#allocation10 + $0x28] sm:$0xff] }
  0xc6   :  { %4946 = vmatpush1.bf16.msra.mxu1 %v7093_v62  ;;  %417 = vmatprep.mubr.f32.mxu1 %v8848_v0  ;;  %v7117_v15 = vpack.c.bf16 %v700_v13, %v696_v12  ;;  %v732_v12 = vld [vmem:[#allocation10 + $0x128] sm:$0xff]  ;;  %v730_v13 = vld [vmem:[#allocation10 + $0x118] sm:$0xff] }
  0xc7   :  { %4948 = vmatprep.subr.bf16.mxu1 %v7096_v2 }
  0xc8   :  { %4956 = vmatprep.subr.bf16.mxu0 %v7117_v15 }
  0xc9   :  { %418 = vmatmul.mubr.f32.gmra.mrb[28].mxu1 %v7043_v20  ;;  %v7121_v20 = vpack.c.bf16 %v699_v18, %v695_v17  ;;  %v7160_v17 = vpack.c.bf16 %v725_v9, %v721_v7  ;;  %v7162_v18 = vpack.c.bf16 %v732_v12, %v728_v10  ;;  %v743_v7 = vld [vmem:[#allocation10 + $0x180] sm:$0xff]  ;;  %v745_v10 = vld [vmem:[#allocation10 + $0x190] sm:$0xff]  ;;  %v7189_v12 = vpack.c.bf16 %v750_v63, %v746_v58  ;;  %v766_v58 = vld [vmem:[#allocation10 + $0x238] sm:$0xff] }
  0xca   :  { %4950 = vmatpush1.bf16.msra.mxu1 %v7101_v6  ;;  %423 = vmatprep.mubr.f32.mxu1 %v8848_v0  ;;  %v747_v9 = vld [vmem:[#allocation10 + $0x1a0] sm:$0xff]  ;;  %v7204_v63 = vpack.c.bf16 %v755_v36, %v751_v31  ;;  %v768_v36 = vld [vmem:[#allocation10 + $0x248] sm:$0xff] }
  0xcb   :  { %4952 = vmatprep.subr.bf16.mxu1 %v7104_v8  ;;  %4958 = vmatpush1.bf16.msra.mxu0 %v7121_v20 }
  0xcc   :  { %9020 = vst [vmem:[#allocation24_spill] sm:$0xff] %v7204_v63 }
  0xcd   :  { %424 = vmatmul.mubr.f32.gmra.mrb[30].mxu1 %v7047_v27  ;;  %v7128_v27 = vpack.c.bf16 %v708_v25, %v704_v24  ;;  %v729_v24 = vld [vmem:[#allocation10 + $0x110] sm:$0xff]  ;;  %v7165_v25 = vpack.c.bf16 %v734_v16, %v730_v13  ;;  %v752_v16 = vld [vmem:[#allocation10 + $0x1c8] sm:$0xff] }
  0xce   :  { %4954 = vmatpush1.bf16.msra.mxu1 %v7109_v11  ;;  %669 = vmatprep.mubr.f32.mxu1 %v8848_v0  ;;  %v7172_v38 = vpack.c.bf16 %v733_v26, %v729_v24  ;;  %v749_v13 = vld [vmem:[#allocation10 + $0x1b0] sm:$0xff]  ;;  %v758_v24 = vld [vmem:[#allocation10 + $0x1f8] sm:$0xff]  ;;  %v7192_v26 = vpack.c.bf16 %v747_v9, %v743_v7  ;;  %v7198_v30 = vpack.c.bf16 %v756_v21, %v752_v16 }
  0xcf   :  { %5020 = vmatprep.subr.bf16.mxu1 %v7119_v19  ;;  %4960 = vmatprep.subr.bf16.mxu0 %v7128_v27  ;;  %v7196_v28 = vpack.c.bf16 %v749_v13, %v745_v10  ;;  %v7201_v45 = vpack.c.bf16 %v758_v24, %v754_v22  ;;  %v7208_v7 = vpack.c.bf16 %v757_v50, %v753_v44  ;;  %v759_v10 = vld [vmem:[#allocation10 + $0x200] sm:$0xff]  ;;  %v761_v21 = vld [vmem:[#allocation10 + $0x210] sm:$0xff]  ;;  %v772_v44 = vld [vmem:[#allocation10 + $0x268] sm:$0xff] }
  0xd0   :  { %4962 = vmatpush1.bf16.msra.mxu0 %v7133_v33  ;;  %9018 = vst [vmem:[#allocation22_spill] sm:$0xff] %v7198_v30  ;;  %v7210_v9 = vpack.c.bf16 %v764_v56, %v760_v52  ;;  %v763_v13 = vld [vmem:[#allocation10 + $0x220] sm:$0xff]  ;;  %v7213_v16 = vpack.c.bf16 %v766_v58, %v762_v57  ;;  %v765_v22 = vld [vmem:[#allocation10 + $0x230] sm:$0xff]  ;;  %v770_v50 = vld [vmem:[#allocation10 + $0x258] sm:$0xff]  ;;  %v7225_v52 = vpack.c.bf16 %v772_v44, %v768_v36 }
  0xd1   :  { %670 = vmatmul.mubr.f32.vlgmr.msra.gmra.mrb[16].mxu1 %v8848_v0  ;;  %4964 = vmatprep.subr.bf16.mxu0 %v7139_v46  ;;  %9017 = vst [vmem:[#allocation21_spill] sm:$0xff] %v7196_v28  ;;  %9019 = vst [vmem:[#allocation23_spill] sm:$0xff] %v7201_v45  ;;  %v7216_v24 = vpack.c.bf16 %v763_v13, %v759_v10  ;;  %v7220_v31 = vpack.c.bf16 %v765_v22, %v761_v21  ;;  %v774_v56 = vld [vmem:[#allocation10 + $0x278] sm:$0xff]  ;;  %v767_v57 = vld [vmem:[#allocation10 + $0x240] sm:$0xff] }
  0xd2   :  { %958 = vmatprep.mubr.f32.mxu1 %v8848_v0  ;;  %5022 = vmatpush1.bf16.msra.mxu1 %v7124_v23  ;;  %9021 = vst [vmem:[#allocation25_spill] sm:$0xff] %v7208_v7  ;;  %9022 = vst [vmem:[#allocation26_spill] sm:$0xff] %v7210_v9  ;;  %v771_v58 = vld [vmem:[#allocation10 + $0x260] sm:$0xff]  ;;  %v7227_v10 = vpack.c.bf16 %v774_v56, %v770_v50  ;;  %v769_v21 = vld [vmem:[#allocation10 + $0x250] sm:$0xff] }
  0xd3   :  { %5024 = vmatprep.subr.bf16.mxu1 %v7131_v32  ;;  %9023 = vst [vmem:[#allocation27_spill] sm:$0xff] %v7213_v16  ;;  %9024 = vst [vmem:[#allocation28_spill] sm:$0xff] %v7216_v24  ;;  %v7229_v13 = vpack.c.bf16 %v771_v58, %v767_v57  ;;  %v773_v22 = vld [vmem:[#allocation10 + $0x270] sm:$0xff]  ;;  %v780_v36 = vld [vmem:[#allocation10 + $0x2a8] sm:$0xff] }
  0xd4   :  { %4966 = vmatpush1.bf16.msra.mxu0 %v7144_v54  ;;  %9025 = vst [vmem:[#allocation29_spill] sm:$0xff] %v7220_v31  ;;  %9026 = vst [vmem:[#allocation30_spill] sm:$0xff] %v7225_v52  ;;  %v7232_v0 = vpack.c.bf16 %v773_v22, %v769_v21  ;;  %v778_v44 = vld [vmem:[#allocation10 + $0x298] sm:$0xff]  ;;  %v775_v56 = vld [vmem:[#allocation10 + $0x280] sm:$0xff] }
  0xd5   :  { %4968 = vmatprep.subr.bf16.mxu0 %v7150_v61  ;;  %9027 = vst [vmem:[#allocation31_spill] sm:$0xff] %v7227_v10  ;;  %9028 = vst [vmem:[#allocation32_spill] sm:$0xff] %v7229_v13  ;;  %v782_v50 = vld [vmem:[#allocation10 + $0x2b8] sm:$0xff]  ;;  %v779_v57 = vld [vmem:[#allocation10 + $0x2a0] sm:$0xff] }
  0xd6   :  { %5026 = vmatpush1.bf16.msra.mxu1 %v7136_v39  ;;  %9029 = vst [vmem:[#allocation33_spill] sm:$0xff] %v7232_v0  ;;  %v7239_v58 = vpack.c.bf16 %v782_v50, %v778_v44  ;;  %v777_v21 = vld [vmem:[#allocation10 + $0x290] sm:$0xff]  ;;  %v790_v44 = vld [vmem:[#allocation10 + $0x2f8] sm:$0xff]  ;;  %v783_v50 = vld [vmem:[#allocation10 + $0x2c0] sm:$0xff] }
  0xd7   :  { %5028 = vmatprep.subr.bf16.mxu1 %v7141_v49  ;;  %v781_v22 = vld [vmem:[#allocation10 + $0x2b0] sm:$0xff] }
  0xd8   :  { %4970 = vmatpush1.bf16.msra.mxu0 %v7156_v14  ;;  %9031 = vst [vmem:[#allocation35_spill] sm:$0xff] %v7239_v58 }
  0xd9   :  { %4972 = vmatprep.subr.bf16.mxu0 %v7162_v18 }
  0xda   :  { %5030 = vmatpush1.bf16.msra.mxu1 %v7148_v60 }
  0xdb   :  { %5032 = vmatprep.subr.bf16.mxu1 %v7153_v4 }
  0xdc   :  { %4974 = vmatpush1.bf16.msra.mxu0 %v7168_v37 }
  0xdd   :  { %4976 = vmatprep.subr.bf16.mxu0 %v7174_v43 }
  0xde   :  { %5034 = vmatpush1.bf16.msra.mxu1 %v7160_v17 }
  0xdf   :  { %5036 = vmatprep.subr.bf16.mxu1 %v7165_v25 }
  0xe0   :  { %4978 = vmatpush1.bf16.msra.mxu0 %v7180_v1 }
  0xe1   :  { %4980 = vmatprep.subr.bf16.mxu0 %v7186_v5 }
  0xe2   :  { %5038 = vmatpush1.bf16.msra.mxu1 %v7172_v38 }
  0xe3   :  { %5040 = vmatprep.subr.bf16.mxu1 %v7177_v51 }
  0xe4   :  { %4982 = vmatpush1.bf16.msra.mxu0 %v7192_v26 }
  0xe5   :  { %4984 = vmatprep.subr.bf16.mxu0 %v7198_v30 }
  0xe6   :  { %5042 = vmatpush1.bf16.msra.mxu1 %v7184_v3 }
  0xe7   :  { %5044 = vmatprep.subr.bf16.mxu1 %v7189_v12 }
  0xe8   :  { %4986 = vmatpush1.bf16.msra.mxu0 %v7204_v63 }
  0xe9   :  { %4988 = vmatprep.subr.bf16.mxu0 %v7210_v9 }
  0xea   :  { %5046 = vmatpush1.bf16.msra.mxu1 %v7196_v28 }
  0xeb   :  { %5048 = vmatprep.subr.bf16.mxu1 %v7201_v45 }
  0xec   :  { %4990 = vmatpush1.bf16.msra.mxu0 %v7216_v24 }
  0xed   :  { %4992 = vmatprep.subr.bf16.mxu0 %v7225_v52 }
  0xee   :  { %5050 = vmatpush1.bf16.msra.mxu1 %v7208_v7 }
  0xef   :  { %5052 = vmatprep.subr.bf16.mxu1 %v7213_v16  ;;  %v7241_v16 = vpack.c.bf16 %v779_v57, %v775_v56  ;;  %v787_v56 = vld [vmem:[#allocation10 + $0x2e0] sm:$0xff] }
  0xf0   :  { %4994 = vmatpush1.bf16.msra.mxu0 %v7229_v13  ;;  %v7253_v52 = vpack.c.bf16 %v787_v56, %v783_v50  ;;  %v795_v50 = vld [vmem:[#allocation10 + $0x320] sm:$0xff] }
  0xf1   :  { %9032 = vst [vmem:[#allocation36_spill] sm:$0xff] %v7241_v16 }
  0xf2   :  { %5054 = vmatpush1.bf16.msra.mxu1 %v7220_v31  ;;  %v776_v31 = vld [vmem:[#allocation10 + $0x288] sm:$0xff]  ;;  %9036 = vst [vmem:[#allocation40_spill] sm:$0xff] %v7253_v52 }
  0xf3   :  { %5056 = vmatprep.subr.bf16.mxu1 %v7227_v10  ;;  %v7237_v24 = vpack.c.bf16 %v780_v36, %v776_v31  ;;  %v7244_v10 = vpack.c.bf16 %v781_v22, %v777_v21  ;;  %v788_v31 = vld [vmem:[#allocation10 + $0x2e8] sm:$0xff]  ;;  %v786_v36 = vld [vmem:[#allocation10 + $0x2d8] sm:$0xff]  ;;  %v785_v21 = vld [vmem:[#allocation10 + $0x2d0] sm:$0xff] }
  0xf4   :  { %v7251_v57 = vpack.c.bf16 %v790_v44, %v786_v36  ;;  %v789_v22 = vld [vmem:[#allocation10 + $0x2f0] sm:$0xff]  ;;  %v798_v36 = vld [vmem:[#allocation10 + $0x338] sm:$0xff]  ;;  %v791_v44 = vld [vmem:[#allocation10 + $0x300] sm:$0xff] }
  0xf5   :  { %9030 = vst [vmem:[#allocation34_spill] sm:$0xff] %v7237_v24  ;;  %4996 = vmatprep.subr.bf16.mxu0 %v7237_v24  ;;  %9033 = vst [vmem:[#allocation37_spill] sm:$0xff] %v7244_v10  ;;  %v7265_v24 = vpack.c.bf16 %v795_v50, %v791_v44  ;;  %v803_v44 = vld [vmem:[#allocation10 + $0x360] sm:$0xff] }
  0xf6   :  { %5058 = vmatpush1.bf16.msra.mxu1 %v7232_v0  ;;  %4998 = vmatpush1.bf16.msra.mxu0 %v7241_v16  ;;  %v784_v0 = vld [vmem:[#allocation10 + $0x2c8] sm:$0xff]  ;;  %9035 = vst [vmem:[#allocation39_spill] sm:$0xff] %v7251_v57 }
  0xf7   :  { %5060 = vmatprep.subr.bf16.mxu1 %v7239_v58  ;;  %v7249_v13 = vpack.c.bf16 %v788_v31, %v784_v0  ;;  %v7256_v58 = vpack.c.bf16 %v789_v22, %v785_v21  ;;  %v796_v0 = vld [vmem:[#allocation10 + $0x328] sm:$0xff]  ;;  %v794_v31 = vld [vmem:[#allocation10 + $0x318] sm:$0xff]  ;;  %9040 = vst [vmem:[#allocation44_spill] sm:$0xff] %v7265_v24  ;;  %v793_v21 = vld [vmem:[#allocation10 + $0x310] sm:$0xff] }
  0xf8   :  { %v7263_v56 = vpack.c.bf16 %v798_v36, %v794_v31  ;;  %v797_v22 = vld [vmem:[#allocation10 + $0x330] sm:$0xff]  ;;  %v806_v31 = vld [vmem:[#allocation10 + $0x378] sm:$0xff]  ;;  %v799_v36 = vld [vmem:[#allocation10 + $0x340] sm:$0xff] }
  0xf9   :  { %9034 = vst [vmem:[#allocation38_spill] sm:$0xff] %v7249_v13  ;;  %5000 = vmatprep.subr.bf16.mxu0 %v7249_v13  ;;  %9037 = vst [vmem:[#allocation41_spill] sm:$0xff] %v7256_v58  ;;  %v7277_v13 = vpack.c.bf16 %v803_v44, %v799_v36  ;;  %v811_v36 = vld [vmem:[#allocation10 + $0x3a0] sm:$0xff] }
  0xfa   :  { %5062 = vmatpush1.bf16.msra.mxu1 %v7244_v10  ;;  %5002 = vmatpush1.bf16.msra.mxu0 %v7253_v52  ;;  %v792_v10 = vld [vmem:[#allocation10 + $0x308] sm:$0xff]  ;;  %9039 = vst [vmem:[#allocation43_spill] sm:$0xff] %v7263_v56 }
  0xfb   :  { %5064 = vmatprep.subr.bf16.mxu1 %v7251_v57  ;;  %v7261_v16 = vpack.c.bf16 %v796_v0, %v792_v10  ;;  %v7268_v57 = vpack.c.bf16 %v797_v22, %v793_v21  ;;  %v804_v10 = vld [vmem:[#allocation10 + $0x368] sm:$0xff]  ;;  %v802_v0 = vld [vmem:[#allocation10 + $0x358] sm:$0xff]  ;;  %9044 = vst [vmem:[#allocation48_spill] sm:$0xff] %v7277_v13  ;;  %v801_v21 = vld [vmem:[#allocation10 + $0x350] sm:$0xff] }
  0xfc   :  { %v7275_v50 = vpack.c.bf16 %v806_v31, %v802_v0  ;;  %v805_v22 = vld [vmem:[#allocation10 + $0x370] sm:$0xff]  ;;  %v814_v0 = vld [vmem:[#allocation10 + $0x3b8] sm:$0xff]  ;;  %v807_v31 = vld [vmem:[#allocation10 + $0x380] sm:$0xff] }
  0xfd   :  { %9038 = vst [vmem:[#allocation42_spill] sm:$0xff] %v7261_v16  ;;  %5004 = vmatprep.subr.bf16.mxu0 %v7261_v16  ;;  %9041 = vst [vmem:[#allocation45_spill] sm:$0xff] %v7268_v57  ;;  %v7289_v16 = vpack.c.bf16 %v811_v36, %v807_v31  ;;  %v819_v31 = vld [vmem:[#allocation10 + $0x3e0] sm:$0xff] }
  0xfe   :  { %5066 = vmatpush1.bf16.msra.mxu1 %v7256_v58  ;;  %5006 = vmatpush1.bf16.msra.mxu0 %v7265_v24  ;;  %v800_v58 = vld [vmem:[#allocation10 + $0x348] sm:$0xff]  ;;  %9043 = vst [vmem:[#allocation47_spill] sm:$0xff] %v7275_v50 }
  0xff   :  { %5068 = vmatprep.subr.bf16.mxu1 %v7263_v56  ;;  %v7273_v52 = vpack.c.bf16 %v804_v10, %v800_v58  ;;  %v7280_v56 = vpack.c.bf16 %v805_v22, %v801_v21  ;;  %v812_v58 = vld [vmem:[#allocation10 + $0x3a8] sm:$0xff]  ;;  %v810_v10 = vld [vmem:[#allocation10 + $0x398] sm:$0xff]  ;;  %9048 = vst [vmem:[#allocation52_spill] sm:$0xff] %v7289_v16  ;;  %v809_v21 = vld [vmem:[#allocation10 + $0x390] sm:$0xff] }
 0x100   :  { %v7287_v44 = vpack.c.bf16 %v814_v0, %v810_v10  ;;  %v813_v22 = vld [vmem:[#allocation10 + $0x3b0] sm:$0xff]  ;;  %v822_v10 = vld [vmem:[#allocation10 + $0x3f8] sm:$0xff]  ;;  %v815_v0 = vld [vmem:[#allocation10 + $0x3c0] sm:$0xff] }
 0x101   :  { %9042 = vst [vmem:[#allocation46_spill] sm:$0xff] %v7273_v52  ;;  %5008 = vmatprep.subr.bf16.mxu0 %v7273_v52  ;;  %9045 = vst [vmem:[#allocation49_spill] sm:$0xff] %v7280_v56  ;;  %v7301_v52 = vpack.c.bf16 %v819_v31, %v815_v0  ;;  %v182_v31 = vld [vmem:[%s8842_s3] sm:$0xf] }
 0x102   :  { %5070 = vmatpush1.bf16.msra.mxu1 %v7268_v57  ;;  %5010 = vmatpush1.bf16.msra.mxu0 %v7277_v13  ;;  %v808_v57 = vld [vmem:[#allocation10 + $0x388] sm:$0xff]  ;;  %9047 = vst [vmem:[#allocation51_spill] sm:$0xff] %v7287_v44 }
 0x103   :  { %5072 = vmatprep.subr.bf16.mxu1 %v7275_v50  ;;  %v7285_v24 = vpack.c.bf16 %v812_v58, %v808_v57  ;;  %v7292_v50 = vpack.c.bf16 %v813_v22, %v809_v21  ;;  %v820_v57 = vld [vmem:[#allocation10 + $0x3e8] sm:$0xff]  ;;  %v818_v58 = vld [vmem:[#allocation10 + $0x3d8] sm:$0xff]  ;;  %9052 = vst [vmem:[#allocation56_spill] sm:$0xff] %v7301_v52  ;;  %v817_v21 = vld [vmem:[#allocation10 + $0x3d0] sm:$0xff] }
 0x104   :  { %v7299_v36 = vpack.c.bf16 %v822_v10, %v818_v58  ;;  %v821_v22 = vld [vmem:[#allocation10 + $0x3f0] sm:$0xff]  ;;  %v184_v58 = vlaneseq }
 0x105   :  { %9046 = vst [vmem:[#allocation50_spill] sm:$0xff] %v7285_v24  ;;  %5012 = vmatprep.subr.bf16.mxu0 %v7285_v24  ;;  %9049 = vst [vmem:[#allocation53_spill] sm:$0xff] %v7292_v50 }
 0x106   :  { %5074 = vmatpush1.bf16.msra.mxu1 %v7280_v56  ;;  %5014 = vmatpush1.bf16.msra.mxu0 %v7289_v16  ;;  %v816_v56 = vld [vmem:[#allocation10 + $0x3c8] sm:$0xff]  ;;  %9051 = vst [vmem:[#allocation55_spill] sm:$0xff] %v7299_v36  ;;  %v185_v10 = vshrl.u32 %v184_v58, 7 }
 0x107   :  { %5076 = vmatprep.subr.bf16.mxu1 %v7287_v44  ;;  %v7297_v13 = vpack.c.bf16 %v820_v57, %v816_v56  ;;  %v7304_v44 = vpack.c.bf16 %v821_v22, %v817_v21  ;;  %v991_v56 = vld [vmem:[#allocation9 + $0x28] sm:$0xff] }
 0x108   :  { %v186_v0 = vsub.s32 0, %v185_v10  ;;  %v190_v21 = vsub.s32 1, %v185_v10 }
 0x109   :  { %9050 = vst [vmem:[#allocation54_spill] sm:$0xff] %v7297_v13  ;;  %5016 = vmatprep.subr.bf16.mxu0 %v7297_v13  ;;  %9053 = vst [vmem:[#allocation57_spill] sm:$0xff] %v7304_v44 }
 0x10a   :  { %5078 = vmatpush1.bf16.msra.mxu1 %v7292_v50  ;;  %5018 = vmatpush1.bf16.msra.mxu0 %v7301_v52  ;;  %v987_v50 = vld [vmem:[#allocation9 + $0x8] sm:$0xff]  ;;  %v187_v22 = vrot.slane %v182_v31, %v186_v0  ;;  %v191_v52 = vrot.slane %v182_v31, %v190_v21 }
 0x10b   :  { %5080 = vmatprep.subr.bf16.mxu1 %v7299_v36  ;;  %v7309_v57 = vpack.c.bf16 %v991_v56, %v987_v50 }
 0x10d   :  { %9054 = vst [vmem:[#allocation58_spill] sm:$0xff] %v7309_v57  ;;  %5084 = vmatprep.subr.bf16.mxu0 %v7309_v57 }
 0x10e   :  { %5082 = vmatpush1.bf16.msra.mxu1 %v7304_v44 }
 0x10f   :  { %5116 = vmatprep.subr.bf16.mxu1 %v7049_v29 }
 0x164   :  { %v270_v36 = vpop.f32.mrb[0].mxu1 }
 0x165   :  { %v271_v13 = vadd.f32 %v270_v36, %v187_v22  ;;  %v272_v16 = vpop.f32.mrb[1].mxu1 }
 0x166   :  { %v600_v44 = vpop.f32.mrb[0].mxu0  ;;  %v273_v50 = vadd.f32 %v272_v16, %v191_v52 }
 0x167   :  { %v602_v56 = vpop.f32.mrb[1].mxu0  ;;  %v676_v24 = vadd.f32 %v600_v44, %v271_v13 }
 0x168   :  { %v677_v29 = vadd.f32 %v602_v56, %v273_v50  ;;  %v276_v9 = vpop.f32.mrb[2].mxu1 }
 0x169   :  { %v7316_v57 = vadd.f32 %v276_v9, %v187_v22  ;;  %v278_v58 = vpop.f32.mrb[3].mxu1 }
 0x16a   :  { %v7318_v7 = vadd.f32 %v278_v58, %v191_v52  ;;  %6535 = vtanh.f32 %v677_v29 }
 0x16b   :  { %6537 = vtanh.f32 %v676_v24 }
 0x16c   :  { %v282_v63 = vpop.f32.mrb[4].mxu1 }
 0x16d   :  { %v7320_v45 = vadd.f32 %v282_v63, %v187_v22  ;;  %v284_v30 = vpop.f32.mrb[5].mxu1 }
 0x16e   :  { %v7322_v0 = vadd.f32 %v284_v30, %v191_v52 }
 0x16f   :  { %9055 = vst [vmem:[#allocation59_spill] sm:$0xff] %v7320_v45 }
 0x170   :  { %9056 = vst [vmem:[#allocation60_spill] sm:$0xff] %v7322_v0  ;;  %v288_v21 = vpop.f32.mrb[6].mxu1 }
 0x171   :  { %v7324_v36 = vadd.f32 %v288_v21, %v187_v22  ;;  %v290_v28 = vpop.f32.mrb[7].mxu1 }
 0x172   :  { %v7326_v16 = vadd.f32 %v290_v28, %v191_v52 }
 0x173   :  { %9057 = vst [vmem:[#allocation61_spill] sm:$0xff] %v7324_v36 }
 0x174   :  { %9058 = vst [vmem:[#allocation62_spill] sm:$0xff] %v7326_v16  ;;  %v294_v13 = vpop.f32.mrb[8].mxu1 }
 0x175   :  { %v7328_v44 = vadd.f32 %v294_v13, %v187_v22  ;;  %v296_v9 = vpop.f32.mrb[9].mxu1 }
 0x176   :  { %v7330_v50 = vadd.f32 %v296_v9, %v191_v52  ;;  %v194_v9 = vsub.s32 2, %v185_v10 }
 0x177   :  { %9059 = vst [vmem:[#allocation63_spill] sm:$0xff] %v7328_v44 }
 0x178   :  { %9060 = vst [vmem:[#allocation64_spill] sm:$0xff] %v7330_v50  ;;  %v300_v56 = vpop.f32.mrb[10].mxu1  ;;  %v999_v50 = vld [vmem:[#allocation9 + $0x68] sm:$0xff] }
 0x179   :  { %v7332_v58 = vadd.f32 %v300_v56, %v187_v22  ;;  %v302_v63 = vpop.f32.mrb[11].mxu1  ;;  %v7344_v56 = vrot.slane %v182_v31, %v194_v9 }
 0x17a   :  { %v7334_v45 = vadd.f32 %v302_v63, %v191_v52 }
 0x17b   :  { %9061 = vst [vmem:[#allocation65_spill] sm:$0xff] %v7332_v58  ;;  %9067 = vst [vmem:[#allocation71_spill] sm:$0xff] %v7344_v56  ;;  %v198_v58 = vsub.s32 3, %v185_v10 }
 0x17c   :  { %9062 = vst [vmem:[#allocation66_spill] sm:$0xff] %v7334_v45  ;;  %v306_v30 = vpop.f32.mrb[12].mxu1 }
 0x17d   :  { %v7336_v0 = vadd.f32 %v306_v30, %v187_v22  ;;  %v308_v21 = vpop.f32.mrb[13].mxu1 }
 0x17e   :  { %v7338_v36 = vadd.f32 %v308_v21, %v191_v52  ;;  %v6536_v21 = vpop.eup %6535 }
 0x17f   :  { %9063 = vst [vmem:[#allocation67_spill] sm:$0xff] %v7336_v0  ;;  %v7347_v0 = vrot.slane %v182_v31, %v198_v58  ;;  %v986_v58 = vld [vmem:[#allocation9] sm:$0xff] }
 0x180   :  { %9064 = vst [vmem:[#allocation68_spill] sm:$0xff] %v7338_v36  ;;  %v312_v28 = vpop.f32.mrb[14].mxu1  ;;  %v6538_v36 = vpop.eup %6537 }
 0x181   :  { %v7340_v16 = vadd.f32 %v312_v28, %v187_v22  ;;  %v314_v13 = vpop.f32.mrb[15].mxu1  ;;  %v686_v22 = vmul.f32 0.5, %v6536_v21 }
 0x182   :  { %v7342_v44 = vadd.f32 %v314_v13, %v191_v52  ;;  %v684_v52 = vmul.f32 0.5, %v6538_v36 }
 0x183   :  { %9065 = vst [vmem:[#allocation69_spill] sm:$0xff] %v7340_v16  ;;  %v687_v13 = vadd.f32 0.5, %v686_v22  ;;  %v990_v16 = vld [vmem:[#allocation9 + $0x20] sm:$0xff] }
 0x184   :  { %9066 = vst [vmem:[#allocation70_spill] sm:$0xff] %v7342_v44  ;;  %v685_v29 = vadd.f32 0.5, %v684_v52  ;;  %v998_v52 = vld [vmem:[#allocation9 + $0x60] sm:$0xff] }
 0x185   :  { %v690_v9 = vmul.f32 0.0, %v687_v13  ;;  %v1007_v13 = vld [vmem:[#allocation9 + $0xa8] sm:$0xff] }
 0x1a4   :  { %v671_v63 = vpop.f32.mrb[16].mxu1 }
 0x1a5   :  { %v6491_v45 = vadd.f32 %v671_v63, %v7344_v56  ;;  %v673_v30 = vpop.f32.mrb[17].mxu1 }
 0x1a6   :  { %v6492_v28 = vadd.f32 %v673_v30, %v7347_v0  ;;  %v7353_v30 = vpack.c.bf16 %v990_v16, %v986_v58  ;;  %v1014_v58 = vld [vmem:[#allocation9 + $0xe0] sm:$0xff] }
 0x1a7   :  { %6539 = vtanh.f32 %v6491_v45  ;;  %v995_v45 = vld [vmem:[#allocation9 + $0x48] sm:$0xff] }
 0x1a8   :  { %6541 = vtanh.f32 %v6492_v28  ;;  %v7357_v22 = vpack.c.bf16 %v999_v50, %v995_v45  ;;  %v994_v28 = vld [vmem:[#allocation9 + $0x40] sm:$0xff]  ;;  %v1019_v45 = vld [vmem:[#allocation9 + $0x108] sm:$0xff] }
 0x1a9   :  { %v1002_v50 = vld [vmem:[#allocation9 + $0x80] sm:$0xff] }
 0x1b1   :  { %v6540_v24 = vpop.eup %6539 }
 0x1b2   :  { %v691_v44 = vmul.f32 %v6540_v24, %v685_v29  ;;  %v6542_v63 = vpop.eup %6541  ;;  %v7363_v29 = vpack.c.bf16 %v998_v52, %v994_v28  ;;  %v1011_v24 = vld [vmem:[#allocation9 + $0xc8] sm:$0xff]  ;;  %v1018_v52 = vld [vmem:[#allocation9 + $0x100] sm:$0xff] }
 0x1b3   :  { %v688_v31 = vmul.f32 0.5, %v6542_v63  ;;  %v9068_v63 = vmov 0.0  }
 0x1b4   :  { %v7350_v10 = vadd.f32 %v691_v44, %v690_v9  ;;  %v1003_v44 = vld [vmem:[#allocation9 + $0x88] sm:$0xff] }
 0x1b5   :  { %v689_v21 = vadd.f32 0.5, %v688_v31  ;;  %v7367_v16 = vpack.c.bf16 %v1007_v13, %v1003_v44  ;;  %v1015_v9 = vld [vmem:[#allocation9 + $0xe8] sm:$0xff]  ;;  %v1010_v31 = vld [vmem:[#allocation9 + $0xc0] sm:$0xff] }
 0x1b6   :  { %6543 = vtanh.f32 %v7350_v10  ;;  %v7381_v28 = vpack.c.bf16 %v1014_v58, %v1010_v31  ;;  %v1027_v44 = vld [vmem:[#allocation9 + $0x148] sm:$0xff]  ;;  %v1034_v58 = vld [vmem:[#allocation9 + $0x180] sm:$0xff] }
 0x1b7   :  { %v1031_v13 = vld [vmem:[#allocation9 + $0x168] sm:$0xff] }
 0x1c0   :  { %v6544_v56 = vpop.eup %6543 }
 0x1c1   :  { %v7355_v36 = vmul.f32 %v6544_v56, %v689_v21  ;;  %v1006_v56 = vld [vmem:[#allocation9 + $0xa0] sm:$0xff]  ;;  %v1023_v21 = vld [vmem:[#allocation9 + $0x128] sm:$0xff] }
 0x1c3   :  { %888 = vmatmul.mubr.f32.vlgmr.msra.gmra.mrb[2].mxu0 %v7355_v36  ;;  %959 = vmatmul.mubr.f32.vlgmr.msra.gmra.mrb[32].mxu1 %v7355_v36 }
 0x1c4   :  { %5086 = vmatpush1.bf16.msra.mxu0 %v7353_v30  ;;  %5118 = vmatpush1.bf16.msra.mxu1 %v7053_v34  ;;  %v7373_v34 = vpack.c.bf16 %v1006_v56, %v1002_v50  ;;  %v1026_v56 = vld [vmem:[#allocation9 + $0x140] sm:$0xff] }
 0x1c5   :  { %5088 = vmatprep.subr.bf16.mxu0 %v7357_v22  ;;  %5120 = vmatprep.subr.bf16.mxu1 %v7056_v35  ;;  %v7377_v35 = vpack.c.bf16 %v1015_v9, %v1011_v24  ;;  %v1035_v24 = vld [vmem:[#allocation9 + $0x188] sm:$0xff] }
 0x1c6   :  { %1114 = vmatprep.mubr.f32.mxu0 %v9068_v63  ;;  %1185 = vmatprep.mubr.f32.mxu1 %v9068_v63  ;;  %v1039_v9 = vld [vmem:[#allocation9 + $0x1a8] sm:$0xff] }
 0x1c8   :  { %5090 = vmatpush1.bf16.msra.mxu0 %v7363_v29  ;;  %5122 = vmatpush1.bf16.msra.mxu1 %v7061_v40  ;;  %v7385_v40 = vpack.c.bf16 %v1023_v21, %v1019_v45  ;;  %v1043_v45 = vld [vmem:[#allocation9 + $0x1c8] sm:$0xff] }
 0x1c9   :  { %5092 = vmatprep.subr.bf16.mxu0 %v7367_v16  ;;  %5124 = vmatprep.subr.bf16.mxu1 %v7064_v42  ;;  %v1022_v42 = vld [vmem:[#allocation9 + $0x120] sm:$0xff]  ;;  %v1047_v21 = vld [vmem:[#allocation9 + $0x1e8] sm:$0xff] }
 0x1ca   :  { %v7389_v50 = vpack.c.bf16 %v1022_v42, %v1018_v52  ;;  %v1042_v42 = vld [vmem:[#allocation9 + $0x1c0] sm:$0xff] }
 0x1cc   :  { %5094 = vmatpush1.bf16.msra.mxu0 %v7373_v34  ;;  %5126 = vmatpush1.bf16.msra.mxu1 %v7069_v41  ;;  %v7393_v41 = vpack.c.bf16 %v1031_v13, %v1027_v44  ;;  %v9102_v13 = vld [vmem:[#allocation54_spill] sm:$0xff] }
 0x1cd   :  { %5096 = vmatprep.subr.bf16.mxu0 %v7377_v35  ;;  %5128 = vmatprep.subr.bf16.mxu1 %v7072_v47  ;;  %v1030_v47 = vld [vmem:[#allocation9 + $0x160] sm:$0xff] }
 0x1ce   :  { %v7397_v31 = vpack.c.bf16 %v1030_v47, %v1026_v56  ;;  %v9103_v56 = vld [vmem:[#allocation55_spill] sm:$0xff]  ;;  %v9104_v47 = vld [vmem:[#allocation56_spill] sm:$0xff] }
 0x1d0   :  { %5098 = vmatpush1.bf16.msra.mxu0 %v7381_v28  ;;  %5130 = vmatpush1.bf16.msra.mxu1 %v7077_v48  ;;  %v7401_v48 = vpack.c.bf16 %v1039_v9, %v1035_v24  ;;  %v9105_v24 = vld [vmem:[#allocation57_spill] sm:$0xff]  ;;  %v9106_v9 = vld [vmem:[#allocation58_spill] sm:$0xff] }
 0x1d1   :  { %5100 = vmatprep.subr.bf16.mxu0 %v7385_v40  ;;  %5132 = vmatprep.subr.bf16.mxu1 %v7080_v53  ;;  %v1038_v53 = vld [vmem:[#allocation9 + $0x1a0] sm:$0xff] }
 0x1d2   :  { %v7405_v52 = vpack.c.bf16 %v1038_v53, %v1034_v58  ;;  %v1505_v58 = vld [vmem:[#allocation9 + $0x18] sm:$0xff] }
 0x1d3   :  { %v1509_v53 = vld [vmem:[#allocation9 + $0x38] sm:$0xff] }
 0x1d4   :  { %5102 = vmatpush1.bf16.msra.mxu0 %v7389_v50  ;;  %5134 = vmatpush1.bf16.msra.mxu1 %v7085_v55  ;;  %v7409_v55 = vpack.c.bf16 %v1047_v21, %v1043_v45  ;;  %v7486_v45 = vpack.c.bf16 %v1509_v53, %v1505_v58  ;;  %v7489_v21 = vld [vmem:[#allocation12] sm:$0xff] }
 0x1d5   :  { %5104 = vmatprep.subr.bf16.mxu0 %v7393_v41  ;;  %5136 = vmatprep.subr.bf16.mxu1 %v7088_v59  ;;  %v1046_v59 = vld [vmem:[#allocation9 + $0x1e0] sm:$0xff] }
 0x1d6   :  { %v7413_v44 = vpack.c.bf16 %v1046_v59, %v1042_v42  ;;  %v7491_v42 = vld [vmem:[#allocation12 + $0x8] sm:$0xff] }
 0x1d8   :  { %5106 = vmatpush1.bf16.msra.mxu0 %v7397_v31  ;;  %5138 = vmatpush1.bf16.msra.mxu1 %v7093_v62  ;;  %v9069_v62 = vld [vmem:[#allocation21_spill] sm:$0xff] }
 0x1d9   :  { %5108 = vmatprep.subr.bf16.mxu0 %v7401_v48  ;;  %5140 = vmatprep.subr.bf16.mxu1 %v7096_v2  ;;  %v9070_v2 = vld [vmem:[#allocation22_spill] sm:$0xff] }
 0x1dc   :  { %5110 = vmatpush1.bf16.msra.mxu0 %v7405_v52  ;;  %5142 = vmatpush1.bf16.msra.mxu1 %v7101_v6  ;;  %v9071_v6 = vld [vmem:[#allocation23_spill] sm:$0xff] }
 0x1dd   :  { %5112 = vmatprep.subr.bf16.mxu0 %v7409_v55  ;;  %5144 = vmatprep.subr.bf16.mxu1 %v7104_v8  ;;  %v9072_v8 = vld [vmem:[#allocation24_spill] sm:$0xff] }
 0x1e0   :  { %5114 = vmatpush1.bf16.msra.mxu0 %v7413_v44  ;;  %5146 = vmatpush1.bf16.msra.mxu1 %v7109_v11  ;;  %v9073_v11 = vld [vmem:[#allocation25_spill] sm:$0xff] }
 0x1e1   :  { %5148 = vmatprep.subr.bf16.mxu0 %v7117_v15  ;;  %5212 = vmatprep.subr.bf16.mxu1 %v7119_v19  ;;  %v9074_v15 = vld [vmem:[#allocation26_spill] sm:$0xff]  ;;  %v9075_v19 = vld [vmem:[#allocation27_spill] sm:$0xff] }
 0x1e3   :  { %1115 = vmatmul.mubr.f32.vlgmr.msra.gmra.mrb[4].mxu0 %v7355_v36  ;;  %1186 = vmatmul.mubr.f32.vlgmr.msra.gmra.mrb[18].mxu1 %v7355_v36  ;;  %v9101_v36 = vld [vmem:[#allocation53_spill] sm:$0xff] }
 0x1e4   :  { %5150 = vmatpush1.bf16.msra.mxu0 %v7121_v20  ;;  %5214 = vmatpush1.bf16.msra.mxu1 %v7124_v23  ;;  %v9076_v20 = vld [vmem:[#allocation28_spill] sm:$0xff]  ;;  %v9077_v23 = vld [vmem:[#allocation29_spill] sm:$0xff] }
 0x1e5   :  { %5152 = vmatprep.subr.bf16.mxu0 %v7128_v27  ;;  %5216 = vmatprep.subr.bf16.mxu1 %v7131_v32  ;;  %v9078_v27 = vld [vmem:[#allocation30_spill] sm:$0xff]  ;;  %v9079_v32 = vld [vmem:[#allocation31_spill] sm:$0xff] }
 0x1e8   :  { %5154 = vmatpush1.bf16.msra.mxu0 %v7133_v33  ;;  %5218 = vmatpush1.bf16.msra.mxu1 %v7136_v39  ;;  %v9080_v33 = vld [vmem:[#allocation32_spill] sm:$0xff]  ;;  %v9081_v39 = vld [vmem:[#allocation33_spill] sm:$0xff] }
 0x1e9   :  { %5156 = vmatprep.subr.bf16.mxu0 %v7139_v46  ;;  %5220 = vmatprep.subr.bf16.mxu1 %v7141_v49  ;;  %v9082_v46 = vld [vmem:[#allocation34_spill] sm:$0xff]  ;;  %v9083_v49 = vld [vmem:[#allocation35_spill] sm:$0xff] }
 0x1ec   :  { %5158 = vmatpush1.bf16.msra.mxu0 %v7144_v54  ;;  %5222 = vmatpush1.bf16.msra.mxu1 %v7148_v60  ;;  %v9084_v54 = vld [vmem:[#allocation36_spill] sm:$0xff]  ;;  %v9085_v60 = vld [vmem:[#allocation37_spill] sm:$0xff] }
 0x1ed   :  { %5160 = vmatprep.subr.bf16.mxu0 %v7150_v61  ;;  %5224 = vmatprep.subr.bf16.mxu1 %v7153_v4  ;;  %v9086_v61 = vld [vmem:[#allocation38_spill] sm:$0xff]  ;;  %v9087_v4 = vld [vmem:[#allocation39_spill] sm:$0xff] }
 0x1f0   :  { %5162 = vmatpush1.bf16.msra.mxu0 %v7156_v14  ;;  %5226 = vmatpush1.bf16.msra.mxu1 %v7160_v17  ;;  %v9088_v14 = vld [vmem:[#allocation40_spill] sm:$0xff]  ;;  %v9089_v17 = vld [vmem:[#allocation41_spill] sm:$0xff] }
 0x1f1   :  { %5164 = vmatprep.subr.bf16.mxu0 %v7162_v18  ;;  %5228 = vmatprep.subr.bf16.mxu1 %v7165_v25  ;;  %v9090_v18 = vld [vmem:[#allocation42_spill] sm:$0xff]  ;;  %v9091_v25 = vld [vmem:[#allocation43_spill] sm:$0xff] }
 0x1f4   :  { %5166 = vmatpush1.bf16.msra.mxu0 %v7168_v37  ;;  %5230 = vmatpush1.bf16.msra.mxu1 %v7172_v38  ;;  %v9092_v37 = vld [vmem:[#allocation44_spill] sm:$0xff]  ;;  %v9093_v38 = vld [vmem:[#allocation45_spill] sm:$0xff] }
 0x1f5   :  { %5168 = vmatprep.subr.bf16.mxu0 %v7174_v43  ;;  %5232 = vmatprep.subr.bf16.mxu1 %v7177_v51  ;;  %v9094_v43 = vld [vmem:[#allocation46_spill] sm:$0xff]  ;;  %v9095_v51 = vld [vmem:[#allocation47_spill] sm:$0xff] }
 0x1f8   :  { %5170 = vmatpush1.bf16.msra.mxu0 %v7180_v1  ;;  %5234 = vmatpush1.bf16.msra.mxu1 %v7184_v3  ;;  %v9096_v1 = vld [vmem:[#allocation48_spill] sm:$0xff]  ;;  %v9097_v3 = vld [vmem:[#allocation49_spill] sm:$0xff] }
 0x1f9   :  { %5172 = vmatprep.subr.bf16.mxu0 %v7186_v5  ;;  %5236 = vmatprep.subr.bf16.mxu1 %v7189_v12  ;;  %v9098_v5 = vld [vmem:[#allocation50_spill] sm:$0xff]  ;;  %v9099_v12 = vld [vmem:[#allocation51_spill] sm:$0xff] }
 0x1fc   :  { %5174 = vmatpush1.bf16.msra.mxu0 %v7192_v26  ;;  %5238 = vmatpush1.bf16.msra.mxu1 %v9069_v62  ;;  %v9100_v26 = vld [vmem:[#allocation52_spill] sm:$0xff]  ;;  %v7493_v62 = vld [vmem:[#allocation12 + $0x10] sm:$0xff] }
 0x1fd   :  { %5176 = vmatprep.subr.bf16.mxu0 %v9070_v2  ;;  %5240 = vmatprep.subr.bf16.mxu1 %v9071_v6 }
 0x200   :  { %5178 = vmatpush1.bf16.msra.mxu0 %v9072_v8  ;;  %5242 = vmatpush1.bf16.msra.mxu1 %v9073_v11 }
 0x201   :  { %5180 = vmatprep.subr.bf16.mxu0 %v9074_v15  ;;  %5244 = vmatprep.subr.bf16.mxu1 %v9075_v19 }
 0x204   :  { %5182 = vmatpush1.bf16.msra.mxu0 %v9076_v20  ;;  %5246 = vmatpush1.bf16.msra.mxu1 %v9077_v23  ;;  %v7498_v20 = vld [vmem:[#allocation12 + $0x18] sm:$0xff] }
 0x205   :  { %5184 = vmatprep.subr.bf16.mxu0 %v9078_v27  ;;  %5248 = vmatprep.subr.bf16.mxu1 %v9079_v32 }
 0x208   :  { %5186 = vmatpush1.bf16.msra.mxu0 %v9080_v33  ;;  %5250 = vmatpush1.bf16.msra.mxu1 %v9081_v39 }
 0x209   :  { %5188 = vmatprep.subr.bf16.mxu0 %v9082_v46  ;;  %5252 = vmatprep.subr.bf16.mxu1 %v9083_v49 }
 0x20c   :  { %5190 = vmatpush1.bf16.msra.mxu0 %v9084_v54  ;;  %5254 = vmatpush1.bf16.msra.mxu1 %v9085_v60 }
 0x20d   :  { %5192 = vmatprep.subr.bf16.mxu0 %v9086_v61  ;;  %5256 = vmatprep.subr.bf16.mxu1 %v9087_v4 }
 0x210   :  { %5194 = vmatpush1.bf16.msra.mxu0 %v9088_v14  ;;  %5258 = vmatpush1.bf16.msra.mxu1 %v9089_v17 }
 0x211   :  { %5196 = vmatprep.subr.bf16.mxu0 %v9090_v18  ;;  %5260 = vmatprep.subr.bf16.mxu1 %v9091_v25 }
 0x214   :  { %5198 = vmatpush1.bf16.msra.mxu0 %v9092_v37  ;;  %5262 = vmatpush1.bf16.msra.mxu1 %v9093_v38 }
 0x215   :  { %5200 = vmatprep.subr.bf16.mxu0 %v9094_v43  ;;  %5264 = vmatprep.subr.bf16.mxu1 %v9095_v51 }
 0x218   :  { %5202 = vmatpush1.bf16.msra.mxu0 %v9096_v1  ;;  %5266 = vmatpush1.bf16.msra.mxu1 %v9097_v3 }
 0x219   :  { %5204 = vmatprep.subr.bf16.mxu0 %v9098_v5  ;;  %5268 = vmatprep.subr.bf16.mxu1 %v9099_v12  ;;  %v9107_v5 = vld [vmem:[#allocation71_spill] sm:$0xff] }
 0x21c   :  { %5206 = vmatpush1.bf16.msra.mxu0 %v9100_v26  ;;  %5270 = vmatpush1.bf16.msra.mxu1 %v9101_v36 }
 0x21d   :  { %5208 = vmatprep.subr.bf16.mxu0 %v9102_v13  ;;  %5272 = vmatprep.subr.bf16.mxu1 %v9103_v56 }
 0x220   :  { %5210 = vmatpush1.bf16.msra.mxu0 %v9104_v47  ;;  %5274 = vmatpush1.bf16.msra.mxu1 %v9105_v24 }
 0x221   :  { %5276 = vmatprep.subr.bf16.mxu0 %v9106_v9  ;;  %5308 = vmatprep.subr.bf16.mxu1 %v7486_v45 }
 0x296   :  { %v889_v59 = vpop.f32.mrb[2].mxu0  ;;  %v960_v2 = vpop.f32.mrb[32].mxu1 }
 0x297   :  { %v890_v6 = vadd.f32 %v889_v59, %v7489_v21  ;;  %v891_v8 = vpop.f32.mrb[3].mxu0  ;;  %v962_v11 = vpop.f32.mrb[33].mxu1  ;;  %v961_v19 = vadd.f32 %v960_v2, %v7493_v62 }
 0x298   :  { %v892_v15 = vadd.f32 %v891_v8, %v7491_v42  ;;  %v963_v23 = vadd.f32 %v962_v11, %v7498_v20  ;;  %v1504_v8 = vld [vmem:[#allocation9 + $0x10] sm:$0xff] }
 0x299   :  { %6545 = vtanh.f32 %v890_v6  ;;  %v1508_v11 = vld [vmem:[#allocation9 + $0x30] sm:$0xff] }
 0x29a   :  { %6547 = vtanh.f32 %v892_v15  ;;  %v1513_v15 = vld [vmem:[#allocation9 + $0x58] sm:$0xff] }
 0x29b   :  { %6549 = vtanh.f32 %v961_v19  ;;  %v1517_v19 = vld [vmem:[#allocation9 + $0x78] sm:$0xff] }
 0x29c   :  { %6551 = vtanh.f32 %v963_v23 }
 0x2a3   :  { %v6546_v27 = vpop.eup %6545 }
 0x2a4   :  { %v969_v32 = vmul.f32 0.5, %v6546_v27  ;;  %v6548_v33 = vpop.eup %6547 }
 0x2a5   :  { %v971_v46 = vmul.f32 0.5, %v6548_v33  ;;  %v6550_v49 = vpop.eup %6549 }
 0x2a6   :  { %v970_v39 = vadd.f32 0.5, %v969_v32  ;;  %v6552_v14 = vpop.eup %6551  ;;  %v7516_v32 = vpack.c.bf16 %v1508_v11, %v1504_v8  ;;  %v1730_v8 = vld [vmem:[#allocation10 + $0x18] sm:$0xff] }
 0x2a7   :  { %v972_v54 = vadd.f32 0.5, %v971_v46  ;;  %v973_v17 = vmul.f32 0.5, %v6552_v14  ;;  %v1512_v46 = vld [vmem:[#allocation9 + $0x50] sm:$0xff]  ;;  %v1734_v11 = vld [vmem:[#allocation10 + $0x38] sm:$0xff] }
 0x2a8   :  { %v976_v60 = vmul.f32 %v6550_v49, %v970_v39  ;;  %v7520_v39 = vpack.c.bf16 %v1517_v19, %v1513_v15  ;;  %v1521_v49 = vld [vmem:[#allocation9 + $0x98] sm:$0xff]  ;;  %v1520_v14 = vld [vmem:[#allocation9 + $0x90] sm:$0xff]  ;;  %v1727_v15 = vld [vmem:[#allocation10] sm:$0xff] }
 0x2a9   :  { %v975_v61 = vmul.f32 0.0, %v972_v54  ;;  %v974_v37 = vadd.f32 0.5, %v973_v17  ;;  %v1525_v54 = vld [vmem:[#allocation9 + $0xb8] sm:$0xff]  ;;  %v1524_v17 = vld [vmem:[#allocation9 + $0xb0] sm:$0xff]  ;;  %v1731_v19 = vld [vmem:[#allocation10 + $0x20] sm:$0xff] }
 0x2ab   :  { %v7501_v4 = vadd.f32 %v976_v60, %v975_v61  ;;  %v7530_v61 = vpack.c.bf16 %v1525_v54, %v1521_v49  ;;  %v1738_v49 = vld [vmem:[#allocation10 + $0x58] sm:$0xff] }
 0x2ad   :  { %6553 = vtanh.f32 %v7501_v4 }
 0x2b6   :  { %v1116_v18 = vpop.f32.mrb[4].mxu0  ;;  %v1187_v25 = vpop.f32.mrb[18].mxu1 }
 0x2b7   :  { %v1192_v38 = vadd.f32 %v1116_v18, %v7316_v57  ;;  %v1118_v43 = vpop.f32.mrb[5].mxu0  ;;  %v1189_v51 = vpop.f32.mrb[19].mxu1  ;;  %v6493_v12 = vadd.f32 %v1187_v25, %v9107_v5  ;;  %v1529_v18 = vld [vmem:[#allocation9 + $0xd8] sm:$0xff] }
 0x2b8   :  { %v6554_v1 = vpop.eup %6553  ;;  %v1193_v3 = vadd.f32 %v1118_v43, %v7318_v7  ;;  %v6494_v36 = vadd.f32 %v1189_v51, %v7347_v0  ;;  %v1533_v25 = vld [vmem:[#allocation9 + $0xf8] sm:$0xff] }
 0x2b9   :  { %6555 = vtanh.f32 %v1192_v38  ;;  %v7507_v26 = vmul.f32 %v6554_v1, %v974_v37  ;;  %v1528_v37 = vld [vmem:[#allocation9 + $0xd0] sm:$0xff]  ;;  %v1537_v43 = vld [vmem:[#allocation9 + $0x118] sm:$0xff] }
 0x2ba   :  { %6557 = vtanh.f32 %v1193_v3  ;;  %v1532_v38 = vld [vmem:[#allocation9 + $0xf0] sm:$0xff]  ;;  %v1541_v51 = vld [vmem:[#allocation9 + $0x138] sm:$0xff] }
 0x2bb   :  { %9108 = vst [vmem:[#allocation21_spill] sm:$0xff] %v7507_v26  ;;  %1403 = vmatprep.mubr.f32.mxu0 %v7507_v26  ;;  %1474 = vmatprep.mubr.f32.mxu1 %v7507_v26  ;;  %6559 = vtanh.f32 %v6493_v12  ;;  %v7544_v1 = vpack.c.bf16 %v1532_v38, %v1528_v37  ;;  %v1540_v3 = vld [vmem:[#allocation9 + $0x130] sm:$0xff]  ;;  %v1545_v12 = vld [vmem:[#allocation9 + $0x158] sm:$0xff] }
 0x2bc   :  { %6561 = vtanh.f32 %v6494_v36  ;;  %v1549_v36 = vld [vmem:[#allocation9 + $0x178] sm:$0xff]  ;;  %v1737_v38 = vld [vmem:[#allocation10 + $0x50] sm:$0xff] }
 0x2bd   :  { %v1786_v26 = vld [vmem:[#allocation10 + $0x1d8] sm:$0xff] }
 0x2c3   :  { %v6556_v13 = vpop.eup %6555 }
 0x2c4   :  { %v1200_v57 = vmul.f32 0.5, %v6556_v13  ;;  %v6558_v56 = vpop.eup %6557 }
 0x2c5   :  { %v1202_v24 = vmul.f32 0.5, %v6558_v56  ;;  %v6560_v7 = vpop.eup %6559  ;;  %v1553_v56 = vld [vmem:[#allocation9 + $0x198] sm:$0xff] }
 0x2c6   :  { %v1201_v47 = vadd.f32 0.5, %v1200_v57  ;;  %v6562_v2 = vpop.eup %6561  ;;  %v1548_v57 = vld [vmem:[#allocation9 + $0x170] sm:$0xff] }
 0x2c7   :  { %v1203_v9 = vadd.f32 0.5, %v1202_v24  ;;  %v1204_v6 = vmul.f32 0.5, %v6562_v2  ;;  %v1564_v2 = vld [vmem:[#allocation9 + $0x1f0] sm:$0xff] }
 0x2c8   :  { %v1207_v58 = vmul.f32 %v6560_v7, %v1201_v47  ;;  %v1557_v47 = vld [vmem:[#allocation9 + $0x1b8] sm:$0xff]  ;;  %v1556_v7 = vld [vmem:[#allocation9 + $0x1b0] sm:$0xff] }
 0x2c9   :  { %v1206_v53 = vmul.f32 %v1203_v9, %v7350_v10  ;;  %v1205_v23 = vadd.f32 0.5, %v1204_v6  ;;  %v1516_v10 = vld [vmem:[#allocation9 + $0x70] sm:$0xff]  ;;  %v1561_v9 = vld [vmem:[#allocation9 + $0x1d8] sm:$0xff] }
 0x2ca   :  { %v7526_v60 = vpack.c.bf16 %v1516_v10, %v1512_v46  ;;  %v1740_v10 = vld [vmem:[#allocation10 + $0x68] sm:$0xff] }
 0x2cb   :  { %v7513_v59 = vadd.f32 %v1207_v58, %v1206_v53  ;;  %v1565_v58 = vld [vmem:[#allocation9 + $0x1f8] sm:$0xff] }
 0x2cd   :  { %6563 = vtanh.f32 %v7513_v59 }
 0x2d7   :  { %v6564_v27 = vpop.eup %6563 }
 0x2d8   :  { %v7518_v33 = vmul.f32 %v6564_v27, %v1205_v23  ;;  %v7586_v23 = vpack.c.bf16 %v1734_v11, %v1730_v8  ;;  %v1729_v27 = vld [vmem:[#allocation10 + $0x10] sm:$0xff]  ;;  %v1758_v8 = vld [vmem:[#allocation10 + $0xf8] sm:$0xff]  ;;  %v1751_v11 = vld [vmem:[#allocation10 + $0xc0] sm:$0xff] }
 0x2da   :  { %1404 = vmatmul.mubr.f32.vlgmr.msra.gmra.mrb[6].mxu0 %v7518_v33  ;;  %1475 = vmatmul.mubr.f32.vlgmr.msra.gmra.mrb[34].mxu1 %v7518_v33 }
 0x2db   :  { %5278 = vmatpush1.bf16.msra.mxu0 %v7353_v30  ;;  %5310 = vmatpush1.bf16.msra.mxu1 %v7516_v32  ;;  %v7536_v30 = vpack.c.bf16 %v1524_v17, %v1520_v14  ;;  %v1742_v14 = vld [vmem:[#allocation10 + $0x78] sm:$0xff]  ;;  %v1735_v17 = vld [vmem:[#allocation10 + $0x40] sm:$0xff] }
 0x2dc   :  { %5280 = vmatprep.subr.bf16.mxu0 %v7357_v22  ;;  %5312 = vmatprep.subr.bf16.mxu1 %v7520_v39  ;;  %v7540_v22 = vpack.c.bf16 %v1533_v25, %v1529_v18  ;;  %v1739_v18 = vld [vmem:[#allocation10 + $0x60] sm:$0xff]  ;;  %v7598_v25 = vpack.c.bf16 %v1742_v14, %v1738_v49  ;;  %v1760_v49 = vld [vmem:[#allocation10 + $0x108] sm:$0xff] }
 0x2dd   :  { %1630 = vmatprep.mubr.f32.mxu0 %v9068_v63  ;;  %1701 = vmatprep.mubr.f32.mxu1 %v9068_v63  ;;  %v7600_v37 = vpack.c.bf16 %v1739_v18, %v1735_v17  ;;  %v1764_v14 = vld [vmem:[#allocation10 + $0x128] sm:$0xff]  ;;  %v1762_v17 = vld [vmem:[#allocation10 + $0x118] sm:$0xff] }
 0x2de   :  { %v7632_v18 = vpack.c.bf16 %v1764_v14, %v1760_v49  ;;  %v1773_v49 = vld [vmem:[#allocation10 + $0x170] sm:$0xff] }
 0x2df   :  { %5282 = vmatpush1.bf16.msra.mxu0 %v7363_v29  ;;  %5314 = vmatpush1.bf16.msra.mxu1 %v7526_v60  ;;  %v7548_v29 = vpack.c.bf16 %v1541_v51, %v1537_v43  ;;  %v1741_v43 = vld [vmem:[#allocation10 + $0x70] sm:$0xff] }
 0x2e0   :  { %5284 = vmatprep.subr.bf16.mxu0 %v7367_v16  ;;  %5316 = vmatprep.subr.bf16.mxu1 %v7530_v61  ;;  %v1536_v16 = vld [vmem:[#allocation9 + $0x110] sm:$0xff]  ;;  %v7603_v51 = vpack.c.bf16 %v1741_v43, %v1737_v38  ;;  %v1766_v38 = vld [vmem:[#allocation10 + $0x138] sm:$0xff]  ;;  %v1759_v43 = vld [vmem:[#allocation10 + $0x100] sm:$0xff] }
 0x2e1   :  { %v7552_v13 = vpack.c.bf16 %v1540_v3, %v1536_v16  ;;  %v1744_v16 = vld [vmem:[#allocation10 + $0x88] sm:$0xff] }
 0x2e2   :  { %v1748_v3 = vld [vmem:[#allocation10 + $0xa8] sm:$0xff] }
 0x2e3   :  { %5286 = vmatpush1.bf16.msra.mxu0 %v7373_v34  ;;  %5318 = vmatpush1.bf16.msra.mxu1 %v7536_v30  ;;  %v7556_v34 = vpack.c.bf16 %v1549_v36, %v1545_v12  ;;  %v1746_v12 = vld [vmem:[#allocation10 + $0x98] sm:$0xff]  ;;  %v7608_v36 = vpack.c.bf16 %v1748_v3, %v1744_v16  ;;  %v1763_v16 = vld [vmem:[#allocation10 + $0x120] sm:$0xff]  ;;  %v7634_v3 = vpack.c.bf16 %v1766_v38, %v1762_v17  ;;  %v1776_v17 = vld [vmem:[#allocation10 + $0x188] sm:$0xff] }
 0x2e4   :  { %5288 = vmatprep.subr.bf16.mxu0 %v7377_v35  ;;  %5320 = vmatprep.subr.bf16.mxu1 %v7540_v22  ;;  %v1544_v35 = vld [vmem:[#allocation9 + $0x150] sm:$0xff]  ;;  %v1780_v38 = vld [vmem:[#allocation10 + $0x1a8] sm:$0xff] }
 0x2e5   :  { %v7560_v24 = vpack.c.bf16 %v1548_v57, %v1544_v35  ;;  %v1750_v35 = vld [vmem:[#allocation10 + $0xb8] sm:$0xff]  ;;  %v1743_v57 = vld [vmem:[#allocation10 + $0x80] sm:$0xff] }
 0x2e7   :  { %5290 = vmatpush1.bf16.msra.mxu0 %v7381_v28  ;;  %5322 = vmatpush1.bf16.msra.mxu1 %v7544_v1  ;;  %v7564_v28 = vpack.c.bf16 %v1557_v47, %v1553_v56  ;;  %v1747_v56 = vld [vmem:[#allocation10 + $0xa0] sm:$0xff]  ;;  %v7610_v47 = vpack.c.bf16 %v1750_v35, %v1746_v12  ;;  %v7636_v12 = vpack.c.bf16 %v1763_v16, %v1759_v43  ;;  %v1761_v35 = vld [vmem:[#allocation10 + $0x110] sm:$0xff]  ;;  %v1778_v43 = vld [vmem:[#allocation10 + $0x198] sm:$0xff] }
 0x2e8   :  { %5292 = vmatprep.subr.bf16.mxu0 %v7385_v40  ;;  %5324 = vmatprep.subr.bf16.mxu1 %v7548_v29  ;;  %v1552_v40 = vld [vmem:[#allocation9 + $0x190] sm:$0xff]  ;;  %v7655_v16 = vpack.c.bf16 %v1780_v38, %v1776_v17  ;;  %v1790_v17 = vld [vmem:[#allocation10 + $0x1f8] sm:$0xff] }
 0x2e9   :  { %v7568_v53 = vpack.c.bf16 %v1556_v7, %v1552_v40  ;;  %v7612_v40 = vpack.c.bf16 %v1747_v56, %v1743_v57  ;;  %v1745_v7 = vld [vmem:[#allocation10 + $0x90] sm:$0xff] }
 0x2ea   :  { %v1765_v57 = vld [vmem:[#allocation10 + $0x130] sm:$0xff] }
 0x2eb   :  { %5294 = vmatpush1.bf16.msra.mxu0 %v7389_v50  ;;  %5326 = vmatpush1.bf16.msra.mxu1 %v7552_v13  ;;  %v7572_v50 = vpack.c.bf16 %v1565_v58, %v1561_v9  ;;  %v1749_v9 = vld [vmem:[#allocation10 + $0xb0] sm:$0xff]  ;;  %v7639_v56 = vpack.c.bf16 %v1765_v57, %v1761_v35  ;;  %v1782_v35 = vld [vmem:[#allocation10 + $0x1b8] sm:$0xff]  ;;  %v1775_v57 = vld [vmem:[#allocation10 + $0x180] sm:$0xff] }
 0x2ec   :  { %5296 = vmatprep.subr.bf16.mxu0 %v7393_v41  ;;  %5328 = vmatprep.subr.bf16.mxu1 %v7556_v34  ;;  %v1560_v41 = vld [vmem:[#allocation9 + $0x1d0] sm:$0xff]  ;;  %v7615_v58 = vpack.c.bf16 %v1749_v9, %v1745_v7  ;;  %v1768_v7 = vld [vmem:[#allocation10 + $0x148] sm:$0xff] }
 0x2ed   :  { %v7576_v6 = vpack.c.bf16 %v1564_v2, %v1560_v41  ;;  %v1752_v41 = vld [vmem:[#allocation10 + $0xc8] sm:$0xff] }
 0x2ee   :  { %v1756_v2 = vld [vmem:[#allocation10 + $0xe8] sm:$0xff] }
 0x2ef   :  { %5298 = vmatpush1.bf16.msra.mxu0 %v7397_v31  ;;  %5330 = vmatpush1.bf16.msra.mxu1 %v7560_v24  ;;  %v1728_v31 = vld [vmem:[#allocation10 + $0x8] sm:$0xff] }
 0x2f0   :  { %5300 = vmatprep.subr.bf16.mxu0 %v7401_v48  ;;  %5332 = vmatprep.subr.bf16.mxu1 %v7564_v28  ;;  %v1732_v48 = vld [vmem:[#allocation10 + $0x28] sm:$0xff] }
 0x2f1   :  { %v1772_v9 = vld [vmem:[#allocation10 + $0x168] sm:$0xff] }
 0x2f3   :  { %5302 = vmatpush1.bf16.msra.mxu0 %v7405_v52  ;;  %5334 = vmatpush1.bf16.msra.mxu1 %v7568_v53  ;;  %v7584_v52 = vpack.c.bf16 %v1732_v48, %v1728_v31  ;;  %v1754_v31 = vld [vmem:[#allocation10 + $0xd8] sm:$0xff]  ;;  %v7620_v48 = vpack.c.bf16 %v1756_v2, %v1752_v41  ;;  %v7644_v2 = vpack.c.bf16 %v1772_v9, %v1768_v7  ;;  %v1779_v7 = vld [vmem:[#allocation10 + $0x1a0] sm:$0xff] }
 0x2f4   :  { %5304 = vmatprep.subr.bf16.mxu0 %v7409_v55  ;;  %5336 = vmatprep.subr.bf16.mxu1 %v7572_v50  ;;  %v7588_v55 = vpack.c.bf16 %v1731_v19, %v1727_v15  ;;  %v1755_v15 = vld [vmem:[#allocation10 + $0xe0] sm:$0xff]  ;;  %v7622_v19 = vpack.c.bf16 %v1758_v8, %v1754_v31  ;;  %v1770_v41 = vld [vmem:[#allocation10 + $0x158] sm:$0xff]  ;;  %v7658_v9 = vpack.c.bf16 %v1782_v35, %v1778_v43 }
 0x2f5   :  { %v1774_v31 = vld [vmem:[#allocation10 + $0x178] sm:$0xff]  ;;  %v1767_v8 = vld [vmem:[#allocation10 + $0x140] sm:$0xff] }
 0x2f6   :  { %9110 = vst [vmem:[#allocation23_spill] sm:$0xff] %v7658_v9  ;;  %v1783_v43 = vld [vmem:[#allocation10 + $0x1c0] sm:$0xff] }
 0x2f7   :  { %5306 = vmatpush1.bf16.msra.mxu0 %v7413_v44  ;;  %5338 = vmatpush1.bf16.msra.mxu1 %v7576_v6  ;;  %v1733_v44 = vld [vmem:[#allocation10 + $0x30] sm:$0xff]  ;;  %v1787_v35 = vld [vmem:[#allocation10 + $0x1e0] sm:$0xff] }
 0x2f8   :  { %5340 = vmatprep.subr.bf16.mxu0 %v7584_v52  ;;  %v7591_v46 = vpack.c.bf16 %v1733_v44, %v1729_v27  ;;  %5404 = vmatprep.subr.bf16.mxu1 %v7586_v23  ;;  %v7624_v27 = vpack.c.bf16 %v1755_v15, %v1751_v11  ;;  %v1753_v44 = vld [vmem:[#allocation10 + $0xd0] sm:$0xff]  ;;  %v1771_v11 = vld [vmem:[#allocation10 + $0x160] sm:$0xff]  ;;  %v7646_v15 = vpack.c.bf16 %v1774_v31, %v1770_v41 }
 0x2f9   :  { %v7660_v41 = vpack.c.bf16 %v1779_v7, %v1775_v57  ;;  %v1777_v31 = vld [vmem:[#allocation10 + $0x190] sm:$0xff]  ;;  %v7674_v7 = vpack.c.bf16 %v1787_v35, %v1783_v43 }
 0x2fa   :  { %1631 = vmatmul.mubr.f32.vlgmr.msra.gmra.mrb[8].mxu0 %v7518_v33  ;;  %1702 = vmatmul.mubr.f32.vlgmr.msra.gmra.mrb[20].mxu1 %v7518_v33  ;;  %v1736_v33 = vld [vmem:[#allocation10 + $0x48] sm:$0xff]  ;;  %v1785_v57 = vld [vmem:[#allocation10 + $0x1d0] sm:$0xff] }
 0x2fb   :  { %5342 = vmatpush1.bf16.msra.mxu0 %v7588_v55  ;;  %5406 = vmatpush1.bf16.msra.mxu1 %v7591_v46  ;;  %v7596_v54 = vpack.c.bf16 %v1740_v10, %v1736_v33  ;;  %v1757_v33 = vld [vmem:[#allocation10 + $0xf0] sm:$0xff]  ;;  %9111 = vst [vmem:[#allocation24_spill] sm:$0xff] %v7660_v41  ;;  %9115 = vst [vmem:[#allocation28_spill] sm:$0xff] %v7674_v7 }
 0x2fc   :  { %5408 = vmatprep.subr.bf16.mxu1 %v7598_v25  ;;  %v7627_v10 = vpack.c.bf16 %v1757_v33, %v1753_v44  ;;  %v7648_v44 = vpack.c.bf16 %v1771_v11, %v1767_v8  ;;  %v1769_v33 = vld [vmem:[#allocation10 + $0x150] sm:$0xff]  ;;  %v1784_v11 = vld [vmem:[#allocation10 + $0x1c8] sm:$0xff] }
 0x2fd   :  { %5344 = vmatprep.subr.bf16.mxu0 %v7596_v54  ;;  %v7651_v14 = vpack.c.bf16 %v1773_v49, %v1769_v33  ;;  %v1781_v8 = vld [vmem:[#allocation10 + $0x1b0] sm:$0xff]  ;;  %v1788_v49 = vld [vmem:[#allocation10 + $0x1e8] sm:$0xff] }
 0x2fe   :  { %9109 = vst [vmem:[#allocation22_spill] sm:$0xff] %v7648_v44  ;;  %v7663_v33 = vpack.c.bf16 %v1781_v8, %v1777_v31  ;;  %v7666_v38 = vpack.c.bf16 %v1788_v49, %v1784_v11  ;;  %v1789_v31 = vld [vmem:[#allocation10 + $0x1f0] sm:$0xff]  ;;  %v1796_v11 = vld [vmem:[#allocation10 + $0x228] sm:$0xff]  ;;  %v1794_v49 = vld [vmem:[#allocation10 + $0x218] sm:$0xff] }
 0x2ff   :  { %5346 = vmatpush1.bf16.msra.mxu0 %v7600_v37  ;;  %5410 = vmatpush1.bf16.msra.mxu1 %v7603_v51  ;;  %v7676_v8 = vpack.c.bf16 %v1789_v31, %v1785_v57  ;;  %v1793_v43 = vld [vmem:[#allocation10 + $0x210] sm:$0xff]  ;;  %v1800_v31 = vld [vmem:[#allocation10 + $0x248] sm:$0xff] }
 0x300   :  { %5348 = vmatprep.subr.bf16.mxu0 %v7608_v36  ;;  %5412 = vmatprep.subr.bf16.mxu1 %v7610_v47  ;;  %9112 = vst [vmem:[#allocation25_spill] sm:$0xff] %v7663_v33  ;;  %9113 = vst [vmem:[#allocation26_spill] sm:$0xff] %v7666_v38  ;;  %v1797_v35 = vld [vmem:[#allocation10 + $0x230] sm:$0xff] }
 0x301   :  { %9116 = vst [vmem:[#allocation29_spill] sm:$0xff] %v7676_v8  ;;  %v7687_v57 = vpack.c.bf16 %v1797_v35, %v1793_v43  ;;  %v1801_v43 = vld [vmem:[#allocation10 + $0x250] sm:$0xff] }
 0x302   :  { %v1805_v35 = vld [vmem:[#allocation10 + $0x270] sm:$0xff] }
 0x303   :  { %5350 = vmatpush1.bf16.msra.mxu0 %v7612_v40  ;;  %5414 = vmatpush1.bf16.msra.mxu1 %v7615_v58  ;;  %9120 = vst [vmem:[#allocation33_spill] sm:$0xff] %v7687_v57 }
 0x304   :  { %5352 = vmatprep.subr.bf16.mxu0 %v7620_v48  ;;  %5416 = vmatprep.subr.bf16.mxu1 %v7622_v19 }
 0x307   :  { %5354 = vmatpush1.bf16.msra.mxu0 %v7624_v27  ;;  %5418 = vmatpush1.bf16.msra.mxu1 %v7627_v10 }
 0x308   :  { %5356 = vmatprep.subr.bf16.mxu0 %v7632_v18  ;;  %5420 = vmatprep.subr.bf16.mxu1 %v7634_v3 }
 0x30b   :  { %5358 = vmatpush1.bf16.msra.mxu0 %v7636_v12  ;;  %5422 = vmatpush1.bf16.msra.mxu1 %v7639_v56 }
 0x30c   :  { %5360 = vmatprep.subr.bf16.mxu0 %v7644_v2  ;;  %5424 = vmatprep.subr.bf16.mxu1 %v7646_v15 }
 0x30f   :  { %5362 = vmatpush1.bf16.msra.mxu0 %v7648_v44  ;;  %5426 = vmatpush1.bf16.msra.mxu1 %v7651_v14  ;;  %v7668_v44 = vpack.c.bf16 %v1790_v17, %v1786_v26  ;;  %v1792_v26 = vld [vmem:[#allocation10 + $0x208] sm:$0xff] }
 0x310   :  { %5364 = vmatprep.subr.bf16.mxu0 %v7655_v16  ;;  %5428 = vmatprep.subr.bf16.mxu1 %v7658_v9  ;;  %v7680_v17 = vpack.c.bf16 %v1796_v11, %v1792_v26  ;;  %v1804_v26 = vld [vmem:[#allocation10 + $0x268] sm:$0xff]  ;;  %v1802_v11 = vld [vmem:[#allocation10 + $0x258] sm:$0xff] }
 0x311   :  { %9114 = vst [vmem:[#allocation27_spill] sm:$0xff] %v7668_v44 }
 0x312   :  { %9117 = vst [vmem:[#allocation30_spill] sm:$0xff] %v7680_v17 }
 0x313   :  { %5366 = vmatpush1.bf16.msra.mxu0 %v7660_v41  ;;  %5430 = vmatpush1.bf16.msra.mxu1 %v7663_v33  ;;  %v1791_v33 = vld [vmem:[#allocation10 + $0x200] sm:$0xff] }
 0x314   :  { %5368 = vmatprep.subr.bf16.mxu0 %v7666_v38  ;;  %5432 = vmatprep.subr.bf16.mxu1 %v7668_v44  ;;  %v1798_v38 = vld [vmem:[#allocation10 + $0x238] sm:$0xff]  ;;  %v1795_v41 = vld [vmem:[#allocation10 + $0x220] sm:$0xff] }
 0x315   :  { %v7682_v9 = vpack.c.bf16 %v1798_v38, %v1794_v49  ;;  %v7684_v44 = vpack.c.bf16 %v1795_v41, %v1791_v33  ;;  %v1806_v38 = vld [vmem:[#allocation10 + $0x278] sm:$0xff]  ;;  %v1799_v41 = vld [vmem:[#allocation10 + $0x240] sm:$0xff] }
 0x316   :  { %v1803_v33 = vld [vmem:[#allocation10 + $0x260] sm:$0xff]  ;;  %v7694_v49 = vpack.c.bf16 %v1806_v38, %v1802_v11  ;;  %v1814_v11 = vld [vmem:[#allocation10 + $0x2b8] sm:$0xff] }
 0x317   :  { %5370 = vmatpush1.bf16.msra.mxu0 %v7674_v7  ;;  %5434 = vmatpush1.bf16.msra.mxu1 %v7676_v8  ;;  %9118 = vst [vmem:[#allocation31_spill] sm:$0xff] %v7682_v9  ;;  %9119 = vst [vmem:[#allocation32_spill] sm:$0xff] %v7684_v44  ;;  %v7692_v8 = vpack.c.bf16 %v1804_v26, %v1800_v31  ;;  %v7696_v7 = vpack.c.bf16 %v1803_v33, %v1799_v41  ;;  %v1812_v31 = vld [vmem:[#allocation10 + $0x2a8] sm:$0xff]  ;;  %v1810_v26 = vld [vmem:[#allocation10 + $0x298] sm:$0xff] }
 0x318   :  { %5372 = vmatprep.subr.bf16.mxu0 %v7680_v17  ;;  %5436 = vmatprep.subr.bf16.mxu1 %v7682_v9  ;;  %9122 = vst [vmem:[#allocation35_spill] sm:$0xff] %v7694_v49  ;;  %v7699_v9 = vpack.c.bf16 %v1805_v35, %v1801_v43  ;;  %v1807_v38 = vld [vmem:[#allocation10 + $0x280] sm:$0xff]  ;;  %v7706_v33 = vpack.c.bf16 %v1814_v11, %v1810_v26  ;;  %v1809_v43 = vld [vmem:[#allocation10 + $0x290] sm:$0xff]  ;;  %v1822_v26 = vld [vmem:[#allocation10 + $0x2f8] sm:$0xff] }
 0x319   :  { %9121 = vst [vmem:[#allocation34_spill] sm:$0xff] %v7692_v8  ;;  %9123 = vst [vmem:[#allocation36_spill] sm:$0xff] %v7696_v7  ;;  %v1811_v41 = vld [vmem:[#allocation10 + $0x2a0] sm:$0xff]  ;;  %v1813_v35 = vld [vmem:[#allocation10 + $0x2b0] sm:$0xff] }
 0x31a   :  { %9124 = vst [vmem:[#allocation37_spill] sm:$0xff] %v7699_v9  ;;  %9126 = vst [vmem:[#allocation39_spill] sm:$0xff] %v7706_v33  ;;  %v7708_v17 = vpack.c.bf16 %v1811_v41, %v1807_v38  ;;  %v1815_v11 = vld [vmem:[#allocation10 + $0x2c0] sm:$0xff] }
 0x31b   :  { %5374 = vmatpush1.bf16.msra.mxu0 %v7684_v44  ;;  %5438 = vmatpush1.bf16.msra.mxu1 %v7687_v57  ;;  %v1808_v57 = vld [vmem:[#allocation10 + $0x288] sm:$0xff]  ;;  %v1819_v38 = vld [vmem:[#allocation10 + $0x2e0] sm:$0xff] }
 0x31c   :  { %5376 = vmatprep.subr.bf16.mxu0 %v7692_v8  ;;  %5440 = vmatprep.subr.bf16.mxu1 %v7694_v49  ;;  %v7704_v44 = vpack.c.bf16 %v1812_v31, %v1808_v57  ;;  %9127 = vst [vmem:[#allocation40_spill] sm:$0xff] %v7708_v17  ;;  %v7711_v49 = vpack.c.bf16 %v1813_v35, %v1809_v43  ;;  %v1820_v57 = vld [vmem:[#allocation10 + $0x2e8] sm:$0xff]  ;;  %v1818_v31 = vld [vmem:[#allocation10 + $0x2d8] sm:$0xff]  ;;  %v1817_v43 = vld [vmem:[#allocation10 + $0x2d0] sm:$0xff] }
 0x31d   :  { %v7718_v41 = vpack.c.bf16 %v1822_v26, %v1818_v31  ;;  %v7720_v8 = vpack.c.bf16 %v1819_v38, %v1815_v11  ;;  %v1821_v35 = vld [vmem:[#allocation10 + $0x2f0] sm:$0xff]  ;;  %v1830_v31 = vld [vmem:[#allocation10 + $0x338] sm:$0xff]  ;;  %v1823_v26 = vld [vmem:[#allocation10 + $0x300] sm:$0xff] }
 0x31e   :  { %9125 = vst [vmem:[#allocation38_spill] sm:$0xff] %v7704_v44  ;;  %9128 = vst [vmem:[#allocation41_spill] sm:$0xff] %v7711_v49  ;;  %v1827_v11 = vld [vmem:[#allocation10 + $0x320] sm:$0xff] }
 0x31f   :  { %5378 = vmatpush1.bf16.msra.mxu0 %v7696_v7  ;;  %5442 = vmatpush1.bf16.msra.mxu1 %v7699_v9  ;;  %v1816_v9 = vld [vmem:[#allocation10 + $0x2c8] sm:$0xff]  ;;  %9130 = vst [vmem:[#allocation43_spill] sm:$0xff] %v7718_v41  ;;  %9131 = vst [vmem:[#allocation44_spill] sm:$0xff] %v7720_v8 }
 0x320   :  { %5380 = vmatprep.subr.bf16.mxu0 %v7704_v44  ;;  %5444 = vmatprep.subr.bf16.mxu1 %v7706_v33  ;;  %v7716_v7 = vpack.c.bf16 %v1820_v57, %v1816_v9  ;;  %v7723_v33 = vpack.c.bf16 %v1821_v35, %v1817_v43  ;;  %v1828_v9 = vld [vmem:[#allocation10 + $0x328] sm:$0xff]  ;;  %v1826_v57 = vld [vmem:[#allocation10 + $0x318] sm:$0xff]  ;;  %v7732_v44 = vpack.c.bf16 %v1827_v11, %v1823_v26  ;;  %v1825_v43 = vld [vmem:[#allocation10 + $0x310] sm:$0xff] }
 0x321   :  { %v7730_v38 = vpack.c.bf16 %v1830_v31, %v1826_v57  ;;  %v1829_v35 = vld [vmem:[#allocation10 + $0x330] sm:$0xff]  ;;  %v1838_v57 = vld [vmem:[#allocation10 + $0x378] sm:$0xff]  ;;  %v1831_v31 = vld [vmem:[#allocation10 + $0x340] sm:$0xff] }
 0x322   :  { %9129 = vst [vmem:[#allocation42_spill] sm:$0xff] %v7716_v7  ;;  %9132 = vst [vmem:[#allocation45_spill] sm:$0xff] %v7723_v33  ;;  %v1835_v26 = vld [vmem:[#allocation10 + $0x360] sm:$0xff] }
 0x323   :  { %5382 = vmatpush1.bf16.msra.mxu0 %v7708_v17  ;;  %5446 = vmatpush1.bf16.msra.mxu1 %v7711_v49  ;;  %v1824_v49 = vld [vmem:[#allocation10 + $0x308] sm:$0xff]  ;;  %9134 = vst [vmem:[#allocation47_spill] sm:$0xff] %v7730_v38  ;;  %9135 = vst [vmem:[#allocation48_spill] sm:$0xff] %v7732_v44 }
 0x324   :  { %5384 = vmatprep.subr.bf16.mxu0 %v7716_v7  ;;  %5448 = vmatprep.subr.bf16.mxu1 %v7718_v41  ;;  %v7728_v17 = vpack.c.bf16 %v1828_v9, %v1824_v49  ;;  %v7735_v41 = vpack.c.bf16 %v1829_v35, %v1825_v43  ;;  %v1836_v49 = vld [vmem:[#allocation10 + $0x368] sm:$0xff]  ;;  %v1834_v9 = vld [vmem:[#allocation10 + $0x358] sm:$0xff]  ;;  %v7744_v7 = vpack.c.bf16 %v1835_v26, %v1831_v31  ;;  %v1833_v43 = vld [vmem:[#allocation10 + $0x350] sm:$0xff] }
 0x325   :  { %v7742_v11 = vpack.c.bf16 %v1838_v57, %v1834_v9  ;;  %v1837_v35 = vld [vmem:[#allocation10 + $0x370] sm:$0xff]  ;;  %v1846_v9 = vld [vmem:[#allocation10 + $0x3b8] sm:$0xff]  ;;  %v1839_v57 = vld [vmem:[#allocation10 + $0x380] sm:$0xff] }
 0x326   :  { %9133 = vst [vmem:[#allocation46_spill] sm:$0xff] %v7728_v17  ;;  %9136 = vst [vmem:[#allocation49_spill] sm:$0xff] %v7735_v41  ;;  %v1843_v31 = vld [vmem:[#allocation10 + $0x3a0] sm:$0xff] }
 0x327   :  { %5386 = vmatpush1.bf16.msra.mxu0 %v7720_v8  ;;  %5450 = vmatpush1.bf16.msra.mxu1 %v7723_v33  ;;  %v1832_v33 = vld [vmem:[#allocation10 + $0x348] sm:$0xff]  ;;  %9138 = vst [vmem:[#allocation51_spill] sm:$0xff] %v7742_v11  ;;  %9139 = vst [vmem:[#allocation52_spill] sm:$0xff] %v7744_v7 }
 0x328   :  { %5388 = vmatprep.subr.bf16.mxu0 %v7728_v17  ;;  %5452 = vmatprep.subr.bf16.mxu1 %v7730_v38  ;;  %v7740_v8 = vpack.c.bf16 %v1836_v49, %v1832_v33  ;;  %v7747_v38 = vpack.c.bf16 %v1837_v35, %v1833_v43  ;;  %v1844_v33 = vld [vmem:[#allocation10 + $0x3a8] sm:$0xff]  ;;  %v1842_v49 = vld [vmem:[#allocation10 + $0x398] sm:$0xff]  ;;  %v7756_v17 = vpack.c.bf16 %v1843_v31, %v1839_v57  ;;  %v1841_v43 = vld [vmem:[#allocation10 + $0x390] sm:$0xff] }
 0x329   :  { %v7754_v26 = vpack.c.bf16 %v1846_v9, %v1842_v49  ;;  %v1845_v35 = vld [vmem:[#allocation10 + $0x3b0] sm:$0xff]  ;;  %v1854_v49 = vld [vmem:[#allocation10 + $0x3f8] sm:$0xff]  ;;  %v1847_v9 = vld [vmem:[#allocation10 + $0x3c0] sm:$0xff] }
 0x32a   :  { %9137 = vst [vmem:[#allocation50_spill] sm:$0xff] %v7740_v8  ;;  %9140 = vst [vmem:[#allocation53_spill] sm:$0xff] %v7747_v38  ;;  %v1851_v57 = vld [vmem:[#allocation10 + $0x3e0] sm:$0xff] }
 0x32b   :  { %5390 = vmatpush1.bf16.msra.mxu0 %v7732_v44  ;;  %5454 = vmatpush1.bf16.msra.mxu1 %v7735_v41  ;;  %v1840_v41 = vld [vmem:[#allocation10 + $0x388] sm:$0xff]  ;;  %9142 = vst [vmem:[#allocation55_spill] sm:$0xff] %v7754_v26  ;;  %9143 = vst [vmem:[#allocation56_spill] sm:$0xff] %v7756_v17 }
 0x32c   :  { %5392 = vmatprep.subr.bf16.mxu0 %v7740_v8  ;;  %5456 = vmatprep.subr.bf16.mxu1 %v7742_v11  ;;  %v7752_v44 = vpack.c.bf16 %v1844_v33, %v1840_v41  ;;  %v7759_v11 = vpack.c.bf16 %v1845_v35, %v1841_v43  ;;  %v1852_v41 = vld [vmem:[#allocation10 + $0x3e8] sm:$0xff]  ;;  %v1850_v33 = vld [vmem:[#allocation10 + $0x3d8] sm:$0xff]  ;;  %v7768_v8 = vpack.c.bf16 %v1851_v57, %v1847_v9  ;;  %v1849_v43 = vld [vmem:[#allocation10 + $0x3d0] sm:$0xff] }
 0x32d   :  { %v7766_v31 = vpack.c.bf16 %v1854_v49, %v1850_v33  ;;  %v1853_v35 = vld [vmem:[#allocation10 + $0x3f0] sm:$0xff] }
 0x32e   :  { %9141 = vst [vmem:[#allocation54_spill] sm:$0xff] %v7752_v44  ;;  %9144 = vst [vmem:[#allocation57_spill] sm:$0xff] %v7759_v11 }
 0x32f   :  { %5394 = vmatpush1.bf16.msra.mxu0 %v7744_v7  ;;  %5458 = vmatpush1.bf16.msra.mxu1 %v7747_v38  ;;  %v1848_v38 = vld [vmem:[#allocation10 + $0x3c8] sm:$0xff]  ;;  %9146 = vst [vmem:[#allocation71_spill] sm:$0xff] %v7766_v31  ;;  %9147 = vst [vmem:[#allocation72_spill] sm:$0xff] %v7768_v8 }
 0x330   :  { %5396 = vmatprep.subr.bf16.mxu0 %v7752_v44  ;;  %5460 = vmatprep.subr.bf16.mxu1 %v7754_v26  ;;  %v7764_v7 = vpack.c.bf16 %v1852_v41, %v1848_v38  ;;  %v7771_v26 = vpack.c.bf16 %v1853_v35, %v1849_v43  ;;  %v2023_v38 = vld [vmem:[#allocation9 + $0x28] sm:$0xff] }
 0x332   :  { %9145 = vst [vmem:[#allocation58_spill] sm:$0xff] %v7764_v7  ;;  %9148 = vst [vmem:[#allocation73_spill] sm:$0xff] %v7771_v26 }
 0x333   :  { %5398 = vmatpush1.bf16.msra.mxu0 %v7756_v17  ;;  %5462 = vmatpush1.bf16.msra.mxu1 %v7759_v11  ;;  %v2019_v11 = vld [vmem:[#allocation9 + $0x8] sm:$0xff] }
 0x334   :  { %5400 = vmatprep.subr.bf16.mxu0 %v7764_v7  ;;  %5464 = vmatprep.subr.bf16.mxu1 %v7766_v31  ;;  %v7776_v41 = vpack.c.bf16 %v2023_v38, %v2019_v11 }
 0x336   :  { %9149 = vst [vmem:[#allocation74_spill] sm:$0xff] %v7776_v41 }
 0x337   :  { %5402 = vmatpush1.bf16.msra.mxu0 %v7768_v8  ;;  %5466 = vmatpush1.bf16.msra.mxu1 %v7771_v26 }
 0x338   :  { %5500 = vmatprep.subr.bf16.mxu1 %v7486_v45  ;;  %5468 = vmatprep.subr.bf16.mxu0 %v7776_v41 }
 0x3ad   :  { %v1405_v33 = vpop.f32.mrb[6].mxu0  ;;  %v1476_v49 = vpop.f32.mrb[34].mxu1 }
 0x3ae   :  { %v1406_v9 = vadd.f32 %v1405_v33, %v7489_v21  ;;  %v1407_v57 = vpop.f32.mrb[7].mxu0  ;;  %v1478_v43 = vpop.f32.mrb[35].mxu1  ;;  %v1477_v8 = vadd.f32 %v1476_v49, %v7493_v62 }
 0x3af   :  { %v1408_v35 = vadd.f32 %v1407_v57, %v7491_v42  ;;  %v1479_v11 = vadd.f32 %v1478_v43, %v7498_v20 }
 0x3b0   :  { %6565 = vtanh.f32 %v1406_v9  ;;  %v9150_v9 = vld [vmem:[#allocation59_spill] sm:$0xff] }
 0x3b1   :  { %6567 = vtanh.f32 %v1408_v35 }
 0x3b2   :  { %6569 = vtanh.f32 %v1477_v8 }
 0x3b3   :  { %6571 = vtanh.f32 %v1479_v11  ;;  %v9151_v11 = vld [vmem:[#allocation60_spill] sm:$0xff] }
 0x3ba   :  { %v6566_v38 = vpop.eup %6565 }
 0x3bb   :  { %v1485_v26 = vmul.f32 0.5, %v6566_v38  ;;  %v6568_v45 = vpop.eup %6567 }
 0x3bc   :  { %v1487_v41 = vmul.f32 0.5, %v6568_v45  ;;  %v6570_v7 = vpop.eup %6569 }
 0x3bd   :  { %v1486_v31 = vadd.f32 0.5, %v1485_v26  ;;  %v6572_v42 = vpop.eup %6571 }
 0x3be   :  { %v1488_v17 = vadd.f32 0.5, %v1487_v41  ;;  %v1489_v62 = vmul.f32 0.5, %v6572_v42 }
 0x3bf   :  { %v1492_v21 = vmul.f32 %v6570_v7, %v1486_v31 }
 0x3c0   :  { %v1491_v33 = vmul.f32 %v1488_v17, %v7501_v4  ;;  %v1490_v20 = vadd.f32 0.5, %v1489_v62 }
 0x3c2   :  { %v7785_v44 = vadd.f32 %v1492_v21, %v1491_v33 }
 0x3c4   :  { %6573 = vtanh.f32 %v7785_v44 }
 0x3cd   :  { %v1632_v8 = vpop.f32.mrb[8].mxu0  ;;  %v1703_v49 = vpop.f32.mrb[20].mxu1 }
 0x3ce   :  { %v1708_v57 = vadd.f32 %v1632_v8, %v9150_v9  ;;  %v1634_v43 = vpop.f32.mrb[9].mxu0  ;;  %v1705_v26 = vpop.f32.mrb[21].mxu1  ;;  %v6495_v7 = vadd.f32 %v1703_v49, %v9107_v5 }
 0x3cf   :  { %v6574_v35 = vpop.eup %6573  ;;  %v1709_v38 = vadd.f32 %v1634_v43, %v9151_v11  ;;  %v6496_v17 = vadd.f32 %v1705_v26, %v7347_v0  ;;  %v2018_v43 = vld [vmem:[#allocation9] sm:$0xff]  ;;  %v2027_v26 = vld [vmem:[#allocation9 + $0x48] sm:$0xff] }
 0x3d0   :  { %6575 = vtanh.f32 %v1708_v57  ;;  %v7791_v4 = vmul.f32 %v6574_v35, %v1490_v20  ;;  %v2022_v35 = vld [vmem:[#allocation9 + $0x20] sm:$0xff]  ;;  %v2031_v11 = vld [vmem:[#allocation9 + $0x68] sm:$0xff] }
 0x3d1   :  { %6577 = vtanh.f32 %v1709_v38 }
 0x3d2   :  { %9152 = vst [vmem:[#allocation59_spill] sm:$0xff] %v7791_v4  ;;  %1919 = vmatprep.mubr.f32.mxu0 %v7791_v4  ;;  %1990 = vmatprep.mubr.f32.mxu1 %v7791_v4  ;;  %6579 = vtanh.f32 %v6495_v7  ;;  %v2818_v4 = vld [vmem:[#allocation10 + $0x1d8] sm:$0xff] }
 0x3d3   :  { %6581 = vtanh.f32 %v6496_v17 }
 0x3da   :  { %v6576_v31 = vpop.eup %6575 }
 0x3db   :  { %v1716_v41 = vmul.f32 0.5, %v6576_v31  ;;  %v6578_v45 = vpop.eup %6577  ;;  %v7800_v31 = vpack.c.bf16 %v2022_v35, %v2018_v43  ;;  %v2042_v43 = vld [vmem:[#allocation9 + $0xc0] sm:$0xff] }
 0x3dc   :  { %v1718_v33 = vmul.f32 0.5, %v6578_v45  ;;  %v6580_v42 = vpop.eup %6579  ;;  %v2026_v45 = vld [vmem:[#allocation9 + $0x40] sm:$0xff] }
 0x3dd   :  { %v1717_v21 = vadd.f32 0.5, %v1716_v41  ;;  %v6582_v9 = vpop.eup %6581  ;;  %v7804_v41 = vpack.c.bf16 %v2031_v11, %v2027_v26  ;;  %v2046_v35 = vld [vmem:[#allocation9 + $0xe0] sm:$0xff]  ;;  %v2051_v26 = vld [vmem:[#allocation9 + $0x108] sm:$0xff] }
 0x3de   :  { %v1719_v62 = vadd.f32 0.5, %v1718_v33  ;;  %v1720_v57 = vmul.f32 0.5, %v6582_v9  ;;  %v2039_v33 = vld [vmem:[#allocation9 + $0xa8] sm:$0xff] }
 0x3df   :  { %v1723_v8 = vmul.f32 %v6580_v42, %v1717_v21  ;;  %v2035_v21 = vld [vmem:[#allocation9 + $0x88] sm:$0xff] }
 0x3e0   :  { %v1722_v49 = vmul.f32 %v1719_v62, %v7513_v59  ;;  %v1721_v38 = vadd.f32 0.5, %v1720_v57  ;;  %v2030_v59 = vld [vmem:[#allocation9 + $0x60] sm:$0xff]  ;;  %v7814_v62 = vpack.c.bf16 %v2039_v33, %v2035_v21  ;;  %v2043_v9 = vld [vmem:[#allocation9 + $0xc8] sm:$0xff] }
 0x3e1   :  { %v7810_v42 = vpack.c.bf16 %v2030_v59, %v2026_v45  ;;  %v2047_v57 = vld [vmem:[#allocation9 + $0xe8] sm:$0xff]  ;;  %v2058_v33 = vld [vmem:[#allocation9 + $0x140] sm:$0xff] }
 0x3e2   :  { %v7797_v20 = vadd.f32 %v1723_v8, %v1722_v49  ;;  %v2034_v8 = vld [vmem:[#allocation9 + $0x80] sm:$0xff]  ;;  %v2055_v11 = vld [vmem:[#allocation9 + $0x128] sm:$0xff] }
 0x3e3   :  { %v2038_v49 = vld [vmem:[#allocation9 + $0xa0] sm:$0xff]  ;;  %v2059_v45 = vld [vmem:[#allocation9 + $0x148] sm:$0xff] }
 0x3e4   :  { %6583 = vtanh.f32 %v7797_v20  ;;  %v2063_v59 = vld [vmem:[#allocation9 + $0x168] sm:$0xff] }
 0x3ee   :  { %v6584_v7 = vpop.eup %6583 }
 0x3ef   :  { %v7802_v17 = vmul.f32 %v6584_v7, %v1721_v38  ;;  %v7828_v38 = vpack.c.bf16 %v2046_v35, %v2042_v43  ;;  %v2050_v7 = vld [vmem:[#allocation9 + $0x100] sm:$0xff]  ;;  %v2075_v43 = vld [vmem:[#allocation9 + $0x1c8] sm:$0xff] }
 0x3f0   :  { %v2079_v35 = vld [vmem:[#allocation9 + $0x1e8] sm:$0xff] }
 0x3f1   :  { %1920 = vmatmul.mubr.f32.vlgmr.msra.gmra.mrb[10].mxu0 %v7802_v17  ;;  %1991 = vmatmul.mubr.f32.vlgmr.msra.gmra.mrb[36].mxu1 %v7802_v17 }
 0x3f2   :  { %5470 = vmatpush1.bf16.msra.mxu0 %v7800_v31  ;;  %5502 = vmatpush1.bf16.msra.mxu1 %v7516_v32  ;;  %v7820_v32 = vpack.c.bf16 %v2038_v49, %v2034_v8  ;;  %v2067_v8 = vld [vmem:[#allocation9 + $0x188] sm:$0xff] }
 0x3f3   :  { %5472 = vmatprep.subr.bf16.mxu0 %v7804_v41  ;;  %5504 = vmatprep.subr.bf16.mxu1 %v7520_v39  ;;  %v7824_v39 = vpack.c.bf16 %v2047_v57, %v2043_v9  ;;  %v2071_v49 = vld [vmem:[#allocation9 + $0x1a8] sm:$0xff]  ;;  %v2066_v57 = vld [vmem:[#allocation9 + $0x180] sm:$0xff] }
 0x3f4   :  { %2146 = vmatprep.mubr.f32.mxu0 %v9068_v63  ;;  %2217 = vmatprep.mubr.f32.mxu1 %v9068_v63 }
 0x3f6   :  { %5474 = vmatpush1.bf16.msra.mxu0 %v7810_v42  ;;  %5506 = vmatpush1.bf16.msra.mxu1 %v7526_v60  ;;  %v7832_v60 = vpack.c.bf16 %v2055_v11, %v2051_v26  ;;  %v2074_v11 = vld [vmem:[#allocation9 + $0x1c0] sm:$0xff] }
 0x3f7   :  { %5476 = vmatprep.subr.bf16.mxu0 %v7814_v62  ;;  %5508 = vmatprep.subr.bf16.mxu1 %v7530_v61  ;;  %v2054_v61 = vld [vmem:[#allocation9 + $0x120] sm:$0xff] }
 0x3f8   :  { %v7836_v21 = vpack.c.bf16 %v2054_v61, %v2050_v7  ;;  %v9183_v61 = vld [vmem:[#allocation52_spill] sm:$0xff] }
 0x3fa   :  { %5478 = vmatpush1.bf16.msra.mxu0 %v7820_v32  ;;  %5510 = vmatpush1.bf16.msra.mxu1 %v7536_v30  ;;  %v7840_v30 = vpack.c.bf16 %v2063_v59, %v2059_v45  ;;  %v9184_v45 = vld [vmem:[#allocation53_spill] sm:$0xff]  ;;  %v9185_v59 = vld [vmem:[#allocation54_spill] sm:$0xff] }
 0x3fb   :  { %5480 = vmatprep.subr.bf16.mxu0 %v7824_v39  ;;  %5512 = vmatprep.subr.bf16.mxu1 %v7540_v22  ;;  %v2062_v22 = vld [vmem:[#allocation9 + $0x160] sm:$0xff] }
 0x3fc   :  { %v7844_v9 = vpack.c.bf16 %v2062_v22, %v2058_v33  ;;  %v9186_v33 = vld [vmem:[#allocation55_spill] sm:$0xff]  ;;  %v9187_v22 = vld [vmem:[#allocation56_spill] sm:$0xff] }
 0x3fe   :  { %5482 = vmatpush1.bf16.msra.mxu0 %v7828_v38  ;;  %5514 = vmatpush1.bf16.msra.mxu1 %v7544_v1  ;;  %v7848_v1 = vpack.c.bf16 %v2071_v49, %v2067_v8  ;;  %v9188_v8 = vld [vmem:[#allocation57_spill] sm:$0xff]  ;;  %v9189_v49 = vld [vmem:[#allocation58_spill] sm:$0xff] }
 0x3ff   :  { %5484 = vmatprep.subr.bf16.mxu0 %v7832_v60  ;;  %5516 = vmatprep.subr.bf16.mxu1 %v7548_v29  ;;  %v2070_v29 = vld [vmem:[#allocation9 + $0x1a0] sm:$0xff] }
 0x400   :  { %v7852_v26 = vpack.c.bf16 %v2070_v29, %v2066_v57  ;;  %v9190_v57 = vld [vmem:[#allocation71_spill] sm:$0xff]  ;;  %v9191_v29 = vld [vmem:[#allocation72_spill] sm:$0xff] }
 0x402   :  { %5486 = vmatpush1.bf16.msra.mxu0 %v7836_v21  ;;  %5518 = vmatpush1.bf16.msra.mxu1 %v7552_v13  ;;  %v7856_v13 = vpack.c.bf16 %v2079_v35, %v2075_v43  ;;  %v9192_v43 = vld [vmem:[#allocation73_spill] sm:$0xff]  ;;  %v9193_v35 = vld [vmem:[#allocation74_spill] sm:$0xff] }
 0x403   :  { %5488 = vmatprep.subr.bf16.mxu0 %v7840_v30  ;;  %5520 = vmatprep.subr.bf16.mxu1 %v7556_v34  ;;  %v2078_v34 = vld [vmem:[#allocation9 + $0x1e0] sm:$0xff] }
 0x404   :  { %v7860_v7 = vpack.c.bf16 %v2078_v34, %v2074_v11  ;;  %v2537_v11 = vld [vmem:[#allocation9 + $0x18] sm:$0xff] }
 0x405   :  { %v2541_v34 = vld [vmem:[#allocation9 + $0x38] sm:$0xff] }
 0x406   :  { %5490 = vmatpush1.bf16.msra.mxu0 %v7844_v9  ;;  %5522 = vmatpush1.bf16.msra.mxu1 %v7560_v24  ;;  %v9153_v24 = vld [vmem:[#allocation22_spill] sm:$0xff] }
 0x407   :  { %5492 = vmatprep.subr.bf16.mxu0 %v7848_v1  ;;  %5524 = vmatprep.subr.bf16.mxu1 %v7564_v28  ;;  %v9154_v28 = vld [vmem:[#allocation23_spill] sm:$0xff] }
 0x40a   :  { %5494 = vmatpush1.bf16.msra.mxu0 %v7852_v26  ;;  %5526 = vmatpush1.bf16.msra.mxu1 %v7568_v53  ;;  %v9155_v53 = vld [vmem:[#allocation24_spill] sm:$0xff] }
 0x40b   :  { %5496 = vmatprep.subr.bf16.mxu0 %v7856_v13  ;;  %5528 = vmatprep.subr.bf16.mxu1 %v7572_v50  ;;  %v9156_v50 = vld [vmem:[#allocation25_spill] sm:$0xff] }
 0x40e   :  { %5498 = vmatpush1.bf16.msra.mxu0 %v7860_v7  ;;  %5530 = vmatpush1.bf16.msra.mxu1 %v7576_v6  ;;  %v9157_v6 = vld [vmem:[#allocation26_spill] sm:$0xff] }
 0x40f   :  { %5532 = vmatprep.subr.bf16.mxu0 %v7584_v52  ;;  %5596 = vmatprep.subr.bf16.mxu1 %v7586_v23  ;;  %v9158_v52 = vld [vmem:[#allocation27_spill] sm:$0xff]  ;;  %v9159_v23 = vld [vmem:[#allocation28_spill] sm:$0xff] }
 0x411   :  { %2147 = vmatmul.mubr.f32.vlgmr.msra.gmra.mrb[12].mxu0 %v7802_v17  ;;  %2218 = vmatmul.mubr.f32.vlgmr.msra.gmra.mrb[22].mxu1 %v7802_v17  ;;  %v9182_v17 = vld [vmem:[#allocation51_spill] sm:$0xff] }
 0x412   :  { %5534 = vmatpush1.bf16.msra.mxu0 %v7588_v55  ;;  %5598 = vmatpush1.bf16.msra.mxu1 %v7591_v46  ;;  %v9160_v55 = vld [vmem:[#allocation29_spill] sm:$0xff]  ;;  %v9161_v46 = vld [vmem:[#allocation30_spill] sm:$0xff] }
 0x413   :  { %5536 = vmatprep.subr.bf16.mxu0 %v7596_v54  ;;  %5600 = vmatprep.subr.bf16.mxu1 %v7598_v25  ;;  %v9162_v54 = vld [vmem:[#allocation31_spill] sm:$0xff]  ;;  %v9163_v25 = vld [vmem:[#allocation32_spill] sm:$0xff] }
 0x416   :  { %5538 = vmatpush1.bf16.msra.mxu0 %v7600_v37  ;;  %5602 = vmatpush1.bf16.msra.mxu1 %v7603_v51  ;;  %v9164_v37 = vld [vmem:[#allocation33_spill] sm:$0xff]  ;;  %v9165_v51 = vld [vmem:[#allocation34_spill] sm:$0xff] }
 0x417   :  { %5540 = vmatprep.subr.bf16.mxu0 %v7608_v36  ;;  %5604 = vmatprep.subr.bf16.mxu1 %v7610_v47  ;;  %v9166_v36 = vld [vmem:[#allocation35_spill] sm:$0xff]  ;;  %v9167_v47 = vld [vmem:[#allocation36_spill] sm:$0xff] }
 0x41a   :  { %5542 = vmatpush1.bf16.msra.mxu0 %v7612_v40  ;;  %5606 = vmatpush1.bf16.msra.mxu1 %v7615_v58  ;;  %v9168_v40 = vld [vmem:[#allocation37_spill] sm:$0xff]  ;;  %v9169_v58 = vld [vmem:[#allocation38_spill] sm:$0xff] }
 0x41b   :  { %5544 = vmatprep.subr.bf16.mxu0 %v7620_v48  ;;  %5608 = vmatprep.subr.bf16.mxu1 %v7622_v19  ;;  %v9170_v48 = vld [vmem:[#allocation39_spill] sm:$0xff]  ;;  %v9171_v19 = vld [vmem:[#allocation40_spill] sm:$0xff] }
 0x41e   :  { %5546 = vmatpush1.bf16.msra.mxu0 %v7624_v27  ;;  %5610 = vmatpush1.bf16.msra.mxu1 %v7627_v10  ;;  %v9172_v27 = vld [vmem:[#allocation41_spill] sm:$0xff]  ;;  %v9173_v10 = vld [vmem:[#allocation42_spill] sm:$0xff] }
 0x41f   :  { %5548 = vmatprep.subr.bf16.mxu0 %v7632_v18  ;;  %5612 = vmatprep.subr.bf16.mxu1 %v7634_v3  ;;  %v9174_v18 = vld [vmem:[#allocation43_spill] sm:$0xff]  ;;  %v9175_v3 = vld [vmem:[#allocation44_spill] sm:$0xff] }
 0x422   :  { %5550 = vmatpush1.bf16.msra.mxu0 %v7636_v12  ;;  %5614 = vmatpush1.bf16.msra.mxu1 %v7639_v56  ;;  %v9176_v12 = vld [vmem:[#allocation45_spill] sm:$0xff]  ;;  %v9177_v56 = vld [vmem:[#allocation46_spill] sm:$0xff] }
 0x423   :  { %5552 = vmatprep.subr.bf16.mxu0 %v7644_v2  ;;  %5616 = vmatprep.subr.bf16.mxu1 %v7646_v15  ;;  %v9178_v2 = vld [vmem:[#allocation47_spill] sm:$0xff]  ;;  %v9179_v15 = vld [vmem:[#allocation48_spill] sm:$0xff] }
 0x426   :  { %5554 = vmatpush1.bf16.msra.mxu0 %v9153_v24  ;;  %5618 = vmatpush1.bf16.msra.mxu1 %v7651_v14  ;;  %v9180_v14 = vld [vmem:[#allocation49_spill] sm:$0xff]  ;;  %v7933_v24 = vpack.c.bf16 %v2541_v34, %v2537_v11 }
 0x427   :  { %5556 = vmatprep.subr.bf16.mxu0 %v7655_v16  ;;  %5620 = vmatprep.subr.bf16.mxu1 %v9154_v28  ;;  %v9181_v16 = vld [vmem:[#allocation50_spill] sm:$0xff] }
 0x42a   :  { %5558 = vmatpush1.bf16.msra.mxu0 %v9155_v53  ;;  %5622 = vmatpush1.bf16.msra.mxu1 %v9156_v50  ;;  %v7936_v50 = vld [vmem:[#allocation12] sm:$0xff] }
 0x42b   :  { %5560 = vmatprep.subr.bf16.mxu0 %v9157_v6  ;;  %5624 = vmatprep.subr.bf16.mxu1 %v9158_v52 }
 0x42e   :  { %5562 = vmatpush1.bf16.msra.mxu0 %v9159_v23  ;;  %5626 = vmatpush1.bf16.msra.mxu1 %v9160_v55  ;;  %v7939_v55 = vld [vmem:[#allocation12 + $0x8] sm:$0xff] }
 0x42f   :  { %5564 = vmatprep.subr.bf16.mxu0 %v9161_v46  ;;  %5628 = vmatprep.subr.bf16.mxu1 %v9162_v54  ;;  %v7942_v54 = vld [vmem:[#allocation12 + $0x10] sm:$0xff] }
 0x432   :  { %5566 = vmatpush1.bf16.msra.mxu0 %v9163_v25  ;;  %5630 = vmatpush1.bf16.msra.mxu1 %v9164_v37  ;;  %v7945_v37 = vld [vmem:[#allocation12 + $0x18] sm:$0xff] }
 0x433   :  { %5568 = vmatprep.subr.bf16.mxu0 %v9165_v51  ;;  %5632 = vmatprep.subr.bf16.mxu1 %v9166_v36 }
 0x436   :  { %5570 = vmatpush1.bf16.msra.mxu0 %v9167_v47  ;;  %5634 = vmatpush1.bf16.msra.mxu1 %v9168_v40 }
 0x437   :  { %5572 = vmatprep.subr.bf16.mxu0 %v9169_v58  ;;  %5636 = vmatprep.subr.bf16.mxu1 %v9170_v48 }
 0x43a   :  { %5574 = vmatpush1.bf16.msra.mxu0 %v9171_v19  ;;  %5638 = vmatpush1.bf16.msra.mxu1 %v9172_v27 }
 0x43b   :  { %5576 = vmatprep.subr.bf16.mxu0 %v9173_v10  ;;  %5640 = vmatprep.subr.bf16.mxu1 %v9174_v18 }
 0x43e   :  { %5578 = vmatpush1.bf16.msra.mxu0 %v9175_v3  ;;  %5642 = vmatpush1.bf16.msra.mxu1 %v9176_v12 }
 0x43f   :  { %5580 = vmatprep.subr.bf16.mxu0 %v9177_v56  ;;  %5644 = vmatprep.subr.bf16.mxu1 %v9178_v2 }
 0x442   :  { %5582 = vmatpush1.bf16.msra.mxu0 %v9179_v15  ;;  %5646 = vmatpush1.bf16.msra.mxu1 %v9180_v14 }
 0x443   :  { %5584 = vmatprep.subr.bf16.mxu0 %v9181_v16  ;;  %5648 = vmatprep.subr.bf16.mxu1 %v9182_v17  ;;  %v9194_v16 = vld [vmem:[#allocation61_spill] sm:$0xff] }
 0x446   :  { %5586 = vmatpush1.bf16.msra.mxu0 %v9183_v61  ;;  %5650 = vmatpush1.bf16.msra.mxu1 %v9184_v45 }
 0x447   :  { %5588 = vmatprep.subr.bf16.mxu0 %v9185_v59  ;;  %5652 = vmatprep.subr.bf16.mxu1 %v9186_v33  ;;  %v9195_v33 = vld [vmem:[#allocation62_spill] sm:$0xff] }
 0x44a   :  { %5590 = vmatpush1.bf16.msra.mxu0 %v9187_v22  ;;  %5654 = vmatpush1.bf16.msra.mxu1 %v9188_v8 }
 0x44b   :  { %5592 = vmatprep.subr.bf16.mxu0 %v9189_v49  ;;  %5656 = vmatprep.subr.bf16.mxu1 %v9190_v57 }
 0x44e   :  { %5594 = vmatpush1.bf16.msra.mxu0 %v9191_v29  ;;  %5658 = vmatpush1.bf16.msra.mxu1 %v9192_v43 }
 0x44f   :  { %5660 = vmatprep.subr.bf16.mxu0 %v9193_v35  ;;  %5692 = vmatprep.subr.bf16.mxu1 %v7933_v24 }
 0x4c4   :  { %v1921_v28 = vpop.f32.mrb[10].mxu0  ;;  %v1992_v53 = vpop.f32.mrb[36].mxu1 }
 0x4c5   :  { %v1922_v6 = vadd.f32 %v7936_v50, %v1921_v28  ;;  %v1923_v52 = vpop.f32.mrb[11].mxu0  ;;  %v1994_v23 = vpop.f32.mrb[37].mxu1  ;;  %v1993_v25 = vadd.f32 %v7942_v54, %v1992_v53 }
 0x4c6   :  { %v1924_v46 = vadd.f32 %v7939_v55, %v1923_v52  ;;  %v1995_v51 = vadd.f32 %v7945_v37, %v1994_v23 }
 0x4c7   :  { %6585 = vtanh.f32 %v1922_v6 }
 0x4c8   :  { %6587 = vtanh.f32 %v1924_v46 }
 0x4c9   :  { %6589 = vtanh.f32 %v1993_v25  ;;  %v2536_v25 = vld [vmem:[#allocation9 + $0x10] sm:$0xff] }
 0x4ca   :  { %6591 = vtanh.f32 %v1995_v51  ;;  %v2540_v51 = vld [vmem:[#allocation9 + $0x30] sm:$0xff] }
 0x4d1   :  { %v6586_v36 = vpop.eup %6585 }
 0x4d2   :  { %v2001_v47 = vmul.f32 0.5, %v6586_v36  ;;  %v6588_v40 = vpop.eup %6587  ;;  %v2545_v36 = vld [vmem:[#allocation9 + $0x58] sm:$0xff] }
 0x4d3   :  { %v2003_v48 = vmul.f32 0.5, %v6588_v40  ;;  %v6590_v19 = vpop.eup %6589 }
 0x4d4   :  { %v2002_v58 = vadd.f32 0.5, %v2001_v47  ;;  %v6592_v12 = vpop.eup %6591  ;;  %v2549_v47 = vld [vmem:[#allocation9 + $0x78] sm:$0xff] }
 0x4d5   :  { %v2004_v27 = vadd.f32 0.5, %v2003_v48  ;;  %v2005_v56 = vmul.f32 0.5, %v6592_v12  ;;  %v7964_v48 = vpack.c.bf16 %v2540_v51, %v2536_v25  ;;  %v2557_v12 = vld [vmem:[#allocation9 + $0xb8] sm:$0xff] }
 0x4d6   :  { %v2008_v10 = vmul.f32 %v6590_v19, %v2002_v58  ;;  %v2762_v51 = vld [vmem:[#allocation10 + $0x18] sm:$0xff] }
 0x4d7   :  { %v2007_v18 = vmul.f32 %v2004_v27, %v7785_v44  ;;  %v2006_v14 = vadd.f32 0.5, %v2005_v56  ;;  %v7968_v27 = vpack.c.bf16 %v2549_v47, %v2545_v36  ;;  %v2766_v36 = vld [vmem:[#allocation10 + $0x38] sm:$0xff]  ;;  %v2759_v47 = vld [vmem:[#allocation10] sm:$0xff] }
 0x4d9   :  { %v7949_v3 = vadd.f32 %v2008_v10, %v2007_v18  ;;  %v2544_v10 = vld [vmem:[#allocation9 + $0x50] sm:$0xff]  ;;  %v2553_v18 = vld [vmem:[#allocation9 + $0x98] sm:$0xff] }
 0x4db   :  { %6593 = vtanh.f32 %v7949_v3 }
 0x4e4   :  { %v2148_v2 = vpop.f32.mrb[12].mxu0  ;;  %v2219_v15 = vpop.f32.mrb[22].mxu1 }
 0x4e5   :  { %v2224_v17 = vadd.f32 %v2148_v2, %v9194_v16  ;;  %v2150_v61 = vpop.f32.mrb[13].mxu0  ;;  %v2221_v45 = vpop.f32.mrb[23].mxu1  ;;  %v6497_v8 = vadd.f32 %v2219_v15, %v9107_v5  ;;  %v7978_v2 = vpack.c.bf16 %v2557_v12, %v2553_v18  ;;  %v2552_v15 = vld [vmem:[#allocation9 + $0x90] sm:$0xff]  ;;  %v2561_v16 = vld [vmem:[#allocation9 + $0xd8] sm:$0xff]  ;;  %v2772_v18 = vld [vmem:[#allocation10 + $0x68] sm:$0xff] }
 0x4e6   :  { %v6594_v59 = vpop.eup %6593  ;;  %v2225_v22 = vadd.f32 %v2150_v61, %v9195_v33  ;;  %v6498_v49 = vadd.f32 %v2221_v45, %v7347_v0  ;;  %v2560_v61 = vld [vmem:[#allocation9 + $0xd0] sm:$0xff]  ;;  %v2573_v33 = vld [vmem:[#allocation9 + $0x138] sm:$0xff] }
 0x4e7   :  { %6595 = vtanh.f32 %v2224_v17  ;;  %v7955_v44 = vmul.f32 %v6594_v59, %v2006_v14  ;;  %v2556_v14 = vld [vmem:[#allocation9 + $0xb0] sm:$0xff]  ;;  %v2565_v17 = vld [vmem:[#allocation9 + $0xf8] sm:$0xff] }
 0x4e8   :  { %6597 = vtanh.f32 %v2225_v22  ;;  %v2564_v45 = vld [vmem:[#allocation9 + $0xf0] sm:$0xff]  ;;  %v2569_v59 = vld [vmem:[#allocation9 + $0x118] sm:$0xff] }
 0x4e9   :  { %9196 = vst [vmem:[#allocation60_spill] sm:$0xff] %v7955_v44  ;;  %2435 = vmatprep.mubr.f32.mxu0 %v7955_v44  ;;  %2506 = vmatprep.mubr.f32.mxu1 %v7955_v44  ;;  %6599 = vtanh.f32 %v6497_v8  ;;  %v7992_v22 = vpack.c.bf16 %v2564_v45, %v2560_v61  ;;  %v2572_v8 = vld [vmem:[#allocation9 + $0x130] sm:$0xff]  ;;  %v2770_v12 = vld [vmem:[#allocation10 + $0x58] sm:$0xff]  ;;  %v2820_v44 = vld [vmem:[#allocation10 + $0x1e8] sm:$0xff] }
 0x4ea   :  { %6601 = vtanh.f32 %v6498_v49  ;;  %v2577_v49 = vld [vmem:[#allocation9 + $0x158] sm:$0xff] }
 0x4f1   :  { %v6596_v57 = vpop.eup %6595 }
 0x4f2   :  { %v2232_v29 = vmul.f32 0.5, %v6596_v57  ;;  %v6598_v43 = vpop.eup %6597  ;;  %v2581_v57 = vld [vmem:[#allocation9 + $0x178] sm:$0xff] }
 0x4f3   :  { %v2234_v11 = vmul.f32 0.5, %v6598_v43  ;;  %v6600_v34 = vpop.eup %6599  ;;  %v2580_v43 = vld [vmem:[#allocation9 + $0x170] sm:$0xff] }
 0x4f4   :  { %v2233_v35 = vadd.f32 0.5, %v2232_v29  ;;  %v6602_v23 = vpop.eup %6601 }
 0x4f5   :  { %v2235_v28 = vadd.f32 0.5, %v2234_v11  ;;  %v2236_v46 = vmul.f32 0.5, %v6602_v23  ;;  %v2589_v11 = vld [vmem:[#allocation9 + $0x1b8] sm:$0xff] }
 0x4f6   :  { %v2239_v53 = vmul.f32 %v6600_v34, %v2233_v35  ;;  %v2585_v35 = vld [vmem:[#allocation9 + $0x198] sm:$0xff] }
 0x4f7   :  { %v2238_v6 = vmul.f32 %v2235_v28, %v7797_v20  ;;  %v2237_v40 = vadd.f32 0.5, %v2236_v46  ;;  %v2548_v20 = vld [vmem:[#allocation9 + $0x70] sm:$0xff] }
 0x4f8   :  { %v7974_v56 = vpack.c.bf16 %v2548_v20, %v2544_v10  ;;  %v2588_v28 = vld [vmem:[#allocation9 + $0x1b0] sm:$0xff] }
 0x4f9   :  { %v7961_v52 = vadd.f32 %v2239_v53, %v2238_v6  ;;  %v2593_v53 = vld [vmem:[#allocation9 + $0x1d8] sm:$0xff]  ;;  %v2596_v46 = vld [vmem:[#allocation9 + $0x1f0] sm:$0xff] }
 0x4fa   :  { %v2597_v6 = vld [vmem:[#allocation9 + $0x1f8] sm:$0xff]  ;;  %v2761_v10 = vld [vmem:[#allocation10 + $0x10] sm:$0xff] }
 0x4fb   :  { %6603 = vtanh.f32 %v7961_v52 }
 0x505   :  { %v6604_v58 = vpop.eup %6603 }
 0x506   :  { %v7966_v19 = vmul.f32 %v6604_v58, %v2237_v40  ;;  %v2763_v40 = vld [vmem:[#allocation10 + $0x20] sm:$0xff]  ;;  %v8034_v58 = vpack.c.bf16 %v2766_v36, %v2762_v51  ;;  %v2790_v36 = vld [vmem:[#allocation10 + $0xf8] sm:$0xff] }
 0x508   :  { %2436 = vmatmul.mubr.f32.vlgmr.msra.gmra.mrb[14].mxu0 %v7966_v19  ;;  %2507 = vmatmul.mubr.f32.vlgmr.msra.gmra.mrb[38].mxu1 %v7966_v19 }
 0x509   :  { %5662 = vmatpush1.bf16.msra.mxu0 %v7800_v31  ;;  %5694 = vmatpush1.bf16.msra.mxu1 %v7964_v48  ;;  %v7984_v31 = vpack.c.bf16 %v2556_v14, %v2552_v15  ;;  %v2774_v14 = vld [vmem:[#allocation10 + $0x78] sm:$0xff] }
 0x50a   :  { %5664 = vmatprep.subr.bf16.mxu0 %v7804_v41  ;;  %5696 = vmatprep.subr.bf16.mxu1 %v7968_v27  ;;  %v7988_v41 = vpack.c.bf16 %v2565_v17, %v2561_v16  ;;  %v2767_v16 = vld [vmem:[#allocation10 + $0x40] sm:$0xff]  ;;  %v8046_v61 = vpack.c.bf16 %v2774_v14, %v2770_v12  ;;  %v2792_v14 = vld [vmem:[#allocation10 + $0x108] sm:$0xff] }
 0x50b   :  { %2662 = vmatprep.mubr.f32.mxu0 %v9068_v63  ;;  %2733 = vmatprep.mubr.f32.mxu1 %v9068_v63  ;;  %v2771_v17 = vld [vmem:[#allocation10 + $0x60] sm:$0xff] }
 0x50c   :  { %v8048_v45 = vpack.c.bf16 %v2771_v17, %v2767_v16  ;;  %v2796_v16 = vld [vmem:[#allocation10 + $0x128] sm:$0xff]  ;;  %v2794_v17 = vld [vmem:[#allocation10 + $0x118] sm:$0xff] }
 0x50d   :  { %5666 = vmatpush1.bf16.msra.mxu0 %v7810_v42  ;;  %5698 = vmatpush1.bf16.msra.mxu1 %v7974_v56  ;;  %v7996_v42 = vpack.c.bf16 %v2573_v33, %v2569_v59  ;;  %v2769_v59 = vld [vmem:[#allocation10 + $0x50] sm:$0xff] }
 0x50e   :  { %5668 = vmatprep.subr.bf16.mxu0 %v7814_v62  ;;  %5700 = vmatprep.subr.bf16.mxu1 %v7978_v2  ;;  %v2568_v62 = vld [vmem:[#allocation9 + $0x110] sm:$0xff] }
 0x50f   :  { %v8000_v29 = vpack.c.bf16 %v2572_v8, %v2568_v62  ;;  %v2773_v33 = vld [vmem:[#allocation10 + $0x70] sm:$0xff]  ;;  %v2776_v8 = vld [vmem:[#allocation10 + $0x88] sm:$0xff] }
 0x510   :  { %v8051_v62 = vpack.c.bf16 %v2773_v33, %v2769_v59  ;;  %v8080_v59 = vpack.c.bf16 %v2796_v16, %v2792_v14  ;;  %v2798_v33 = vld [vmem:[#allocation10 + $0x138] sm:$0xff]  ;;  %v2801_v14 = vld [vmem:[#allocation10 + $0x150] sm:$0xff] }
 0x511   :  { %5670 = vmatpush1.bf16.msra.mxu0 %v7820_v32  ;;  %5702 = vmatpush1.bf16.msra.mxu1 %v7984_v31  ;;  %v8004_v32 = vpack.c.bf16 %v2581_v57, %v2577_v49  ;;  %v2780_v49 = vld [vmem:[#allocation10 + $0xa8] sm:$0xff]  ;;  %v2778_v57 = vld [vmem:[#allocation10 + $0x98] sm:$0xff]  ;;  %v2805_v16 = vld [vmem:[#allocation10 + $0x170] sm:$0xff] }
 0x512   :  { %5672 = vmatprep.subr.bf16.mxu0 %v7824_v39  ;;  %5704 = vmatprep.subr.bf16.mxu1 %v7988_v41  ;;  %v2576_v39 = vld [vmem:[#allocation9 + $0x150] sm:$0xff] }
 0x513   :  { %v8008_v34 = vpack.c.bf16 %v2580_v43, %v2576_v39  ;;  %v8056_v39 = vpack.c.bf16 %v2780_v49, %v2776_v8  ;;  %v2782_v43 = vld [vmem:[#allocation10 + $0xb8] sm:$0xff]  ;;  %v2791_v8 = vld [vmem:[#allocation10 + $0x100] sm:$0xff] }
 0x514   :  { %v2795_v49 = vld [vmem:[#allocation10 + $0x120] sm:$0xff] }
 0x515   :  { %5674 = vmatpush1.bf16.msra.mxu0 %v7828_v38  ;;  %5706 = vmatpush1.bf16.msra.mxu1 %v7992_v22  ;;  %v8012_v38 = vpack.c.bf16 %v2589_v11, %v2585_v35  ;;  %v2775_v35 = vld [vmem:[#allocation10 + $0x80] sm:$0xff] }
 0x516   :  { %5676 = vmatprep.subr.bf16.mxu0 %v7832_v60  ;;  %5708 = vmatprep.subr.bf16.mxu1 %v7996_v42  ;;  %v2584_v60 = vld [vmem:[#allocation9 + $0x190] sm:$0xff]  ;;  %v2779_v11 = vld [vmem:[#allocation10 + $0xa0] sm:$0xff] }
 0x517   :  { %v8016_v23 = vpack.c.bf16 %v2588_v28, %v2584_v60  ;;  %v8058_v60 = vpack.c.bf16 %v2782_v43, %v2778_v57  ;;  %v8060_v28 = vpack.c.bf16 %v2779_v11, %v2775_v35  ;;  %v8082_v57 = vpack.c.bf16 %v2798_v33, %v2794_v17  ;;  %v2793_v35 = vld [vmem:[#allocation10 + $0x110] sm:$0xff]  ;;  %v2808_v33 = vld [vmem:[#allocation10 + $0x188] sm:$0xff] }
 0x518   :  { %v8084_v43 = vpack.c.bf16 %v2795_v49, %v2791_v8  ;;  %v2797_v11 = vld [vmem:[#allocation10 + $0x130] sm:$0xff]  ;;  %v8099_v17 = vpack.c.bf16 %v2805_v16, %v2801_v14  ;;  %v2812_v8 = vld [vmem:[#allocation10 + $0x1a8] sm:$0xff]  ;;  %v2810_v49 = vld [vmem:[#allocation10 + $0x198] sm:$0xff] }
 0x519   :  { %5678 = vmatpush1.bf16.msra.mxu0 %v7836_v21  ;;  %5710 = vmatpush1.bf16.msra.mxu1 %v8000_v29  ;;  %v8020_v21 = vpack.c.bf16 %v2597_v6, %v2593_v53  ;;  %v2777_v53 = vld [vmem:[#allocation10 + $0x90] sm:$0xff]  ;;  %v2816_v14 = vld [vmem:[#allocation10 + $0x1c8] sm:$0xff] }
 0x51a   :  { %5680 = vmatprep.subr.bf16.mxu0 %v7840_v30  ;;  %5712 = vmatprep.subr.bf16.mxu1 %v8004_v32  ;;  %v2592_v30 = vld [vmem:[#allocation9 + $0x1d0] sm:$0xff] }
 0x51b   :  { %v8024_v25 = vpack.c.bf16 %v2596_v46, %v2592_v30  ;;  %v2781_v6 = vld [vmem:[#allocation10 + $0xb0] sm:$0xff]  ;;  %v2784_v46 = vld [vmem:[#allocation10 + $0xc8] sm:$0xff] }
 0x51c   :  { %v8063_v30 = vpack.c.bf16 %v2781_v6, %v2777_v53  ;;  %v8087_v53 = vpack.c.bf16 %v2797_v11, %v2793_v35  ;;  %v2800_v6 = vld [vmem:[#allocation10 + $0x148] sm:$0xff]  ;;  %v8103_v35 = vpack.c.bf16 %v2812_v8, %v2808_v33  ;;  %v2814_v11 = vld [vmem:[#allocation10 + $0x1b8] sm:$0xff]  ;;  %v8114_v8 = vpack.c.bf16 %v2820_v44, %v2816_v14 }
 0x51d   :  { %5682 = vmatpush1.bf16.msra.mxu0 %v7844_v9  ;;  %5714 = vmatpush1.bf16.msra.mxu1 %v8008_v34  ;;  %v2760_v9 = vld [vmem:[#allocation10 + $0x8] sm:$0xff]  ;;  %v2822_v33 = vld [vmem:[#allocation10 + $0x1f8] sm:$0xff] }
 0x51e   :  { %5684 = vmatprep.subr.bf16.mxu0 %v7848_v1  ;;  %5716 = vmatprep.subr.bf16.mxu1 %v8012_v38  ;;  %v2764_v1 = vld [vmem:[#allocation10 + $0x28] sm:$0xff]  ;;  %9201 = vst [vmem:[#allocation26_spill] sm:$0xff] %v8114_v8  ;;  %v2826_v14 = vld [vmem:[#allocation10 + $0x218] sm:$0xff] }
 0x51f   :  { %v2828_v44 = vld [vmem:[#allocation10 + $0x228] sm:$0xff] }
 0x521   :  { %5686 = vmatpush1.bf16.msra.mxu0 %v7852_v26  ;;  %5718 = vmatpush1.bf16.msra.mxu1 %v8016_v23  ;;  %v8032_v26 = vpack.c.bf16 %v2764_v1, %v2760_v9  ;;  %v2788_v9 = vld [vmem:[#allocation10 + $0xe8] sm:$0xff]  ;;  %v2786_v1 = vld [vmem:[#allocation10 + $0xd8] sm:$0xff] }
 0x522   :  { %5688 = vmatprep.subr.bf16.mxu0 %v7856_v13  ;;  %5720 = vmatprep.subr.bf16.mxu1 %v8020_v21  ;;  %v8036_v13 = vpack.c.bf16 %v2763_v40, %v2759_v47  ;;  %v8068_v51 = vpack.c.bf16 %v2788_v9, %v2784_v46  ;;  %v2783_v47 = vld [vmem:[#allocation10 + $0xc0] sm:$0xff]  ;;  %v2804_v46 = vld [vmem:[#allocation10 + $0x168] sm:$0xff]  ;;  %v2802_v9 = vld [vmem:[#allocation10 + $0x158] sm:$0xff] }
 0x523   :  { %v2787_v40 = vld [vmem:[#allocation10 + $0xe0] sm:$0xff] }
 0x525   :  { %5690 = vmatpush1.bf16.msra.mxu0 %v7860_v7  ;;  %5722 = vmatpush1.bf16.msra.mxu1 %v8024_v25  ;;  %v2765_v7 = vld [vmem:[#allocation10 + $0x30] sm:$0xff] }
 0x526   :  { %5724 = vmatprep.subr.bf16.mxu0 %v8032_v26  ;;  %v8039_v20 = vpack.c.bf16 %v2765_v7, %v2761_v10  ;;  %5788 = vmatprep.subr.bf16.mxu1 %v8034_v58  ;;  %v8070_v10 = vpack.c.bf16 %v2790_v36, %v2786_v1  ;;  %v8072_v7 = vpack.c.bf16 %v2787_v40, %v2783_v47  ;;  %v2806_v36 = vld [vmem:[#allocation10 + $0x178] sm:$0xff]  ;;  %v2799_v47 = vld [vmem:[#allocation10 + $0x140] sm:$0xff] }
 0x527   :  { %v8092_v1 = vpack.c.bf16 %v2804_v46, %v2800_v6  ;;  %v2803_v40 = vld [vmem:[#allocation10 + $0x160] sm:$0xff] }
 0x528   :  { %2663 = vmatmul.mubr.f32.vlgmr.msra.gmra.mrb[16].mxu0 %v7966_v19  ;;  %2734 = vmatmul.mubr.f32.vlgmr.msra.gmra.mrb[24].mxu1 %v7966_v19  ;;  %v2768_v19 = vld [vmem:[#allocation10 + $0x48] sm:$0xff]  ;;  %v2807_v6 = vld [vmem:[#allocation10 + $0x180] sm:$0xff] }
 0x529   :  { %5726 = vmatpush1.bf16.msra.mxu0 %v8036_v13  ;;  %5790 = vmatpush1.bf16.msra.mxu1 %v8039_v20  ;;  %v8044_v15 = vpack.c.bf16 %v2772_v18, %v2768_v19  ;;  %v2785_v19 = vld [vmem:[#allocation10 + $0xd0] sm:$0xff]  ;;  %v2811_v46 = vld [vmem:[#allocation10 + $0x1a0] sm:$0xff] }
 0x52a   :  { %5792 = vmatprep.subr.bf16.mxu1 %v8046_v61  ;;  %v2789_v18 = vld [vmem:[#allocation10 + $0xf0] sm:$0xff] }
 0x52b   :  { %5728 = vmatprep.subr.bf16.mxu0 %v8044_v15  ;;  %v8075_v12 = vpack.c.bf16 %v2789_v18, %v2785_v19  ;;  %v8094_v19 = vpack.c.bf16 %v2806_v36, %v2802_v9  ;;  %v8096_v18 = vpack.c.bf16 %v2803_v40, %v2799_v47  ;;  %v8106_v9 = vpack.c.bf16 %v2814_v11, %v2810_v49  ;;  %v2809_v47 = vld [vmem:[#allocation10 + $0x190] sm:$0xff]  ;;  %v2815_v49 = vld [vmem:[#allocation10 + $0x1c0] sm:$0xff] }
 0x52c   :  { %v8108_v36 = vpack.c.bf16 %v2811_v46, %v2807_v6  ;;  %v2813_v40 = vld [vmem:[#allocation10 + $0x1b0] sm:$0xff]  ;;  %v2819_v11 = vld [vmem:[#allocation10 + $0x1e0] sm:$0xff] }
 0x52d   :  { %5730 = vmatpush1.bf16.msra.mxu0 %v8048_v45  ;;  %5794 = vmatpush1.bf16.msra.mxu1 %v8051_v62  ;;  %9197 = vst [vmem:[#allocation22_spill] sm:$0xff] %v8096_v18  ;;  %9198 = vst [vmem:[#allocation23_spill] sm:$0xff] %v8106_v9  ;;  %v8111_v16 = vpack.c.bf16 %v2813_v40, %v2809_v47  ;;  %v2817_v6 = vld [vmem:[#allocation10 + $0x1d0] sm:$0xff]  ;;  %v8122_v46 = vpack.c.bf16 %v2819_v11, %v2815_v49 }
 0x52e   :  { %5732 = vmatprep.subr.bf16.mxu0 %v8056_v39  ;;  %5796 = vmatprep.subr.bf16.mxu1 %v8058_v60  ;;  %9199 = vst [vmem:[#allocation24_spill] sm:$0xff] %v8108_v36  ;;  %v2821_v47 = vld [vmem:[#allocation10 + $0x1f0] sm:$0xff] }
 0x52f   :  { %9200 = vst [vmem:[#allocation25_spill] sm:$0xff] %v8111_v16  ;;  %9203 = vst [vmem:[#allocation28_spill] sm:$0xff] %v8122_v46  ;;  %v8124_v40 = vpack.c.bf16 %v2821_v47, %v2817_v6  ;;  %v2825_v49 = vld [vmem:[#allocation10 + $0x210] sm:$0xff]  ;;  %v2832_v47 = vld [vmem:[#allocation10 + $0x248] sm:$0xff] }
 0x530   :  { %v2829_v11 = vld [vmem:[#allocation10 + $0x230] sm:$0xff] }
 0x531   :  { %5734 = vmatpush1.bf16.msra.mxu0 %v8060_v28  ;;  %5798 = vmatpush1.bf16.msra.mxu1 %v8063_v30  ;;  %9204 = vst [vmem:[#allocation29_spill] sm:$0xff] %v8124_v40  ;;  %v8135_v6 = vpack.c.bf16 %v2829_v11, %v2825_v49  ;;  %v2833_v49 = vld [vmem:[#allocation10 + $0x250] sm:$0xff] }
 0x532   :  { %5736 = vmatprep.subr.bf16.mxu0 %v8068_v51  ;;  %5800 = vmatprep.subr.bf16.mxu1 %v8070_v10  ;;  %v2837_v11 = vld [vmem:[#allocation10 + $0x270] sm:$0xff] }
 0x533   :  { %9208 = vst [vmem:[#allocation33_spill] sm:$0xff] %v8135_v6 }
 0x535   :  { %5738 = vmatpush1.bf16.msra.mxu0 %v8072_v7  ;;  %5802 = vmatpush1.bf16.msra.mxu1 %v8075_v12 }
 0x536   :  { %5740 = vmatprep.subr.bf16.mxu0 %v8080_v59  ;;  %5804 = vmatprep.subr.bf16.mxu1 %v8082_v57 }
 0x539   :  { %5742 = vmatpush1.bf16.msra.mxu0 %v8084_v43  ;;  %5806 = vmatpush1.bf16.msra.mxu1 %v8087_v53 }
 0x53a   :  { %5744 = vmatprep.subr.bf16.mxu0 %v8092_v1  ;;  %5808 = vmatprep.subr.bf16.mxu1 %v8094_v19 }
 0x53d   :  { %5746 = vmatpush1.bf16.msra.mxu0 %v8096_v18  ;;  %5810 = vmatpush1.bf16.msra.mxu1 %v8099_v17  ;;  %v8116_v18 = vpack.c.bf16 %v2822_v33, %v2818_v4  ;;  %v2824_v4 = vld [vmem:[#allocation10 + $0x208] sm:$0xff] }
 0x53e   :  { %5748 = vmatprep.subr.bf16.mxu0 %v8103_v35  ;;  %5812 = vmatprep.subr.bf16.mxu1 %v8106_v9  ;;  %v8128_v33 = vpack.c.bf16 %v2828_v44, %v2824_v4  ;;  %v2836_v4 = vld [vmem:[#allocation10 + $0x268] sm:$0xff]  ;;  %v2834_v44 = vld [vmem:[#allocation10 + $0x258] sm:$0xff] }
 0x53f   :  { %9202 = vst [vmem:[#allocation27_spill] sm:$0xff] %v8116_v18 }
 0x540   :  { %9205 = vst [vmem:[#allocation30_spill] sm:$0xff] %v8128_v33 }
 0x541   :  { %5750 = vmatpush1.bf16.msra.mxu0 %v8108_v36  ;;  %5814 = vmatpush1.bf16.msra.mxu1 %v8111_v16  ;;  %v2823_v16 = vld [vmem:[#allocation10 + $0x200] sm:$0xff] }
 0x542   :  { %5752 = vmatprep.subr.bf16.mxu0 %v8114_v8  ;;  %5816 = vmatprep.subr.bf16.mxu1 %v8116_v18  ;;  %v2830_v8 = vld [vmem:[#allocation10 + $0x238] sm:$0xff]  ;;  %v2827_v36 = vld [vmem:[#allocation10 + $0x220] sm:$0xff] }
 0x543   :  { %v8130_v9 = vpack.c.bf16 %v2830_v8, %v2826_v14  ;;  %v8132_v18 = vpack.c.bf16 %v2827_v36, %v2823_v16  ;;  %v2838_v8 = vld [vmem:[#allocation10 + $0x278] sm:$0xff]  ;;  %v2831_v36 = vld [vmem:[#allocation10 + $0x240] sm:$0xff] }
 0x544   :  { %v2835_v16 = vld [vmem:[#allocation10 + $0x260] sm:$0xff]  ;;  %v8142_v14 = vpack.c.bf16 %v2838_v8, %v2834_v44  ;;  %v2846_v44 = vld [vmem:[#allocation10 + $0x2b8] sm:$0xff] }
 0x545   :  { %5754 = vmatpush1.bf16.msra.mxu0 %v8122_v46  ;;  %5818 = vmatpush1.bf16.msra.mxu1 %v8124_v40  ;;  %9206 = vst [vmem:[#allocation31_spill] sm:$0xff] %v8130_v9  ;;  %9207 = vst [vmem:[#allocation32_spill] sm:$0xff] %v8132_v18  ;;  %v8140_v40 = vpack.c.bf16 %v2836_v4, %v2832_v47  ;;  %v8144_v46 = vpack.c.bf16 %v2835_v16, %v2831_v36  ;;  %v2844_v47 = vld [vmem:[#allocation10 + $0x2a8] sm:$0xff]  ;;  %v2842_v4 = vld [vmem:[#allocation10 + $0x298] sm:$0xff] }
 0x546   :  { %5756 = vmatprep.subr.bf16.mxu0 %v8128_v33  ;;  %5820 = vmatprep.subr.bf16.mxu1 %v8130_v9  ;;  %9210 = vst [vmem:[#allocation35_spill] sm:$0xff] %v8142_v14  ;;  %v8147_v9 = vpack.c.bf16 %v2837_v11, %v2833_v49  ;;  %v2839_v8 = vld [vmem:[#allocation10 + $0x280] sm:$0xff]  ;;  %v8154_v16 = vpack.c.bf16 %v2846_v44, %v2842_v4  ;;  %v2841_v49 = vld [vmem:[#allocation10 + $0x290] sm:$0xff]  ;;  %v2854_v4 = vld [vmem:[#allocation10 + $0x2f8] sm:$0xff] }
 0x547   :  { %9209 = vst [vmem:[#allocation34_spill] sm:$0xff] %v8140_v40  ;;  %9211 = vst [vmem:[#allocation36_spill] sm:$0xff] %v8144_v46  ;;  %v2843_v36 = vld [vmem:[#allocation10 + $0x2a0] sm:$0xff]  ;;  %v2845_v11 = vld [vmem:[#allocation10 + $0x2b0] sm:$0xff] }
 0x548   :  { %9212 = vst [vmem:[#allocation37_spill] sm:$0xff] %v8147_v9  ;;  %9214 = vst [vmem:[#allocation39_spill] sm:$0xff] %v8154_v16  ;;  %v8156_v33 = vpack.c.bf16 %v2843_v36, %v2839_v8  ;;  %v2847_v44 = vld [vmem:[#allocation10 + $0x2c0] sm:$0xff] }
 0x549   :  { %5758 = vmatpush1.bf16.msra.mxu0 %v8132_v18  ;;  %5822 = vmatpush1.bf16.msra.mxu1 %v8135_v6  ;;  %v2840_v6 = vld [vmem:[#allocation10 + $0x288] sm:$0xff]  ;;  %v2851_v8 = vld [vmem:[#allocation10 + $0x2e0] sm:$0xff] }
 0x54a   :  { %5760 = vmatprep.subr.bf16.mxu0 %v8140_v40  ;;  %5824 = vmatprep.subr.bf16.mxu1 %v8142_v14  ;;  %v8152_v18 = vpack.c.bf16 %v2844_v47, %v2840_v6  ;;  %9215 = vst [vmem:[#allocation40_spill] sm:$0xff] %v8156_v33  ;;  %v8159_v14 = vpack.c.bf16 %v2845_v11, %v2841_v49  ;;  %v2852_v6 = vld [vmem:[#allocation10 + $0x2e8] sm:$0xff]  ;;  %v2850_v47 = vld [vmem:[#allocation10 + $0x2d8] sm:$0xff]  ;;  %v2849_v49 = vld [vmem:[#allocation10 + $0x2d0] sm:$0xff] }
 0x54b   :  { %v8166_v36 = vpack.c.bf16 %v2854_v4, %v2850_v47  ;;  %v8168_v40 = vpack.c.bf16 %v2851_v8, %v2847_v44  ;;  %v2853_v11 = vld [vmem:[#allocation10 + $0x2f0] sm:$0xff]  ;;  %v2862_v47 = vld [vmem:[#allocation10 + $0x338] sm:$0xff]  ;;  %v2855_v4 = vld [vmem:[#allocation10 + $0x300] sm:$0xff] }
 0x54c   :  { %9213 = vst [vmem:[#allocation38_spill] sm:$0xff] %v8152_v18  ;;  %9216 = vst [vmem:[#allocation41_spill] sm:$0xff] %v8159_v14  ;;  %v2859_v44 = vld [vmem:[#allocation10 + $0x320] sm:$0xff] }
 0x54d   :  { %5762 = vmatpush1.bf16.msra.mxu0 %v8144_v46  ;;  %5826 = vmatpush1.bf16.msra.mxu1 %v8147_v9  ;;  %v2848_v9 = vld [vmem:[#allocation10 + $0x2c8] sm:$0xff]  ;;  %9218 = vst [vmem:[#allocation43_spill] sm:$0xff] %v8166_v36  ;;  %9219 = vst [vmem:[#allocation44_spill] sm:$0xff] %v8168_v40 }
 0x54e   :  { %5764 = vmatprep.subr.bf16.mxu0 %v8152_v18  ;;  %5828 = vmatprep.subr.bf16.mxu1 %v8154_v16  ;;  %v8164_v46 = vpack.c.bf16 %v2852_v6, %v2848_v9  ;;  %v8171_v16 = vpack.c.bf16 %v2853_v11, %v2849_v49  ;;  %v2860_v9 = vld [vmem:[#allocation10 + $0x328] sm:$0xff]  ;;  %v2858_v6 = vld [vmem:[#allocation10 + $0x318] sm:$0xff]  ;;  %v8180_v18 = vpack.c.bf16 %v2859_v44, %v2855_v4  ;;  %v2857_v49 = vld [vmem:[#allocation10 + $0x310] sm:$0xff] }
 0x54f   :  { %v8178_v8 = vpack.c.bf16 %v2862_v47, %v2858_v6  ;;  %v2861_v11 = vld [vmem:[#allocation10 + $0x330] sm:$0xff]  ;;  %v2870_v6 = vld [vmem:[#allocation10 + $0x378] sm:$0xff]  ;;  %v2863_v47 = vld [vmem:[#allocation10 + $0x340] sm:$0xff] }
 0x550   :  { %9217 = vst [vmem:[#allocation42_spill] sm:$0xff] %v8164_v46  ;;  %9220 = vst [vmem:[#allocation45_spill] sm:$0xff] %v8171_v16  ;;  %v2867_v4 = vld [vmem:[#allocation10 + $0x360] sm:$0xff] }
 0x551   :  { %5766 = vmatpush1.bf16.msra.mxu0 %v8156_v33  ;;  %5830 = vmatpush1.bf16.msra.mxu1 %v8159_v14  ;;  %v2856_v14 = vld [vmem:[#allocation10 + $0x308] sm:$0xff]  ;;  %9222 = vst [vmem:[#allocation47_spill] sm:$0xff] %v8178_v8  ;;  %9223 = vst [vmem:[#allocation48_spill] sm:$0xff] %v8180_v18 }
 0x552   :  { %5768 = vmatprep.subr.bf16.mxu0 %v8164_v46  ;;  %5832 = vmatprep.subr.bf16.mxu1 %v8166_v36  ;;  %v8176_v33 = vpack.c.bf16 %v2860_v9, %v2856_v14  ;;  %v8183_v36 = vpack.c.bf16 %v2861_v11, %v2857_v49  ;;  %v2868_v14 = vld [vmem:[#allocation10 + $0x368] sm:$0xff]  ;;  %v2866_v9 = vld [vmem:[#allocation10 + $0x358] sm:$0xff]  ;;  %v8192_v46 = vpack.c.bf16 %v2867_v4, %v2863_v47  ;;  %v2865_v49 = vld [vmem:[#allocation10 + $0x350] sm:$0xff] }
 0x553   :  { %v8190_v44 = vpack.c.bf16 %v2870_v6, %v2866_v9  ;;  %v2869_v11 = vld [vmem:[#allocation10 + $0x370] sm:$0xff]  ;;  %v2878_v9 = vld [vmem:[#allocation10 + $0x3b8] sm:$0xff]  ;;  %v2871_v6 = vld [vmem:[#allocation10 + $0x380] sm:$0xff] }
 0x554   :  { %9221 = vst [vmem:[#allocation46_spill] sm:$0xff] %v8176_v33  ;;  %9224 = vst [vmem:[#allocation49_spill] sm:$0xff] %v8183_v36  ;;  %v2875_v47 = vld [vmem:[#allocation10 + $0x3a0] sm:$0xff] }
 0x555   :  { %5770 = vmatpush1.bf16.msra.mxu0 %v8168_v40  ;;  %5834 = vmatpush1.bf16.msra.mxu1 %v8171_v16  ;;  %v2864_v16 = vld [vmem:[#allocation10 + $0x348] sm:$0xff]  ;;  %9226 = vst [vmem:[#allocation51_spill] sm:$0xff] %v8190_v44  ;;  %9227 = vst [vmem:[#allocation52_spill] sm:$0xff] %v8192_v46 }
 0x556   :  { %5772 = vmatprep.subr.bf16.mxu0 %v8176_v33  ;;  %5836 = vmatprep.subr.bf16.mxu1 %v8178_v8  ;;  %v8188_v40 = vpack.c.bf16 %v2868_v14, %v2864_v16  ;;  %v8195_v8 = vpack.c.bf16 %v2869_v11, %v2865_v49  ;;  %v2876_v16 = vld [vmem:[#allocation10 + $0x3a8] sm:$0xff]  ;;  %v2874_v14 = vld [vmem:[#allocation10 + $0x398] sm:$0xff]  ;;  %v8204_v33 = vpack.c.bf16 %v2875_v47, %v2871_v6  ;;  %v2873_v49 = vld [vmem:[#allocation10 + $0x390] sm:$0xff] }
 0x557   :  { %v8202_v4 = vpack.c.bf16 %v2878_v9, %v2874_v14  ;;  %v2877_v11 = vld [vmem:[#allocation10 + $0x3b0] sm:$0xff]  ;;  %v2886_v14 = vld [vmem:[#allocation10 + $0x3f8] sm:$0xff]  ;;  %v2879_v9 = vld [vmem:[#allocation10 + $0x3c0] sm:$0xff] }
 0x558   :  { %9225 = vst [vmem:[#allocation50_spill] sm:$0xff] %v8188_v40  ;;  %9228 = vst [vmem:[#allocation53_spill] sm:$0xff] %v8195_v8  ;;  %v2883_v6 = vld [vmem:[#allocation10 + $0x3e0] sm:$0xff] }
 0x559   :  { %5774 = vmatpush1.bf16.msra.mxu0 %v8180_v18  ;;  %5838 = vmatpush1.bf16.msra.mxu1 %v8183_v36  ;;  %v2872_v36 = vld [vmem:[#allocation10 + $0x388] sm:$0xff]  ;;  %9230 = vst [vmem:[#allocation55_spill] sm:$0xff] %v8202_v4  ;;  %9231 = vst [vmem:[#allocation56_spill] sm:$0xff] %v8204_v33 }
 0x55a   :  { %5776 = vmatprep.subr.bf16.mxu0 %v8188_v40  ;;  %5840 = vmatprep.subr.bf16.mxu1 %v8190_v44  ;;  %v8200_v18 = vpack.c.bf16 %v2876_v16, %v2872_v36  ;;  %v8207_v44 = vpack.c.bf16 %v2877_v11, %v2873_v49  ;;  %v2884_v36 = vld [vmem:[#allocation10 + $0x3e8] sm:$0xff]  ;;  %v2882_v16 = vld [vmem:[#allocation10 + $0x3d8] sm:$0xff]  ;;  %v8216_v40 = vpack.c.bf16 %v2883_v6, %v2879_v9  ;;  %v2881_v49 = vld [vmem:[#allocation10 + $0x3d0] sm:$0xff] }
 0x55b   :  { %v8214_v47 = vpack.c.bf16 %v2886_v14, %v2882_v16  ;;  %v2885_v11 = vld [vmem:[#allocation10 + $0x3f0] sm:$0xff] }
 0x55c   :  { %9229 = vst [vmem:[#allocation54_spill] sm:$0xff] %v8200_v18  ;;  %9232 = vst [vmem:[#allocation57_spill] sm:$0xff] %v8207_v44 }
 0x55d   :  { %5778 = vmatpush1.bf16.msra.mxu0 %v8192_v46  ;;  %5842 = vmatpush1.bf16.msra.mxu1 %v8195_v8  ;;  %v2880_v8 = vld [vmem:[#allocation10 + $0x3c8] sm:$0xff]  ;;  %9234 = vst [vmem:[#allocation71_spill] sm:$0xff] %v8214_v47  ;;  %9235 = vst [vmem:[#allocation72_spill] sm:$0xff] %v8216_v40 }
 0x55e   :  { %5780 = vmatprep.subr.bf16.mxu0 %v8200_v18  ;;  %5844 = vmatprep.subr.bf16.mxu1 %v8202_v4  ;;  %v8212_v46 = vpack.c.bf16 %v2884_v36, %v2880_v8  ;;  %v8219_v4 = vpack.c.bf16 %v2885_v11, %v2881_v49  ;;  %v3055_v8 = vld [vmem:[#allocation9 + $0x28] sm:$0xff] }
 0x560   :  { %9233 = vst [vmem:[#allocation58_spill] sm:$0xff] %v8212_v46  ;;  %9236 = vst [vmem:[#allocation73_spill] sm:$0xff] %v8219_v4 }
 0x561   :  { %5782 = vmatpush1.bf16.msra.mxu0 %v8204_v33  ;;  %5846 = vmatpush1.bf16.msra.mxu1 %v8207_v44  ;;  %v3051_v44 = vld [vmem:[#allocation9 + $0x8] sm:$0xff] }
 0x562   :  { %5784 = vmatprep.subr.bf16.mxu0 %v8212_v46  ;;  %5848 = vmatprep.subr.bf16.mxu1 %v8214_v47  ;;  %v8224_v36 = vpack.c.bf16 %v3055_v8, %v3051_v44 }
 0x564   :  { %9237 = vst [vmem:[#allocation74_spill] sm:$0xff] %v8224_v36 }
 0x565   :  { %5786 = vmatpush1.bf16.msra.mxu0 %v8216_v40  ;;  %5850 = vmatpush1.bf16.msra.mxu1 %v8219_v4 }
 0x566   :  { %5884 = vmatprep.subr.bf16.mxu1 %v7933_v24  ;;  %5852 = vmatprep.subr.bf16.mxu0 %v8224_v36 }
 0x5db   :  { %v2437_v16 = vpop.f32.mrb[14].mxu0  ;;  %v2508_v14 = vpop.f32.mrb[38].mxu1 }
 0x5dc   :  { %v2438_v9 = vadd.f32 %v7936_v50, %v2437_v16  ;;  %v2439_v6 = vpop.f32.mrb[15].mxu0  ;;  %v2510_v49 = vpop.f32.mrb[39].mxu1  ;;  %v2509_v40 = vadd.f32 %v7942_v54, %v2508_v14 }
 0x5dd   :  { %v2440_v11 = vadd.f32 %v7939_v55, %v2439_v6  ;;  %v2511_v44 = vadd.f32 %v7945_v37, %v2510_v49 }
 0x5de   :  { %6605 = vtanh.f32 %v2438_v9  ;;  %v9238_v9 = vld [vmem:[#allocation63_spill] sm:$0xff] }
 0x5df   :  { %6607 = vtanh.f32 %v2440_v11 }
 0x5e0   :  { %6609 = vtanh.f32 %v2509_v40 }
 0x5e1   :  { %6611 = vtanh.f32 %v2511_v44  ;;  %v9239_v44 = vld [vmem:[#allocation64_spill] sm:$0xff] }
 0x5e8   :  { %v6606_v8 = vpop.eup %6605 }
 0x5e9   :  { %v2517_v4 = vmul.f32 0.5, %v6606_v8  ;;  %v6608_v24 = vpop.eup %6607 }
 0x5ea   :  { %v2519_v36 = vmul.f32 0.5, %v6608_v24  ;;  %v6610_v46 = vpop.eup %6609 }
 0x5eb   :  { %v2518_v47 = vadd.f32 0.5, %v2517_v4  ;;  %v6612_v55 = vpop.eup %6611 }
 0x5ec   :  { %v2520_v33 = vadd.f32 0.5, %v2519_v36  ;;  %v2521_v54 = vmul.f32 0.5, %v6612_v55 }
 0x5ed   :  { %v2524_v50 = vmul.f32 %v6610_v46, %v2518_v47 }
 0x5ee   :  { %v2523_v16 = vmul.f32 %v2520_v33, %v7949_v3  ;;  %v2522_v37 = vadd.f32 0.5, %v2521_v54 }
 0x5f0   :  { %v8233_v18 = vadd.f32 %v2524_v50, %v2523_v16 }
 0x5f2   :  { %6613 = vtanh.f32 %v8233_v18 }
 0x5fb   :  { %v2664_v40 = vpop.f32.mrb[16].mxu0  ;;  %v2735_v14 = vpop.f32.mrb[24].mxu1 }
 0x5fc   :  { %v2740_v6 = vadd.f32 %v2664_v40, %v9238_v9  ;;  %v2666_v49 = vpop.f32.mrb[17].mxu0  ;;  %v2737_v4 = vpop.f32.mrb[25].mxu1  ;;  %v6499_v46 = vadd.f32 %v2735_v14, %v9107_v5 }
 0x5fd   :  { %v6614_v11 = vpop.eup %6613  ;;  %v2741_v8 = vadd.f32 %v2666_v49, %v9239_v44  ;;  %v6500_v33 = vadd.f32 %v2737_v4, %v7347_v0  ;;  %v3050_v49 = vld [vmem:[#allocation9] sm:$0xff]  ;;  %v3059_v4 = vld [vmem:[#allocation9 + $0x48] sm:$0xff] }
 0x5fe   :  { %6615 = vtanh.f32 %v2740_v6  ;;  %v8239_v3 = vmul.f32 %v6614_v11, %v2522_v37  ;;  %v3054_v11 = vld [vmem:[#allocation9 + $0x20] sm:$0xff]  ;;  %v3063_v44 = vld [vmem:[#allocation9 + $0x68] sm:$0xff] }
 0x5ff   :  { %6617 = vtanh.f32 %v2741_v8 }
 0x600   :  { %9240 = vst [vmem:[#allocation61_spill] sm:$0xff] %v8239_v3  ;;  %2951 = vmatprep.mubr.f32.mxu0 %v8239_v3  ;;  %3022 = vmatprep.mubr.f32.mxu1 %v8239_v3  ;;  %6619 = vtanh.f32 %v6499_v46  ;;  %v3850_v3 = vld [vmem:[#allocation10 + $0x1d8] sm:$0xff] }
 0x601   :  { %6621 = vtanh.f32 %v6500_v33 }
 0x608   :  { %v6616_v47 = vpop.eup %6615 }
 0x609   :  { %v2748_v36 = vmul.f32 0.5, %v6616_v47  ;;  %v6618_v24 = vpop.eup %6617  ;;  %v8248_v47 = vpack.c.bf16 %v3054_v11, %v3050_v49  ;;  %v3074_v49 = vld [vmem:[#allocation9 + $0xc0] sm:$0xff] }
 0x60a   :  { %v2750_v16 = vmul.f32 0.5, %v6618_v24  ;;  %v6620_v55 = vpop.eup %6619  ;;  %v3058_v24 = vld [vmem:[#allocation9 + $0x40] sm:$0xff] }
 0x60b   :  { %v2749_v50 = vadd.f32 0.5, %v2748_v36  ;;  %v6622_v9 = vpop.eup %6621  ;;  %v8252_v36 = vpack.c.bf16 %v3063_v44, %v3059_v4  ;;  %v3078_v11 = vld [vmem:[#allocation9 + $0xe0] sm:$0xff]  ;;  %v3083_v4 = vld [vmem:[#allocation9 + $0x108] sm:$0xff] }
 0x60c   :  { %v2751_v54 = vadd.f32 0.5, %v2750_v16  ;;  %v2752_v6 = vmul.f32 0.5, %v6622_v9  ;;  %v3071_v16 = vld [vmem:[#allocation9 + $0xa8] sm:$0xff] }
 0x60d   :  { %v2755_v40 = vmul.f32 %v6620_v55, %v2749_v50  ;;  %v3067_v50 = vld [vmem:[#allocation9 + $0x88] sm:$0xff] }
 0x60e   :  { %v2754_v14 = vmul.f32 %v2751_v54, %v7961_v52  ;;  %v2753_v8 = vadd.f32 0.5, %v2752_v6  ;;  %v3062_v52 = vld [vmem:[#allocation9 + $0x60] sm:$0xff]  ;;  %v8262_v54 = vpack.c.bf16 %v3071_v16, %v3067_v50  ;;  %v3075_v9 = vld [vmem:[#allocation9 + $0xc8] sm:$0xff] }
 0x60f   :  { %v8258_v55 = vpack.c.bf16 %v3062_v52, %v3058_v24  ;;  %v3079_v6 = vld [vmem:[#allocation9 + $0xe8] sm:$0xff]  ;;  %v3090_v16 = vld [vmem:[#allocation9 + $0x140] sm:$0xff] }
 0x610   :  { %v8245_v37 = vadd.f32 %v2755_v40, %v2754_v14  ;;  %v3066_v40 = vld [vmem:[#allocation9 + $0x80] sm:$0xff]  ;;  %v3087_v44 = vld [vmem:[#allocation9 + $0x128] sm:$0xff] }
 0x611   :  { %v3070_v14 = vld [vmem:[#allocation9 + $0xa0] sm:$0xff]  ;;  %v3091_v24 = vld [vmem:[#allocation9 + $0x148] sm:$0xff] }
 0x612   :  { %6623 = vtanh.f32 %v8245_v37  ;;  %v3095_v52 = vld [vmem:[#allocation9 + $0x168] sm:$0xff] }
 0x61c   :  { %v6624_v46 = vpop.eup %6623 }
 0x61d   :  { %v8250_v33 = vmul.f32 %v6624_v46, %v2753_v8  ;;  %v8276_v8 = vpack.c.bf16 %v3078_v11, %v3074_v49  ;;  %v3082_v46 = vld [vmem:[#allocation9 + $0x100] sm:$0xff]  ;;  %v3107_v49 = vld [vmem:[#allocation9 + $0x1c8] sm:$0xff] }
 0x61e   :  { %v3111_v11 = vld [vmem:[#allocation9 + $0x1e8] sm:$0xff] }
 0x61f   :  { %2952 = vmatmul.mubr.f32.vlgmr.msra.gmra.mrb[18].mxu0 %v8250_v33  ;;  %3023 = vmatmul.mubr.f32.vlgmr.msra.gmra.mrb[40].mxu1 %v8250_v33 }
 0x620   :  { %5854 = vmatpush1.bf16.msra.mxu0 %v8248_v47  ;;  %5886 = vmatpush1.bf16.msra.mxu1 %v7964_v48  ;;  %v8268_v48 = vpack.c.bf16 %v3070_v14, %v3066_v40  ;;  %v3099_v40 = vld [vmem:[#allocation9 + $0x188] sm:$0xff] }
 0x621   :  { %5856 = vmatprep.subr.bf16.mxu0 %v8252_v36  ;;  %5888 = vmatprep.subr.bf16.mxu1 %v7968_v27  ;;  %v8272_v27 = vpack.c.bf16 %v3079_v6, %v3075_v9  ;;  %v3103_v14 = vld [vmem:[#allocation9 + $0x1a8] sm:$0xff]  ;;  %v3098_v6 = vld [vmem:[#allocation9 + $0x180] sm:$0xff] }
 0x622   :  { %3178 = vmatprep.mubr.f32.mxu0 %v9068_v63  ;;  %3249 = vmatprep.mubr.f32.mxu1 %v9068_v63 }
 0x624   :  { %5858 = vmatpush1.bf16.msra.mxu0 %v8258_v55  ;;  %5890 = vmatpush1.bf16.msra.mxu1 %v7974_v56  ;;  %v8280_v56 = vpack.c.bf16 %v3087_v44, %v3083_v4  ;;  %v3106_v44 = vld [vmem:[#allocation9 + $0x1c0] sm:$0xff] }
 0x625   :  { %5860 = vmatprep.subr.bf16.mxu0 %v8262_v54  ;;  %5892 = vmatprep.subr.bf16.mxu1 %v7978_v2  ;;  %v3086_v2 = vld [vmem:[#allocation9 + $0x120] sm:$0xff] }
 0x626   :  { %v8284_v50 = vpack.c.bf16 %v3086_v2, %v3082_v46  ;;  %v9271_v2 = vld [vmem:[#allocation52_spill] sm:$0xff] }
 0x628   :  { %5862 = vmatpush1.bf16.msra.mxu0 %v8268_v48  ;;  %5894 = vmatpush1.bf16.msra.mxu1 %v7984_v31  ;;  %v8288_v31 = vpack.c.bf16 %v3095_v52, %v3091_v24  ;;  %v9272_v24 = vld [vmem:[#allocation53_spill] sm:$0xff]  ;;  %v9273_v52 = vld [vmem:[#allocation54_spill] sm:$0xff] }
 0x629   :  { %5864 = vmatprep.subr.bf16.mxu0 %v8272_v27  ;;  %5896 = vmatprep.subr.bf16.mxu1 %v7988_v41  ;;  %v3094_v41 = vld [vmem:[#allocation9 + $0x160] sm:$0xff] }
 0x62a   :  { %v8292_v9 = vpack.c.bf16 %v3094_v41, %v3090_v16  ;;  %v9274_v16 = vld [vmem:[#allocation55_spill] sm:$0xff]  ;;  %v9275_v41 = vld [vmem:[#allocation56_spill] sm:$0xff] }
 0x62c   :  { %5866 = vmatpush1.bf16.msra.mxu0 %v8276_v8  ;;  %5898 = vmatpush1.bf16.msra.mxu1 %v7992_v22  ;;  %v8296_v22 = vpack.c.bf16 %v3103_v14, %v3099_v40  ;;  %v9276_v40 = vld [vmem:[#allocation57_spill] sm:$0xff]  ;;  %v9277_v14 = vld [vmem:[#allocation58_spill] sm:$0xff] }
 0x62d   :  { %5868 = vmatprep.subr.bf16.mxu0 %v8280_v56  ;;  %5900 = vmatprep.subr.bf16.mxu1 %v7996_v42  ;;  %v3102_v42 = vld [vmem:[#allocation9 + $0x1a0] sm:$0xff] }
 0x62e   :  { %v8300_v4 = vpack.c.bf16 %v3102_v42, %v3098_v6  ;;  %v9278_v6 = vld [vmem:[#allocation71_spill] sm:$0xff]  ;;  %v9279_v42 = vld [vmem:[#allocation72_spill] sm:$0xff] }
 0x630   :  { %5870 = vmatpush1.bf16.msra.mxu0 %v8284_v50  ;;  %5902 = vmatpush1.bf16.msra.mxu1 %v8000_v29  ;;  %v8304_v29 = vpack.c.bf16 %v3111_v11, %v3107_v49  ;;  %v9280_v49 = vld [vmem:[#allocation73_spill] sm:$0xff]  ;;  %v9281_v11 = vld [vmem:[#allocation74_spill] sm:$0xff] }
 0x631   :  { %5872 = vmatprep.subr.bf16.mxu0 %v8288_v31  ;;  %5904 = vmatprep.subr.bf16.mxu1 %v8004_v32  ;;  %v3110_v32 = vld [vmem:[#allocation9 + $0x1e0] sm:$0xff] }
 0x632   :  { %v8308_v46 = vpack.c.bf16 %v3110_v32, %v3106_v44  ;;  %v3569_v44 = vld [vmem:[#allocation9 + $0x18] sm:$0xff] }
 0x633   :  { %v3573_v32 = vld [vmem:[#allocation9 + $0x38] sm:$0xff] }
 0x634   :  { %5874 = vmatpush1.bf16.msra.mxu0 %v8292_v9  ;;  %5906 = vmatpush1.bf16.msra.mxu1 %v8008_v34  ;;  %v9241_v34 = vld [vmem:[#allocation22_spill] sm:$0xff] }
 0x635   :  { %5876 = vmatprep.subr.bf16.mxu0 %v8296_v22  ;;  %5908 = vmatprep.subr.bf16.mxu1 %v8012_v38  ;;  %v9242_v38 = vld [vmem:[#allocation23_spill] sm:$0xff] }
 0x638   :  { %5878 = vmatpush1.bf16.msra.mxu0 %v8300_v4  ;;  %5910 = vmatpush1.bf16.msra.mxu1 %v8016_v23  ;;  %v9243_v23 = vld [vmem:[#allocation24_spill] sm:$0xff] }
 0x639   :  { %5880 = vmatprep.subr.bf16.mxu0 %v8304_v29  ;;  %5912 = vmatprep.subr.bf16.mxu1 %v8020_v21  ;;  %v9244_v21 = vld [vmem:[#allocation25_spill] sm:$0xff] }
 0x63c   :  { %5882 = vmatpush1.bf16.msra.mxu0 %v8308_v46  ;;  %5914 = vmatpush1.bf16.msra.mxu1 %v8024_v25  ;;  %v9245_v25 = vld [vmem:[#allocation26_spill] sm:$0xff] }
 0x63d   :  { %5916 = vmatprep.subr.bf16.mxu0 %v8032_v26  ;;  %5980 = vmatprep.subr.bf16.mxu1 %v8034_v58  ;;  %v9246_v26 = vld [vmem:[#allocation27_spill] sm:$0xff]  ;;  %v9247_v58 = vld [vmem:[#allocation28_spill] sm:$0xff] }
 0x63f   :  { %3179 = vmatmul.mubr.f32.vlgmr.msra.gmra.mrb[20].mxu0 %v8250_v33  ;;  %3250 = vmatmul.mubr.f32.vlgmr.msra.gmra.mrb[26].mxu1 %v8250_v33  ;;  %v9270_v33 = vld [vmem:[#allocation51_spill] sm:$0xff] }
 0x640   :  { %5918 = vmatpush1.bf16.msra.mxu0 %v8036_v13  ;;  %5982 = vmatpush1.bf16.msra.mxu1 %v8039_v20  ;;  %v9248_v13 = vld [vmem:[#allocation29_spill] sm:$0xff]  ;;  %v9249_v20 = vld [vmem:[#allocation30_spill] sm:$0xff] }
 0x641   :  { %5920 = vmatprep.subr.bf16.mxu0 %v8044_v15  ;;  %5984 = vmatprep.subr.bf16.mxu1 %v8046_v61  ;;  %v9250_v15 = vld [vmem:[#allocation31_spill] sm:$0xff]  ;;  %v9251_v61 = vld [vmem:[#allocation32_spill] sm:$0xff] }
 0x644   :  { %5922 = vmatpush1.bf16.msra.mxu0 %v8048_v45  ;;  %5986 = vmatpush1.bf16.msra.mxu1 %v8051_v62  ;;  %v9252_v45 = vld [vmem:[#allocation33_spill] sm:$0xff]  ;;  %v9253_v62 = vld [vmem:[#allocation34_spill] sm:$0xff] }
 0x645   :  { %5924 = vmatprep.subr.bf16.mxu0 %v8056_v39  ;;  %5988 = vmatprep.subr.bf16.mxu1 %v8058_v60  ;;  %v9254_v39 = vld [vmem:[#allocation35_spill] sm:$0xff]  ;;  %v9255_v60 = vld [vmem:[#allocation36_spill] sm:$0xff] }
 0x648   :  { %5926 = vmatpush1.bf16.msra.mxu0 %v8060_v28  ;;  %5990 = vmatpush1.bf16.msra.mxu1 %v8063_v30  ;;  %v9256_v28 = vld [vmem:[#allocation37_spill] sm:$0xff]  ;;  %v9257_v30 = vld [vmem:[#allocation38_spill] sm:$0xff] }
 0x649   :  { %5928 = vmatprep.subr.bf16.mxu0 %v8068_v51  ;;  %5992 = vmatprep.subr.bf16.mxu1 %v8070_v10  ;;  %v9258_v51 = vld [vmem:[#allocation39_spill] sm:$0xff]  ;;  %v9259_v10 = vld [vmem:[#allocation40_spill] sm:$0xff] }
 0x64c   :  { %5930 = vmatpush1.bf16.msra.mxu0 %v8072_v7  ;;  %5994 = vmatpush1.bf16.msra.mxu1 %v8075_v12  ;;  %v9260_v7 = vld [vmem:[#allocation41_spill] sm:$0xff]  ;;  %v9261_v12 = vld [vmem:[#allocation42_spill] sm:$0xff] }
 0x64d   :  { %5932 = vmatprep.subr.bf16.mxu0 %v8080_v59  ;;  %5996 = vmatprep.subr.bf16.mxu1 %v8082_v57  ;;  %v9262_v59 = vld [vmem:[#allocation43_spill] sm:$0xff]  ;;  %v9263_v57 = vld [vmem:[#allocation44_spill] sm:$0xff] }
 0x650   :  { %5934 = vmatpush1.bf16.msra.mxu0 %v8084_v43  ;;  %5998 = vmatpush1.bf16.msra.mxu1 %v8087_v53  ;;  %v9264_v43 = vld [vmem:[#allocation45_spill] sm:$0xff]  ;;  %v9265_v53 = vld [vmem:[#allocation46_spill] sm:$0xff] }
 0x651   :  { %5936 = vmatprep.subr.bf16.mxu0 %v8092_v1  ;;  %6000 = vmatprep.subr.bf16.mxu1 %v8094_v19  ;;  %v9266_v1 = vld [vmem:[#allocation47_spill] sm:$0xff]  ;;  %v9267_v19 = vld [vmem:[#allocation48_spill] sm:$0xff] }
 0x654   :  { %5938 = vmatpush1.bf16.msra.mxu0 %v9241_v34  ;;  %6002 = vmatpush1.bf16.msra.mxu1 %v8099_v17  ;;  %v9268_v17 = vld [vmem:[#allocation49_spill] sm:$0xff]  ;;  %v8381_v34 = vpack.c.bf16 %v3573_v32, %v3569_v44 }
 0x655   :  { %5940 = vmatprep.subr.bf16.mxu0 %v8103_v35  ;;  %6004 = vmatprep.subr.bf16.mxu1 %v9242_v38  ;;  %v9269_v35 = vld [vmem:[#allocation50_spill] sm:$0xff] }
 0x658   :  { %5942 = vmatpush1.bf16.msra.mxu0 %v9243_v23  ;;  %6006 = vmatpush1.bf16.msra.mxu1 %v9244_v21  ;;  %v8384_v21 = vld [vmem:[#allocation12] sm:$0xff] }
 0x659   :  { %5944 = vmatprep.subr.bf16.mxu0 %v9245_v25  ;;  %6008 = vmatprep.subr.bf16.mxu1 %v9246_v26 }
 0x65c   :  { %5946 = vmatpush1.bf16.msra.mxu0 %v9247_v58  ;;  %6010 = vmatpush1.bf16.msra.mxu1 %v9248_v13  ;;  %v8387_v13 = vld [vmem:[#allocation12 + $0x8] sm:$0xff] }
 0x65d   :  { %5948 = vmatprep.subr.bf16.mxu0 %v9249_v20  ;;  %6012 = vmatprep.subr.bf16.mxu1 %v9250_v15  ;;  %v8390_v15 = vld [vmem:[#allocation12 + $0x10] sm:$0xff] }
 0x660   :  { %5950 = vmatpush1.bf16.msra.mxu0 %v9251_v61  ;;  %6014 = vmatpush1.bf16.msra.mxu1 %v9252_v45  ;;  %v8393_v45 = vld [vmem:[#allocation12 + $0x18] sm:$0xff] }
 0x661   :  { %5952 = vmatprep.subr.bf16.mxu0 %v9253_v62  ;;  %6016 = vmatprep.subr.bf16.mxu1 %v9254_v39 }
 0x664   :  { %5954 = vmatpush1.bf16.msra.mxu0 %v9255_v60  ;;  %6018 = vmatpush1.bf16.msra.mxu1 %v9256_v28 }
 0x665   :  { %5956 = vmatprep.subr.bf16.mxu0 %v9257_v30  ;;  %6020 = vmatprep.subr.bf16.mxu1 %v9258_v51 }
 0x668   :  { %5958 = vmatpush1.bf16.msra.mxu0 %v9259_v10  ;;  %6022 = vmatpush1.bf16.msra.mxu1 %v9260_v7 }
 0x669   :  { %5960 = vmatprep.subr.bf16.mxu0 %v9261_v12  ;;  %6024 = vmatprep.subr.bf16.mxu1 %v9262_v59 }
 0x66c   :  { %5962 = vmatpush1.bf16.msra.mxu0 %v9263_v57  ;;  %6026 = vmatpush1.bf16.msra.mxu1 %v9264_v43 }
 0x66d   :  { %5964 = vmatprep.subr.bf16.mxu0 %v9265_v53  ;;  %6028 = vmatprep.subr.bf16.mxu1 %v9266_v1 }
 0x670   :  { %5966 = vmatpush1.bf16.msra.mxu0 %v9267_v19  ;;  %6030 = vmatpush1.bf16.msra.mxu1 %v9268_v17 }
 0x671   :  { %5968 = vmatprep.subr.bf16.mxu0 %v9269_v35  ;;  %6032 = vmatprep.subr.bf16.mxu1 %v9270_v33  ;;  %v9282_v35 = vld [vmem:[#allocation65_spill] sm:$0xff] }
 0x674   :  { %5970 = vmatpush1.bf16.msra.mxu0 %v9271_v2  ;;  %6034 = vmatpush1.bf16.msra.mxu1 %v9272_v24 }
 0x675   :  { %5972 = vmatprep.subr.bf16.mxu0 %v9273_v52  ;;  %6036 = vmatprep.subr.bf16.mxu1 %v9274_v16  ;;  %v9283_v16 = vld [vmem:[#allocation66_spill] sm:$0xff] }
 0x678   :  { %5974 = vmatpush1.bf16.msra.mxu0 %v9275_v41  ;;  %6038 = vmatpush1.bf16.msra.mxu1 %v9276_v40 }
 0x679   :  { %5976 = vmatprep.subr.bf16.mxu0 %v9277_v14  ;;  %6040 = vmatprep.subr.bf16.mxu1 %v9278_v6 }
 0x67c   :  { %5978 = vmatpush1.bf16.msra.mxu0 %v9279_v42  ;;  %6042 = vmatpush1.bf16.msra.mxu1 %v9280_v49 }
 0x67d   :  { %6044 = vmatprep.subr.bf16.mxu0 %v9281_v11  ;;  %6076 = vmatprep.subr.bf16.mxu1 %v8381_v34 }
 0x6f2   :  { %v2953_v38 = vpop.f32.mrb[18].mxu0  ;;  %v3024_v23 = vpop.f32.mrb[40].mxu1 }
 0x6f3   :  { %v2954_v25 = vadd.f32 %v8384_v21, %v2953_v38  ;;  %v2955_v26 = vpop.f32.mrb[19].mxu0  ;;  %v3026_v58 = vpop.f32.mrb[41].mxu1  ;;  %v3025_v61 = vadd.f32 %v8390_v15, %v3024_v23 }
 0x6f4   :  { %v2956_v20 = vadd.f32 %v8387_v13, %v2955_v26  ;;  %v3027_v62 = vadd.f32 %v8393_v45, %v3026_v58 }
 0x6f5   :  { %6625 = vtanh.f32 %v2954_v25 }
 0x6f6   :  { %6627 = vtanh.f32 %v2956_v20 }
 0x6f7   :  { %6629 = vtanh.f32 %v3025_v61  ;;  %v3568_v61 = vld [vmem:[#allocation9 + $0x10] sm:$0xff] }
 0x6f8   :  { %6631 = vtanh.f32 %v3027_v62  ;;  %v3572_v62 = vld [vmem:[#allocation9 + $0x30] sm:$0xff] }
 0x6ff   :  { %v6626_v39 = vpop.eup %6625 }
 0x700   :  { %v3033_v60 = vmul.f32 0.5, %v6626_v39  ;;  %v6628_v28 = vpop.eup %6627  ;;  %v3577_v39 = vld [vmem:[#allocation9 + $0x58] sm:$0xff] }
 0x701   :  { %v3035_v51 = vmul.f32 0.5, %v6628_v28  ;;  %v6630_v10 = vpop.eup %6629 }
 0x702   :  { %v3034_v30 = vadd.f32 0.5, %v3033_v60  ;;  %v6632_v43 = vpop.eup %6631  ;;  %v3581_v60 = vld [vmem:[#allocation9 + $0x78] sm:$0xff] }
 0x703   :  { %v3036_v7 = vadd.f32 0.5, %v3035_v51  ;;  %v3037_v53 = vmul.f32 0.5, %v6632_v43  ;;  %v8412_v51 = vpack.c.bf16 %v3572_v62, %v3568_v61  ;;  %v3589_v43 = vld [vmem:[#allocation9 + $0xb8] sm:$0xff] }
 0x704   :  { %v3040_v12 = vmul.f32 %v6630_v10, %v3034_v30  ;;  %v3794_v62 = vld [vmem:[#allocation10 + $0x18] sm:$0xff] }
 0x705   :  { %v3039_v59 = vmul.f32 %v3036_v7, %v8233_v18  ;;  %v3038_v17 = vadd.f32 0.5, %v3037_v53  ;;  %v8416_v7 = vpack.c.bf16 %v3581_v60, %v3577_v39  ;;  %v3798_v39 = vld [vmem:[#allocation10 + $0x38] sm:$0xff]  ;;  %v3791_v60 = vld [vmem:[#allocation10] sm:$0xff] }
 0x707   :  { %v8397_v57 = vadd.f32 %v3040_v12, %v3039_v59  ;;  %v3576_v12 = vld [vmem:[#allocation9 + $0x50] sm:$0xff]  ;;  %v3585_v59 = vld [vmem:[#allocation9 + $0x98] sm:$0xff] }
 0x709   :  { %6633 = vtanh.f32 %v8397_v57 }
 0x712   :  { %v3180_v1 = vpop.f32.mrb[20].mxu0  ;;  %v3251_v19 = vpop.f32.mrb[26].mxu1 }
 0x713   :  { %v3256_v33 = vadd.f32 %v3180_v1, %v9282_v35  ;;  %v3182_v2 = vpop.f32.mrb[21].mxu0  ;;  %v3253_v24 = vpop.f32.mrb[27].mxu1  ;;  %v6501_v40 = vadd.f32 %v3251_v19, %v9107_v5  ;;  %v8426_v1 = vpack.c.bf16 %v3589_v43, %v3585_v59  ;;  %v3584_v19 = vld [vmem:[#allocation9 + $0x90] sm:$0xff]  ;;  %v3593_v35 = vld [vmem:[#allocation9 + $0xd8] sm:$0xff]  ;;  %v3804_v59 = vld [vmem:[#allocation10 + $0x68] sm:$0xff] }
 0x714   :  { %v6634_v52 = vpop.eup %6633  ;;  %v3257_v41 = vadd.f32 %v3182_v2, %v9283_v16  ;;  %v6502_v14 = vadd.f32 %v3253_v24, %v7347_v0  ;;  %v3592_v2 = vld [vmem:[#allocation9 + $0xd0] sm:$0xff]  ;;  %v3605_v16 = vld [vmem:[#allocation9 + $0x138] sm:$0xff] }
 0x715   :  { %6635 = vtanh.f32 %v3256_v33  ;;  %v8403_v18 = vmul.f32 %v6634_v52, %v3038_v17  ;;  %v3588_v17 = vld [vmem:[#allocation9 + $0xb0] sm:$0xff]  ;;  %v3597_v33 = vld [vmem:[#allocation9 + $0xf8] sm:$0xff] }
 0x716   :  { %6637 = vtanh.f32 %v3257_v41  ;;  %v3596_v24 = vld [vmem:[#allocation9 + $0xf0] sm:$0xff]  ;;  %v3601_v52 = vld [vmem:[#allocation9 + $0x118] sm:$0xff] }
 0x717   :  { %9284 = vst [vmem:[#allocation62_spill] sm:$0xff] %v8403_v18  ;;  %3467 = vmatprep.mubr.f32.mxu0 %v8403_v18  ;;  %3538 = vmatprep.mubr.f32.mxu1 %v8403_v18  ;;  %6639 = vtanh.f32 %v6501_v40  ;;  %v8440_v41 = vpack.c.bf16 %v3596_v24, %v3592_v2  ;;  %v3604_v40 = vld [vmem:[#allocation9 + $0x130] sm:$0xff]  ;;  %v3802_v43 = vld [vmem:[#allocation10 + $0x58] sm:$0xff]  ;;  %v3852_v18 = vld [vmem:[#allocation10 + $0x1e8] sm:$0xff] }
 0x718   :  { %6641 = vtanh.f32 %v6502_v14  ;;  %v3609_v14 = vld [vmem:[#allocation9 + $0x158] sm:$0xff] }
 0x71f   :  { %v6636_v6 = vpop.eup %6635 }
 0x720   :  { %v3264_v42 = vmul.f32 0.5, %v6636_v6  ;;  %v6638_v49 = vpop.eup %6637  ;;  %v3613_v6 = vld [vmem:[#allocation9 + $0x178] sm:$0xff] }
 0x721   :  { %v3266_v44 = vmul.f32 0.5, %v6638_v49  ;;  %v6640_v32 = vpop.eup %6639  ;;  %v3612_v49 = vld [vmem:[#allocation9 + $0x170] sm:$0xff] }
 0x722   :  { %v3265_v11 = vadd.f32 0.5, %v3264_v42  ;;  %v6642_v58 = vpop.eup %6641 }
 0x723   :  { %v3267_v38 = vadd.f32 0.5, %v3266_v44  ;;  %v3268_v20 = vmul.f32 0.5, %v6642_v58  ;;  %v3621_v44 = vld [vmem:[#allocation9 + $0x1b8] sm:$0xff] }
 0x724   :  { %v3271_v23 = vmul.f32 %v6640_v32, %v3265_v11  ;;  %v3617_v11 = vld [vmem:[#allocation9 + $0x198] sm:$0xff] }
 0x725   :  { %v3270_v25 = vmul.f32 %v3267_v38, %v8245_v37  ;;  %v3269_v28 = vadd.f32 0.5, %v3268_v20  ;;  %v3580_v37 = vld [vmem:[#allocation9 + $0x70] sm:$0xff] }
 0x726   :  { %v8422_v53 = vpack.c.bf16 %v3580_v37, %v3576_v12  ;;  %v3620_v38 = vld [vmem:[#allocation9 + $0x1b0] sm:$0xff] }
 0x727   :  { %v8409_v26 = vadd.f32 %v3271_v23, %v3270_v25  ;;  %v3625_v23 = vld [vmem:[#allocation9 + $0x1d8] sm:$0xff]  ;;  %v3628_v20 = vld [vmem:[#allocation9 + $0x1f0] sm:$0xff] }
 0x728   :  { %v3629_v25 = vld [vmem:[#allocation9 + $0x1f8] sm:$0xff]  ;;  %v3793_v12 = vld [vmem:[#allocation10 + $0x10] sm:$0xff] }
 0x729   :  { %6643 = vtanh.f32 %v8409_v26 }
 0x733   :  { %v6644_v30 = vpop.eup %6643 }
 0x734   :  { %v8414_v10 = vmul.f32 %v6644_v30, %v3269_v28  ;;  %v3795_v28 = vld [vmem:[#allocation10 + $0x20] sm:$0xff]  ;;  %v8482_v30 = vpack.c.bf16 %v3798_v39, %v3794_v62  ;;  %v3822_v39 = vld [vmem:[#allocation10 + $0xf8] sm:$0xff] }
 0x736   :  { %3468 = vmatmul.mubr.f32.vlgmr.msra.gmra.mrb[22].mxu0 %v8414_v10  ;;  %3539 = vmatmul.mubr.f32.vlgmr.msra.gmra.mrb[42].mxu1 %v8414_v10 }
 0x737   :  { %6046 = vmatpush1.bf16.msra.mxu0 %v8248_v47  ;;  %6078 = vmatpush1.bf16.msra.mxu1 %v8412_v51  ;;  %v8432_v47 = vpack.c.bf16 %v3588_v17, %v3584_v19  ;;  %v3806_v17 = vld [vmem:[#allocation10 + $0x78] sm:$0xff] }
 0x738   :  { %6048 = vmatprep.subr.bf16.mxu0 %v8252_v36  ;;  %6080 = vmatprep.subr.bf16.mxu1 %v8416_v7  ;;  %v8436_v36 = vpack.c.bf16 %v3597_v33, %v3593_v35  ;;  %v3799_v35 = vld [vmem:[#allocation10 + $0x40] sm:$0xff]  ;;  %v8494_v2 = vpack.c.bf16 %v3806_v17, %v3802_v43  ;;  %v3824_v17 = vld [vmem:[#allocation10 + $0x108] sm:$0xff] }
 0x739   :  { %3694 = vmatprep.mubr.f32.mxu0 %v9068_v63  ;;  %3765 = vmatprep.mubr.f32.mxu1 %v9068_v63  ;;  %v3803_v33 = vld [vmem:[#allocation10 + $0x60] sm:$0xff] }
 0x73a   :  { %v8496_v24 = vpack.c.bf16 %v3803_v33, %v3799_v35  ;;  %v3828_v35 = vld [vmem:[#allocation10 + $0x128] sm:$0xff]  ;;  %v3826_v33 = vld [vmem:[#allocation10 + $0x118] sm:$0xff] }
 0x73b   :  { %6050 = vmatpush1.bf16.msra.mxu0 %v8258_v55  ;;  %6082 = vmatpush1.bf16.msra.mxu1 %v8422_v53  ;;  %v8444_v55 = vpack.c.bf16 %v3605_v16, %v3601_v52  ;;  %v3801_v52 = vld [vmem:[#allocation10 + $0x50] sm:$0xff] }
 0x73c   :  { %6052 = vmatprep.subr.bf16.mxu0 %v8262_v54  ;;  %6084 = vmatprep.subr.bf16.mxu1 %v8426_v1  ;;  %v3600_v54 = vld [vmem:[#allocation9 + $0x110] sm:$0xff] }
 0x73d   :  { %v8448_v42 = vpack.c.bf16 %v3604_v40, %v3600_v54  ;;  %v3805_v16 = vld [vmem:[#allocation10 + $0x70] sm:$0xff]  ;;  %v3808_v40 = vld [vmem:[#allocation10 + $0x88] sm:$0xff] }
 0x73e   :  { %v8499_v54 = vpack.c.bf16 %v3805_v16, %v3801_v52  ;;  %v8528_v52 = vpack.c.bf16 %v3828_v35, %v3824_v17  ;;  %v3830_v16 = vld [vmem:[#allocation10 + $0x138] sm:$0xff]  ;;  %v3833_v17 = vld [vmem:[#allocation10 + $0x150] sm:$0xff] }
 0x73f   :  { %6054 = vmatpush1.bf16.msra.mxu0 %v8268_v48  ;;  %6086 = vmatpush1.bf16.msra.mxu1 %v8432_v47  ;;  %v8452_v48 = vpack.c.bf16 %v3613_v6, %v3609_v14  ;;  %v3812_v14 = vld [vmem:[#allocation10 + $0xa8] sm:$0xff]  ;;  %v3810_v6 = vld [vmem:[#allocation10 + $0x98] sm:$0xff]  ;;  %v3837_v35 = vld [vmem:[#allocation10 + $0x170] sm:$0xff] }
 0x740   :  { %6056 = vmatprep.subr.bf16.mxu0 %v8272_v27  ;;  %6088 = vmatprep.subr.bf16.mxu1 %v8436_v36  ;;  %v3608_v27 = vld [vmem:[#allocation9 + $0x150] sm:$0xff] }
 0x741   :  { %v8456_v32 = vpack.c.bf16 %v3612_v49, %v3608_v27  ;;  %v8504_v27 = vpack.c.bf16 %v3812_v14, %v3808_v40  ;;  %v3814_v49 = vld [vmem:[#allocation10 + $0xb8] sm:$0xff]  ;;  %v3823_v40 = vld [vmem:[#allocation10 + $0x100] sm:$0xff] }
 0x742   :  { %v3827_v14 = vld [vmem:[#allocation10 + $0x120] sm:$0xff] }
 0x743   :  { %6058 = vmatpush1.bf16.msra.mxu0 %v8276_v8  ;;  %6090 = vmatpush1.bf16.msra.mxu1 %v8440_v41  ;;  %v8460_v8 = vpack.c.bf16 %v3621_v44, %v3617_v11  ;;  %v3807_v11 = vld [vmem:[#allocation10 + $0x80] sm:$0xff] }
 0x744   :  { %6060 = vmatprep.subr.bf16.mxu0 %v8280_v56  ;;  %6092 = vmatprep.subr.bf16.mxu1 %v8444_v55  ;;  %v3616_v56 = vld [vmem:[#allocation9 + $0x190] sm:$0xff]  ;;  %v3811_v44 = vld [vmem:[#allocation10 + $0xa0] sm:$0xff] }
 0x745   :  { %v8464_v58 = vpack.c.bf16 %v3620_v38, %v3616_v56  ;;  %v8506_v56 = vpack.c.bf16 %v3814_v49, %v3810_v6  ;;  %v8508_v38 = vpack.c.bf16 %v3811_v44, %v3807_v11  ;;  %v8530_v6 = vpack.c.bf16 %v3830_v16, %v3826_v33  ;;  %v3825_v11 = vld [vmem:[#allocation10 + $0x110] sm:$0xff]  ;;  %v3840_v16 = vld [vmem:[#allocation10 + $0x188] sm:$0xff] }
 0x746   :  { %v8532_v49 = vpack.c.bf16 %v3827_v14, %v3823_v40  ;;  %v3829_v44 = vld [vmem:[#allocation10 + $0x130] sm:$0xff]  ;;  %v8547_v33 = vpack.c.bf16 %v3837_v35, %v3833_v17  ;;  %v3844_v40 = vld [vmem:[#allocation10 + $0x1a8] sm:$0xff]  ;;  %v3842_v14 = vld [vmem:[#allocation10 + $0x198] sm:$0xff] }
 0x747   :  { %6062 = vmatpush1.bf16.msra.mxu0 %v8284_v50  ;;  %6094 = vmatpush1.bf16.msra.mxu1 %v8448_v42  ;;  %v8468_v50 = vpack.c.bf16 %v3629_v25, %v3625_v23  ;;  %v3809_v23 = vld [vmem:[#allocation10 + $0x90] sm:$0xff]  ;;  %v3848_v17 = vld [vmem:[#allocation10 + $0x1c8] sm:$0xff] }
 0x748   :  { %6064 = vmatprep.subr.bf16.mxu0 %v8288_v31  ;;  %6096 = vmatprep.subr.bf16.mxu1 %v8452_v48  ;;  %v3624_v31 = vld [vmem:[#allocation9 + $0x1d0] sm:$0xff] }
 0x749   :  { %v8472_v61 = vpack.c.bf16 %v3628_v20, %v3624_v31  ;;  %v3813_v25 = vld [vmem:[#allocation10 + $0xb0] sm:$0xff]  ;;  %v3816_v20 = vld [vmem:[#allocation10 + $0xc8] sm:$0xff] }
 0x74a   :  { %v8511_v31 = vpack.c.bf16 %v3813_v25, %v3809_v23  ;;  %v8535_v23 = vpack.c.bf16 %v3829_v44, %v3825_v11  ;;  %v3832_v25 = vld [vmem:[#allocation10 + $0x148] sm:$0xff]  ;;  %v8551_v11 = vpack.c.bf16 %v3844_v40, %v3840_v16  ;;  %v3846_v44 = vld [vmem:[#allocation10 + $0x1b8] sm:$0xff]  ;;  %v8562_v40 = vpack.c.bf16 %v3852_v18, %v3848_v17 }
 0x74b   :  { %6066 = vmatpush1.bf16.msra.mxu0 %v8292_v9  ;;  %6098 = vmatpush1.bf16.msra.mxu1 %v8456_v32  ;;  %v3792_v9 = vld [vmem:[#allocation10 + $0x8] sm:$0xff]  ;;  %v3854_v16 = vld [vmem:[#allocation10 + $0x1f8] sm:$0xff] }
 0x74c   :  { %6068 = vmatprep.subr.bf16.mxu0 %v8296_v22  ;;  %6100 = vmatprep.subr.bf16.mxu1 %v8460_v8  ;;  %v3796_v22 = vld [vmem:[#allocation10 + $0x28] sm:$0xff]  ;;  %9289 = vst [vmem:[#allocation24_spill] sm:$0xff] %v8562_v40  ;;  %v3858_v17 = vld [vmem:[#allocation10 + $0x218] sm:$0xff] }
 0x74d   :  { %v3860_v18 = vld [vmem:[#allocation10 + $0x228] sm:$0xff] }
 0x74f   :  { %6070 = vmatpush1.bf16.msra.mxu0 %v8300_v4  ;;  %6102 = vmatpush1.bf16.msra.mxu1 %v8464_v58  ;;  %v8480_v4 = vpack.c.bf16 %v3796_v22, %v3792_v9  ;;  %v3820_v9 = vld [vmem:[#allocation10 + $0xe8] sm:$0xff]  ;;  %v3818_v22 = vld [vmem:[#allocation10 + $0xd8] sm:$0xff] }
 0x750   :  { %6072 = vmatprep.subr.bf16.mxu0 %v8304_v29  ;;  %6104 = vmatprep.subr.bf16.mxu1 %v8468_v50  ;;  %v8484_v29 = vpack.c.bf16 %v3795_v28, %v3791_v60  ;;  %v8516_v62 = vpack.c.bf16 %v3820_v9, %v3816_v20  ;;  %v3815_v60 = vld [vmem:[#allocation10 + $0xc0] sm:$0xff]  ;;  %v3836_v20 = vld [vmem:[#allocation10 + $0x168] sm:$0xff]  ;;  %v3834_v9 = vld [vmem:[#allocation10 + $0x158] sm:$0xff] }
 0x751   :  { %v3819_v28 = vld [vmem:[#allocation10 + $0xe0] sm:$0xff] }
 0x753   :  { %6074 = vmatpush1.bf16.msra.mxu0 %v8308_v46  ;;  %6106 = vmatpush1.bf16.msra.mxu1 %v8472_v61  ;;  %v3797_v46 = vld [vmem:[#allocation10 + $0x30] sm:$0xff] }
 0x754   :  { %6108 = vmatprep.subr.bf16.mxu0 %v8480_v4  ;;  %v8487_v37 = vpack.c.bf16 %v3797_v46, %v3793_v12  ;;  %6172 = vmatprep.subr.bf16.mxu1 %v8482_v30  ;;  %v8518_v12 = vpack.c.bf16 %v3822_v39, %v3818_v22  ;;  %v8520_v46 = vpack.c.bf16 %v3819_v28, %v3815_v60  ;;  %v3838_v39 = vld [vmem:[#allocation10 + $0x178] sm:$0xff]  ;;  %v3831_v60 = vld [vmem:[#allocation10 + $0x140] sm:$0xff] }
 0x755   :  { %v8540_v22 = vpack.c.bf16 %v3836_v20, %v3832_v25  ;;  %v3835_v28 = vld [vmem:[#allocation10 + $0x160] sm:$0xff] }
 0x756   :  { %3695 = vmatmul.mubr.f32.vlgmr.msra.gmra.mrb[24].mxu0 %v8414_v10  ;;  %3766 = vmatmul.mubr.f32.vlgmr.msra.gmra.mrb[28].mxu1 %v8414_v10  ;;  %v3800_v10 = vld [vmem:[#allocation10 + $0x48] sm:$0xff]  ;;  %v3839_v25 = vld [vmem:[#allocation10 + $0x180] sm:$0xff] }
 0x757   :  { %6110 = vmatpush1.bf16.msra.mxu0 %v8484_v29  ;;  %6174 = vmatpush1.bf16.msra.mxu1 %v8487_v37  ;;  %v8492_v19 = vpack.c.bf16 %v3804_v59, %v3800_v10  ;;  %v3817_v10 = vld [vmem:[#allocation10 + $0xd0] sm:$0xff]  ;;  %v3843_v20 = vld [vmem:[#allocation10 + $0x1a0] sm:$0xff] }
 0x758   :  { %6176 = vmatprep.subr.bf16.mxu1 %v8494_v2  ;;  %v3821_v59 = vld [vmem:[#allocation10 + $0xf0] sm:$0xff] }
 0x759   :  { %6112 = vmatprep.subr.bf16.mxu0 %v8492_v19  ;;  %v8523_v43 = vpack.c.bf16 %v3821_v59, %v3817_v10  ;;  %v8542_v10 = vpack.c.bf16 %v3838_v39, %v3834_v9  ;;  %v8544_v59 = vpack.c.bf16 %v3835_v28, %v3831_v60  ;;  %v8554_v9 = vpack.c.bf16 %v3846_v44, %v3842_v14  ;;  %v3841_v60 = vld [vmem:[#allocation10 + $0x190] sm:$0xff]  ;;  %v3847_v14 = vld [vmem:[#allocation10 + $0x1c0] sm:$0xff] }
 0x75a   :  { %v8556_v39 = vpack.c.bf16 %v3843_v20, %v3839_v25  ;;  %v3845_v28 = vld [vmem:[#allocation10 + $0x1b0] sm:$0xff]  ;;  %v3851_v44 = vld [vmem:[#allocation10 + $0x1e0] sm:$0xff] }
 0x75b   :  { %6114 = vmatpush1.bf16.msra.mxu0 %v8496_v24  ;;  %6178 = vmatpush1.bf16.msra.mxu1 %v8499_v54  ;;  %9285 = vst [vmem:[#allocation63_spill] sm:$0xff] %v8544_v59  ;;  %9286 = vst [vmem:[#allocation64_spill] sm:$0xff] %v8554_v9  ;;  %v8559_v35 = vpack.c.bf16 %v3845_v28, %v3841_v60  ;;  %v3849_v25 = vld [vmem:[#allocation10 + $0x1d0] sm:$0xff]  ;;  %v8570_v20 = vpack.c.bf16 %v3851_v44, %v3847_v14 }
 0x75c   :  { %6116 = vmatprep.subr.bf16.mxu0 %v8504_v27  ;;  %6180 = vmatprep.subr.bf16.mxu1 %v8506_v56  ;;  %9287 = vst [vmem:[#allocation22_spill] sm:$0xff] %v8556_v39  ;;  %v3853_v60 = vld [vmem:[#allocation10 + $0x1f0] sm:$0xff] }
 0x75d   :  { %9288 = vst [vmem:[#allocation23_spill] sm:$0xff] %v8559_v35  ;;  %9291 = vst [vmem:[#allocation26_spill] sm:$0xff] %v8570_v20  ;;  %v8572_v28 = vpack.c.bf16 %v3853_v60, %v3849_v25  ;;  %v3857_v14 = vld [vmem:[#allocation10 + $0x210] sm:$0xff]  ;;  %v3864_v60 = vld [vmem:[#allocation10 + $0x248] sm:$0xff] }
 0x75e   :  { %v3861_v44 = vld [vmem:[#allocation10 + $0x230] sm:$0xff] }
 0x75f   :  { %6118 = vmatpush1.bf16.msra.mxu0 %v8508_v38  ;;  %6182 = vmatpush1.bf16.msra.mxu1 %v8511_v31  ;;  %9292 = vst [vmem:[#allocation27_spill] sm:$0xff] %v8572_v28  ;;  %v8583_v25 = vpack.c.bf16 %v3861_v44, %v3857_v14  ;;  %v3865_v14 = vld [vmem:[#allocation10 + $0x250] sm:$0xff] }
 0x760   :  { %6120 = vmatprep.subr.bf16.mxu0 %v8516_v62  ;;  %6184 = vmatprep.subr.bf16.mxu1 %v8518_v12  ;;  %v3869_v44 = vld [vmem:[#allocation10 + $0x270] sm:$0xff] }
 0x761   :  { %9296 = vst [vmem:[#allocation31_spill] sm:$0xff] %v8583_v25 }
 0x763   :  { %6122 = vmatpush1.bf16.msra.mxu0 %v8520_v46  ;;  %6186 = vmatpush1.bf16.msra.mxu1 %v8523_v43 }
 0x764   :  { %6124 = vmatprep.subr.bf16.mxu0 %v8528_v52  ;;  %6188 = vmatprep.subr.bf16.mxu1 %v8530_v6 }
 0x767   :  { %6126 = vmatpush1.bf16.msra.mxu0 %v8532_v49  ;;  %6190 = vmatpush1.bf16.msra.mxu1 %v8535_v23 }
 0x768   :  { %6128 = vmatprep.subr.bf16.mxu0 %v8540_v22  ;;  %6192 = vmatprep.subr.bf16.mxu1 %v8542_v10 }
 0x76b   :  { %6130 = vmatpush1.bf16.msra.mxu0 %v8544_v59  ;;  %6194 = vmatpush1.bf16.msra.mxu1 %v8547_v33  ;;  %v8564_v59 = vpack.c.bf16 %v3854_v16, %v3850_v3  ;;  %v3856_v3 = vld [vmem:[#allocation10 + $0x208] sm:$0xff] }
 0x76c   :  { %6132 = vmatprep.subr.bf16.mxu0 %v8551_v11  ;;  %6196 = vmatprep.subr.bf16.mxu1 %v8554_v9  ;;  %v8576_v16 = vpack.c.bf16 %v3860_v18, %v3856_v3  ;;  %v3868_v3 = vld [vmem:[#allocation10 + $0x268] sm:$0xff]  ;;  %v3866_v18 = vld [vmem:[#allocation10 + $0x258] sm:$0xff] }
 0x76d   :  { %9290 = vst [vmem:[#allocation25_spill] sm:$0xff] %v8564_v59 }
 0x76e   :  { %9293 = vst [vmem:[#allocation28_spill] sm:$0xff] %v8576_v16 }
 0x76f   :  { %6134 = vmatpush1.bf16.msra.mxu0 %v8556_v39  ;;  %6198 = vmatpush1.bf16.msra.mxu1 %v8559_v35  ;;  %v3855_v35 = vld [vmem:[#allocation10 + $0x200] sm:$0xff] }
 0x770   :  { %6136 = vmatprep.subr.bf16.mxu0 %v8562_v40  ;;  %6200 = vmatprep.subr.bf16.mxu1 %v8564_v59  ;;  %v3862_v40 = vld [vmem:[#allocation10 + $0x238] sm:$0xff]  ;;  %v3859_v39 = vld [vmem:[#allocation10 + $0x220] sm:$0xff] }
 0x771   :  { %v8578_v9 = vpack.c.bf16 %v3862_v40, %v3858_v17  ;;  %v8580_v59 = vpack.c.bf16 %v3859_v39, %v3855_v35  ;;  %v3870_v40 = vld [vmem:[#allocation10 + $0x278] sm:$0xff]  ;;  %v3863_v39 = vld [vmem:[#allocation10 + $0x240] sm:$0xff] }
 0x772   :  { %v3867_v35 = vld [vmem:[#allocation10 + $0x260] sm:$0xff]  ;;  %v8590_v17 = vpack.c.bf16 %v3870_v40, %v3866_v18  ;;  %v3878_v18 = vld [vmem:[#allocation10 + $0x2b8] sm:$0xff] }
 0x773   :  { %6138 = vmatpush1.bf16.msra.mxu0 %v8570_v20  ;;  %6202 = vmatpush1.bf16.msra.mxu1 %v8572_v28  ;;  %9294 = vst [vmem:[#allocation29_spill] sm:$0xff] %v8578_v9  ;;  %9295 = vst [vmem:[#allocation30_spill] sm:$0xff] %v8580_v59  ;;  %v8588_v28 = vpack.c.bf16 %v3868_v3, %v3864_v60  ;;  %v8592_v20 = vpack.c.bf16 %v3867_v35, %v3863_v39  ;;  %v3876_v60 = vld [vmem:[#allocation10 + $0x2a8] sm:$0xff]  ;;  %v3874_v3 = vld [vmem:[#allocation10 + $0x298] sm:$0xff] }
 0x774   :  { %6140 = vmatprep.subr.bf16.mxu0 %v8576_v16  ;;  %6204 = vmatprep.subr.bf16.mxu1 %v8578_v9  ;;  %9298 = vst [vmem:[#allocation33_spill] sm:$0xff] %v8590_v17  ;;  %v8595_v9 = vpack.c.bf16 %v3869_v44, %v3865_v14  ;;  %v3871_v40 = vld [vmem:[#allocation10 + $0x280] sm:$0xff]  ;;  %v8602_v35 = vpack.c.bf16 %v3878_v18, %v3874_v3  ;;  %v3873_v14 = vld [vmem:[#allocation10 + $0x290] sm:$0xff]  ;;  %v3886_v3 = vld [vmem:[#allocation10 + $0x2f8] sm:$0xff] }
 0x775   :  { %9297 = vst [vmem:[#allocation32_spill] sm:$0xff] %v8588_v28  ;;  %9299 = vst [vmem:[#allocation34_spill] sm:$0xff] %v8592_v20  ;;  %v3875_v39 = vld [vmem:[#allocation10 + $0x2a0] sm:$0xff]  ;;  %v3877_v44 = vld [vmem:[#allocation10 + $0x2b0] sm:$0xff] }
 0x776   :  { %9300 = vst [vmem:[#allocation35_spill] sm:$0xff] %v8595_v9  ;;  %9302 = vst [vmem:[#allocation37_spill] sm:$0xff] %v8602_v35  ;;  %v8604_v16 = vpack.c.bf16 %v3875_v39, %v3871_v40  ;;  %v3879_v18 = vld [vmem:[#allocation10 + $0x2c0] sm:$0xff] }
 0x777   :  { %6142 = vmatpush1.bf16.msra.mxu0 %v8580_v59  ;;  %6206 = vmatpush1.bf16.msra.mxu1 %v8583_v25  ;;  %v3872_v25 = vld [vmem:[#allocation10 + $0x288] sm:$0xff]  ;;  %v3883_v40 = vld [vmem:[#allocation10 + $0x2e0] sm:$0xff] }
 0x778   :  { %6144 = vmatprep.subr.bf16.mxu0 %v8588_v28  ;;  %6208 = vmatprep.subr.bf16.mxu1 %v8590_v17  ;;  %v8600_v59 = vpack.c.bf16 %v3876_v60, %v3872_v25  ;;  %9303 = vst [vmem:[#allocation38_spill] sm:$0xff] %v8604_v16  ;;  %v8607_v17 = vpack.c.bf16 %v3877_v44, %v3873_v14  ;;  %v3884_v25 = vld [vmem:[#allocation10 + $0x2e8] sm:$0xff]  ;;  %v3882_v60 = vld [vmem:[#allocation10 + $0x2d8] sm:$0xff]  ;;  %v3881_v14 = vld [vmem:[#allocation10 + $0x2d0] sm:$0xff] }
 0x779   :  { %v8614_v39 = vpack.c.bf16 %v3886_v3, %v3882_v60  ;;  %v8616_v28 = vpack.c.bf16 %v3883_v40, %v3879_v18  ;;  %v3885_v44 = vld [vmem:[#allocation10 + $0x2f0] sm:$0xff]  ;;  %v3894_v60 = vld [vmem:[#allocation10 + $0x338] sm:$0xff]  ;;  %v3887_v3 = vld [vmem:[#allocation10 + $0x300] sm:$0xff] }
 0x77a   :  { %9301 = vst [vmem:[#allocation36_spill] sm:$0xff] %v8600_v59  ;;  %9304 = vst [vmem:[#allocation39_spill] sm:$0xff] %v8607_v17  ;;  %v3891_v18 = vld [vmem:[#allocation10 + $0x320] sm:$0xff] }
 0x77b   :  { %6146 = vmatpush1.bf16.msra.mxu0 %v8592_v20  ;;  %6210 = vmatpush1.bf16.msra.mxu1 %v8595_v9  ;;  %v3880_v9 = vld [vmem:[#allocation10 + $0x2c8] sm:$0xff]  ;;  %9306 = vst [vmem:[#allocation41_spill] sm:$0xff] %v8614_v39  ;;  %9307 = vst [vmem:[#allocation42_spill] sm:$0xff] %v8616_v28 }
 0x77c   :  { %6148 = vmatprep.subr.bf16.mxu0 %v8600_v59  ;;  %6212 = vmatprep.subr.bf16.mxu1 %v8602_v35  ;;  %v8612_v20 = vpack.c.bf16 %v3884_v25, %v3880_v9  ;;  %v8619_v35 = vpack.c.bf16 %v3885_v44, %v3881_v14  ;;  %v3892_v9 = vld [vmem:[#allocation10 + $0x328] sm:$0xff]  ;;  %v3890_v25 = vld [vmem:[#allocation10 + $0x318] sm:$0xff]  ;;  %v8628_v59 = vpack.c.bf16 %v3891_v18, %v3887_v3  ;;  %v3889_v14 = vld [vmem:[#allocation10 + $0x310] sm:$0xff] }
 0x77d   :  { %v8626_v40 = vpack.c.bf16 %v3894_v60, %v3890_v25  ;;  %v3893_v44 = vld [vmem:[#allocation10 + $0x330] sm:$0xff]  ;;  %v3902_v25 = vld [vmem:[#allocation10 + $0x378] sm:$0xff]  ;;  %v3895_v60 = vld [vmem:[#allocation10 + $0x340] sm:$0xff] }
 0x77e   :  { %9305 = vst [vmem:[#allocation40_spill] sm:$0xff] %v8612_v20  ;;  %9308 = vst [vmem:[#allocation43_spill] sm:$0xff] %v8619_v35  ;;  %v3899_v3 = vld [vmem:[#allocation10 + $0x360] sm:$0xff] }
 0x77f   :  { %6150 = vmatpush1.bf16.msra.mxu0 %v8604_v16  ;;  %6214 = vmatpush1.bf16.msra.mxu1 %v8607_v17  ;;  %v3888_v17 = vld [vmem:[#allocation10 + $0x308] sm:$0xff]  ;;  %9310 = vst [vmem:[#allocation45_spill] sm:$0xff] %v8626_v40  ;;  %9311 = vst [vmem:[#allocation46_spill] sm:$0xff] %v8628_v59 }
 0x780   :  { %6152 = vmatprep.subr.bf16.mxu0 %v8612_v20  ;;  %6216 = vmatprep.subr.bf16.mxu1 %v8614_v39  ;;  %v8624_v16 = vpack.c.bf16 %v3892_v9, %v3888_v17  ;;  %v8631_v39 = vpack.c.bf16 %v3893_v44, %v3889_v14  ;;  %v3900_v17 = vld [vmem:[#allocation10 + $0x368] sm:$0xff]  ;;  %v3898_v9 = vld [vmem:[#allocation10 + $0x358] sm:$0xff]  ;;  %v8640_v20 = vpack.c.bf16 %v3899_v3, %v3895_v60  ;;  %v3897_v14 = vld [vmem:[#allocation10 + $0x350] sm:$0xff] }
 0x781   :  { %v8638_v18 = vpack.c.bf16 %v3902_v25, %v3898_v9  ;;  %v3901_v44 = vld [vmem:[#allocation10 + $0x370] sm:$0xff]  ;;  %v3910_v9 = vld [vmem:[#allocation10 + $0x3b8] sm:$0xff]  ;;  %v3903_v25 = vld [vmem:[#allocation10 + $0x380] sm:$0xff] }
 0x782   :  { %9309 = vst [vmem:[#allocation44_spill] sm:$0xff] %v8624_v16  ;;  %9312 = vst [vmem:[#allocation47_spill] sm:$0xff] %v8631_v39  ;;  %v3907_v60 = vld [vmem:[#allocation10 + $0x3a0] sm:$0xff] }
 0x783   :  { %6154 = vmatpush1.bf16.msra.mxu0 %v8616_v28  ;;  %6218 = vmatpush1.bf16.msra.mxu1 %v8619_v35  ;;  %v3896_v35 = vld [vmem:[#allocation10 + $0x348] sm:$0xff]  ;;  %9314 = vst [vmem:[#allocation49_spill] sm:$0xff] %v8638_v18  ;;  %9315 = vst [vmem:[#allocation50_spill] sm:$0xff] %v8640_v20 }
 0x784   :  { %6156 = vmatprep.subr.bf16.mxu0 %v8624_v16  ;;  %6220 = vmatprep.subr.bf16.mxu1 %v8626_v40  ;;  %v8636_v28 = vpack.c.bf16 %v3900_v17, %v3896_v35  ;;  %v8643_v40 = vpack.c.bf16 %v3901_v44, %v3897_v14  ;;  %v3908_v35 = vld [vmem:[#allocation10 + $0x3a8] sm:$0xff]  ;;  %v3906_v17 = vld [vmem:[#allocation10 + $0x398] sm:$0xff]  ;;  %v8652_v16 = vpack.c.bf16 %v3907_v60, %v3903_v25  ;;  %v3905_v14 = vld [vmem:[#allocation10 + $0x390] sm:$0xff] }
 0x785   :  { %v8650_v3 = vpack.c.bf16 %v3910_v9, %v3906_v17  ;;  %v3909_v44 = vld [vmem:[#allocation10 + $0x3b0] sm:$0xff]  ;;  %v3918_v17 = vld [vmem:[#allocation10 + $0x3f8] sm:$0xff]  ;;  %v3911_v9 = vld [vmem:[#allocation10 + $0x3c0] sm:$0xff] }
 0x786   :  { %9313 = vst [vmem:[#allocation48_spill] sm:$0xff] %v8636_v28  ;;  %9316 = vst [vmem:[#allocation51_spill] sm:$0xff] %v8643_v40  ;;  %v3915_v25 = vld [vmem:[#allocation10 + $0x3e0] sm:$0xff] }
 0x787   :  { %6158 = vmatpush1.bf16.msra.mxu0 %v8628_v59  ;;  %6222 = vmatpush1.bf16.msra.mxu1 %v8631_v39  ;;  %v3904_v39 = vld [vmem:[#allocation10 + $0x388] sm:$0xff]  ;;  %9318 = vst [vmem:[#allocation53_spill] sm:$0xff] %v8650_v3  ;;  %9319 = vst [vmem:[#allocation54_spill] sm:$0xff] %v8652_v16 }
 0x788   :  { %6160 = vmatprep.subr.bf16.mxu0 %v8636_v28  ;;  %6224 = vmatprep.subr.bf16.mxu1 %v8638_v18  ;;  %v8648_v59 = vpack.c.bf16 %v3908_v35, %v3904_v39  ;;  %v8655_v18 = vpack.c.bf16 %v3909_v44, %v3905_v14  ;;  %v3916_v39 = vld [vmem:[#allocation10 + $0x3e8] sm:$0xff]  ;;  %v3914_v35 = vld [vmem:[#allocation10 + $0x3d8] sm:$0xff]  ;;  %v8664_v28 = vpack.c.bf16 %v3915_v25, %v3911_v9  ;;  %v3913_v14 = vld [vmem:[#allocation10 + $0x3d0] sm:$0xff] }
 0x789   :  { %v8662_v60 = vpack.c.bf16 %v3918_v17, %v3914_v35  ;;  %v3917_v44 = vld [vmem:[#allocation10 + $0x3f0] sm:$0xff] }
 0x78a   :  { %9317 = vst [vmem:[#allocation52_spill] sm:$0xff] %v8648_v59  ;;  %9320 = vst [vmem:[#allocation55_spill] sm:$0xff] %v8655_v18 }
 0x78b   :  { %6162 = vmatpush1.bf16.msra.mxu0 %v8640_v20  ;;  %6226 = vmatpush1.bf16.msra.mxu1 %v8643_v40  ;;  %v3912_v40 = vld [vmem:[#allocation10 + $0x3c8] sm:$0xff]  ;;  %9322 = vst [vmem:[#allocation57_spill] sm:$0xff] %v8662_v60  ;;  %9323 = vst [vmem:[#allocation58_spill] sm:$0xff] %v8664_v28 }
 0x78c   :  { %6164 = vmatprep.subr.bf16.mxu0 %v8648_v59  ;;  %6228 = vmatprep.subr.bf16.mxu1 %v8650_v3  ;;  %v8660_v20 = vpack.c.bf16 %v3916_v39, %v3912_v40  ;;  %v8667_v3 = vpack.c.bf16 %v3917_v44, %v3913_v14  ;;  %v4087_v40 = vld [vmem:[#allocation9 + $0x28] sm:$0xff] }
 0x78e   :  { %9321 = vst [vmem:[#allocation56_spill] sm:$0xff] %v8660_v20  ;;  %9324 = vst [vmem:[#allocation71_spill] sm:$0xff] %v8667_v3 }
 0x78f   :  { %6166 = vmatpush1.bf16.msra.mxu0 %v8652_v16  ;;  %6230 = vmatpush1.bf16.msra.mxu1 %v8655_v18  ;;  %v4083_v18 = vld [vmem:[#allocation9 + $0x8] sm:$0xff] }
 0x790   :  { %6168 = vmatprep.subr.bf16.mxu0 %v8660_v20  ;;  %6232 = vmatprep.subr.bf16.mxu1 %v8662_v60  ;;  %v6235_v39 = vpack.c.bf16 %v4087_v40, %v4083_v18 }
 0x793   :  { %6170 = vmatpush1.bf16.msra.mxu0 %v8664_v28  ;;  %6234 = vmatpush1.bf16.msra.mxu1 %v8667_v3 }
 0x794   :  { %6268 = vmatprep.subr.bf16.mxu1 %v8381_v34  ;;  %6236 = vmatprep.subr.bf16.mxu0 %v6235_v39 }
 0x809   :  { %v3469_v35 = vpop.f32.mrb[22].mxu0  ;;  %v3540_v17 = vpop.f32.mrb[42].mxu1 }
 0x80a   :  { %v3470_v9 = vadd.f32 %v8384_v21, %v3469_v35  ;;  %v3471_v25 = vpop.f32.mrb[23].mxu0  ;;  %v3542_v20 = vpop.f32.mrb[43].mxu1  ;;  %v3541_v44 = vadd.f32 %v8390_v15, %v3540_v17 }
 0x80b   :  { %v3472_v14 = vadd.f32 %v8387_v13, %v3471_v25  ;;  %v3543_v28 = vadd.f32 %v8393_v45, %v3542_v20  ;;  %v9325_v20 = vld [vmem:[#allocation67_spill] sm:$0xff] }
 0x80c   :  { %6645 = vtanh.f32 %v3470_v9 }
 0x80d   :  { %6647 = vtanh.f32 %v3472_v14 }
 0x80e   :  { %6649 = vtanh.f32 %v3541_v44 }
 0x80f   :  { %6651 = vtanh.f32 %v3543_v28  ;;  %v9326_v28 = vld [vmem:[#allocation68_spill] sm:$0xff] }
 0x816   :  { %v6646_v3 = vpop.eup %6645 }
 0x817   :  { %v3549_v18 = vmul.f32 0.5, %v6646_v3  ;;  %v6648_v40 = vpop.eup %6647 }
 0x818   :  { %v3551_v39 = vmul.f32 0.5, %v6648_v40  ;;  %v6650_v60 = vpop.eup %6649 }
 0x819   :  { %v3550_v34 = vadd.f32 0.5, %v3549_v18  ;;  %v6652_v13 = vpop.eup %6651 }
 0x81a   :  { %v3552_v16 = vadd.f32 0.5, %v3551_v39  ;;  %v3553_v15 = vmul.f32 0.5, %v6652_v13 }
 0x81b   :  { %v3556_v21 = vmul.f32 %v6650_v60, %v3550_v34 }
 0x81c   :  { %v3555_v35 = vmul.f32 %v3552_v16, %v8397_v57  ;;  %v3554_v45 = vadd.f32 0.5, %v3553_v15 }
 0x81e   :  { %v8678_v59 = vadd.f32 %v3556_v21, %v3555_v35 }
 0x820   :  { %6653 = vtanh.f32 %v8678_v59 }
 0x829   :  { %v3696_v17 = vpop.f32.mrb[24].mxu0  ;;  %v3767_v9 = vpop.f32.mrb[28].mxu1 }
 0x82a   :  { %v3772_v3 = vadd.f32 %v3696_v17, %v9325_v20  ;;  %v3698_v25 = vpop.f32.mrb[25].mxu0  ;;  %v3769_v14 = vpop.f32.mrb[29].mxu1  ;;  %v6503_v60 = vadd.f32 %v3767_v9, %v9107_v5 }
 0x82b   :  { %v6654_v44 = vpop.eup %6653  ;;  %v3773_v18 = vadd.f32 %v3698_v25, %v9326_v28  ;;  %v6504_v16 = vadd.f32 %v3769_v14, %v7347_v0  ;;  %v4082_v25 = vld [vmem:[#allocation9] sm:$0xff]  ;;  %v4091_v14 = vld [vmem:[#allocation9 + $0x48] sm:$0xff] }
 0x82c   :  { %6655 = vtanh.f32 %v3772_v3  ;;  %v8684_v57 = vmul.f32 %v6654_v44, %v3554_v45  ;;  %v4086_v44 = vld [vmem:[#allocation9 + $0x20] sm:$0xff]  ;;  %v4095_v28 = vld [vmem:[#allocation9 + $0x68] sm:$0xff] }
 0x82d   :  { %6657 = vtanh.f32 %v3773_v18 }
 0x82e   :  { %3983 = vmatprep.mubr.f32.mxu0 %v8684_v57  ;;  %4054 = vmatprep.mubr.f32.mxu1 %v8684_v57  ;;  %6659 = vtanh.f32 %v6503_v60 }
 0x82f   :  { %6661 = vtanh.f32 %v6504_v16  ;;  %v6239_v16 = vpack.c.bf16 %v4095_v28, %v4091_v14  ;;  %v4110_v14 = vld [vmem:[#allocation9 + $0xe0] sm:$0xff]  ;;  %v4119_v28 = vld [vmem:[#allocation9 + $0x128] sm:$0xff] }
 0x836   :  { %v6656_v40 = vpop.eup %6655 }
 0x837   :  { %v3780_v34 = vmul.f32 0.5, %v6656_v40  ;;  %v6658_v39 = vpop.eup %6657  ;;  %v6237_v40 = vpack.c.bf16 %v4086_v44, %v4082_v25  ;;  %v4106_v44 = vld [vmem:[#allocation9 + $0xc0] sm:$0xff] }
 0x838   :  { %v3782_v35 = vmul.f32 0.5, %v6658_v39  ;;  %v6660_v13 = vpop.eup %6659  ;;  %v4090_v39 = vld [vmem:[#allocation9 + $0x40] sm:$0xff] }
 0x839   :  { %v3781_v21 = vadd.f32 0.5, %v3780_v34  ;;  %v6662_v20 = vpop.eup %6661 }
 0x83a   :  { %v3783_v15 = vadd.f32 0.5, %v3782_v35  ;;  %v3784_v3 = vmul.f32 0.5, %v6662_v20  ;;  %v4099_v35 = vld [vmem:[#allocation9 + $0x88] sm:$0xff] }
 0x83b   :  { %v3787_v17 = vmul.f32 %v6660_v13, %v3781_v21  ;;  %v4094_v21 = vld [vmem:[#allocation9 + $0x60] sm:$0xff]  ;;  %v4107_v20 = vld [vmem:[#allocation9 + $0xc8] sm:$0xff] }
 0x83c   :  { %v3786_v9 = vmul.f32 %v3783_v15, %v8409_v26  ;;  %v3785_v18 = vadd.f32 0.5, %v3784_v3  ;;  %v4103_v26 = vld [vmem:[#allocation9 + $0xa8] sm:$0xff]  ;;  %v6241_v13 = vpack.c.bf16 %v4094_v21, %v4090_v39  ;;  %v4122_v21 = vld [vmem:[#allocation9 + $0x140] sm:$0xff] }
 0x83d   :  { %v6243_v15 = vpack.c.bf16 %v4103_v26, %v4099_v35  ;;  %v4111_v3 = vld [vmem:[#allocation9 + $0xe8] sm:$0xff]  ;;  %v4126_v35 = vld [vmem:[#allocation9 + $0x160] sm:$0xff] }
 0x83e   :  { %v8690_v45 = vadd.f32 %v3787_v17, %v3786_v9  ;;  %v4098_v17 = vld [vmem:[#allocation9 + $0x80] sm:$0xff]  ;;  %v4135_v26 = vld [vmem:[#allocation9 + $0x1a8] sm:$0xff] }
 0x83f   :  { %v4102_v9 = vld [vmem:[#allocation9 + $0xa0] sm:$0xff] }
 0x840   :  { %6663 = vtanh.f32 %v8690_v45  ;;  %v6245_v25 = vpack.c.bf16 %v4102_v9, %v4098_v17  ;;  %v4134_v17 = vld [vmem:[#allocation9 + $0x1a0] sm:$0xff]  ;;  %v4143_v9 = vld [vmem:[#allocation9 + $0x1e8] sm:$0xff] }
 0x84a   :  { %v6664_v60 = vpop.eup %6663 }
 0x84b   :  { %v8693_v34 = vmul.f32 %v6664_v60, %v3785_v18  ;;  %v6249_v18 = vpack.c.bf16 %v4110_v14, %v4106_v44  ;;  %v4114_v60 = vld [vmem:[#allocation9 + $0x100] sm:$0xff]  ;;  %v9359_v44 = vld [vmem:[#allocation52_spill] sm:$0xff] }
 0x84c   :  { %v9360_v14 = vld [vmem:[#allocation53_spill] sm:$0xff] }
 0x84d   :  { %3984 = vmatmul.mubr.f32.vlgmr.msra.gmra.mrb[26].mxu0 %v8693_v34  ;;  %4055 = vmatmul.mubr.f32.vlgmr.msra.gmra.mrb[44].mxu1 %v8693_v34 }
 0x84e   :  { %6238 = vmatpush1.bf16.msra.mxu0 %v6237_v40  ;;  %6270 = vmatpush1.bf16.msra.mxu1 %v8412_v51  ;;  %v6247_v51 = vpack.c.bf16 %v4111_v3, %v4107_v20  ;;  %v4118_v40 = vld [vmem:[#allocation9 + $0x120] sm:$0xff] }
 0x84f   :  { %6240 = vmatprep.subr.bf16.mxu0 %v6239_v16  ;;  %6272 = vmatprep.subr.bf16.mxu1 %v8416_v7  ;;  %v4115_v7 = vld [vmem:[#allocation9 + $0x108] sm:$0xff]  ;;  %v4138_v3 = vld [vmem:[#allocation9 + $0x1c0] sm:$0xff] }
 0x850   :  { %4210 = vmatprep.mubr.f32.mxu0 %v9068_v63  ;;  %4281 = vmatprep.mubr.f32.mxu1 %v9068_v63  ;;  %v6251_v63 = vpack.c.bf16 %v4119_v28, %v4115_v7  ;;  %v4127_v16 = vld [vmem:[#allocation9 + $0x168] sm:$0xff]  ;;  %v9362_v28 = vld [vmem:[#allocation55_spill] sm:$0xff] }
 0x851   :  { %v9361_v7 = vld [vmem:[#allocation54_spill] sm:$0xff] }
 0x852   :  { %6242 = vmatpush1.bf16.msra.mxu0 %v6241_v13  ;;  %6274 = vmatpush1.bf16.msra.mxu1 %v8422_v53  ;;  %v4123_v53 = vld [vmem:[#allocation9 + $0x148] sm:$0xff] }
 0x853   :  { %6244 = vmatprep.subr.bf16.mxu0 %v6243_v15  ;;  %6276 = vmatprep.subr.bf16.mxu1 %v8426_v1  ;;  %v6253_v1 = vpack.c.bf16 %v4118_v40, %v4114_v60  ;;  %v6255_v39 = vpack.c.bf16 %v4127_v16, %v4123_v53  ;;  %v4130_v15 = vld [vmem:[#allocation9 + $0x180] sm:$0xff]  ;;  %v9365_v60 = vld [vmem:[#allocation58_spill] sm:$0xff]  ;;  %v9366_v40 = vld [vmem:[#allocation71_spill] sm:$0xff] }
 0x854   :  { %v4602_v53 = vld [vmem:[#allocation13] sm:$0xff]  ;;  %v4603_v16 = vld [vmem:[#allocation13 + $0x8] sm:$0xff] }
 0x856   :  { %6246 = vmatpush1.bf16.msra.mxu0 %v6245_v25  ;;  %6278 = vmatpush1.bf16.msra.mxu1 %v8432_v47  ;;  %v4131_v47 = vld [vmem:[#allocation9 + $0x188] sm:$0xff]  ;;  %v4142_v25 = vld [vmem:[#allocation9 + $0x1e0] sm:$0xff] }
 0x857   :  { %6248 = vmatprep.subr.bf16.mxu0 %v6247_v51  ;;  %6280 = vmatprep.subr.bf16.mxu1 %v8436_v36  ;;  %v6257_v36 = vpack.c.bf16 %v4126_v35, %v4122_v21  ;;  %v6259_v13 = vpack.c.bf16 %v4135_v26, %v4131_v47  ;;  %v9358_v51 = vld [vmem:[#allocation51_spill] sm:$0xff]  ;;  %v8783_v35 = vld [vmem:[#allocation12] sm:$0xff] }
 0x85a   :  { %6250 = vmatpush1.bf16.msra.mxu0 %v6249_v18  ;;  %6282 = vmatpush1.bf16.msra.mxu1 %v8440_v41  ;;  %v4139_v41 = vld [vmem:[#allocation9 + $0x1c8] sm:$0xff]  ;;  %v9363_v18 = vld [vmem:[#allocation56_spill] sm:$0xff] }
 0x85b   :  { %6252 = vmatprep.subr.bf16.mxu0 %v6251_v63  ;;  %6284 = vmatprep.subr.bf16.mxu1 %v8444_v55  ;;  %v6261_v55 = vpack.c.bf16 %v4134_v17, %v4130_v15  ;;  %v6263_v20 = vpack.c.bf16 %v4143_v9, %v4139_v41  ;;  %v9364_v63 = vld [vmem:[#allocation57_spill] sm:$0xff]  ;;  %v8789_v17 = vld [vmem:[#allocation12 + $0x10] sm:$0xff]  ;;  %v8792_v9 = vld [vmem:[#allocation12 + $0x18] sm:$0xff] }
 0x85e   :  { %6254 = vmatpush1.bf16.msra.mxu0 %v6253_v1  ;;  %6286 = vmatpush1.bf16.msra.mxu1 %v8448_v42  ;;  %v6265_v42 = vpack.c.bf16 %v4142_v25, %v4138_v3  ;;  %v8780_v1 = vpack.c.bf16 %v4603_v16, %v4602_v53  ;;  %v4608_v53 = vld [vmem:[#allocation13 + $0x30] sm:$0xff]  ;;  %v4609_v16 = vld [vmem:[#allocation13 + $0x38] sm:$0xff] }
 0x85f   :  { %6256 = vmatprep.subr.bf16.mxu0 %v6255_v39  ;;  %6288 = vmatprep.subr.bf16.mxu1 %v8452_v48  ;;  %v9327_v48 = vld [vmem:[#allocation63_spill] sm:$0xff] }
 0x862   :  { %6258 = vmatpush1.bf16.msra.mxu0 %v6257_v36  ;;  %6290 = vmatpush1.bf16.msra.mxu1 %v8456_v32  ;;  %v9328_v32 = vld [vmem:[#allocation64_spill] sm:$0xff] }
 0x863   :  { %6260 = vmatprep.subr.bf16.mxu0 %v6259_v13  ;;  %6292 = vmatprep.subr.bf16.mxu1 %v8460_v8  ;;  %v9329_v8 = vld [vmem:[#allocation22_spill] sm:$0xff] }
 0x864   :  { %v8786_v13 = vld [vmem:[#allocation12 + $0x8] sm:$0xff] }
 0x866   :  { %6262 = vmatpush1.bf16.msra.mxu0 %v6261_v55  ;;  %6294 = vmatpush1.bf16.msra.mxu1 %v8464_v58  ;;  %v9330_v58 = vld [vmem:[#allocation23_spill] sm:$0xff] }
 0x867   :  { %6264 = vmatprep.subr.bf16.mxu0 %v6263_v20  ;;  %6296 = vmatprep.subr.bf16.mxu1 %v8468_v50  ;;  %v9331_v50 = vld [vmem:[#allocation24_spill] sm:$0xff] }
 0x86a   :  { %6266 = vmatpush1.bf16.msra.mxu0 %v6265_v42  ;;  %6298 = vmatpush1.bf16.msra.mxu1 %v8472_v61  ;;  %v9332_v61 = vld [vmem:[#allocation25_spill] sm:$0xff] }
 0x86b   :  { %6300 = vmatprep.subr.bf16.mxu0 %v8480_v4  ;;  %6364 = vmatprep.subr.bf16.mxu1 %v8482_v30  ;;  %v9333_v4 = vld [vmem:[#allocation26_spill] sm:$0xff]  ;;  %v9334_v30 = vld [vmem:[#allocation27_spill] sm:$0xff] }
 0x86d   :  { %4211 = vmatmul.mubr.f32.vlgmr.msra.gmra.mrb[28].mxu0 %v8693_v34  ;;  %4282 = vmatmul.mubr.f32.vlgmr.msra.gmra.mrb[30].mxu1 %v8693_v34  ;;  %v9357_v34 = vld [vmem:[#allocation50_spill] sm:$0xff] }
 0x86e   :  { %6302 = vmatpush1.bf16.msra.mxu0 %v8484_v29  ;;  %6366 = vmatpush1.bf16.msra.mxu1 %v8487_v37  ;;  %v9335_v29 = vld [vmem:[#allocation28_spill] sm:$0xff]  ;;  %v9336_v37 = vld [vmem:[#allocation29_spill] sm:$0xff] }
 0x86f   :  { %6304 = vmatprep.subr.bf16.mxu0 %v8492_v19  ;;  %6368 = vmatprep.subr.bf16.mxu1 %v8494_v2  ;;  %v9337_v19 = vld [vmem:[#allocation30_spill] sm:$0xff]  ;;  %v9338_v2 = vld [vmem:[#allocation31_spill] sm:$0xff] }
 0x872   :  { %6306 = vmatpush1.bf16.msra.mxu0 %v8496_v24  ;;  %6370 = vmatpush1.bf16.msra.mxu1 %v8499_v54  ;;  %v9339_v24 = vld [vmem:[#allocation32_spill] sm:$0xff]  ;;  %v9340_v54 = vld [vmem:[#allocation33_spill] sm:$0xff] }
 0x873   :  { %6308 = vmatprep.subr.bf16.mxu0 %v8504_v27  ;;  %6372 = vmatprep.subr.bf16.mxu1 %v8506_v56  ;;  %v9341_v27 = vld [vmem:[#allocation34_spill] sm:$0xff]  ;;  %v9342_v56 = vld [vmem:[#allocation35_spill] sm:$0xff] }
 0x876   :  { %6310 = vmatpush1.bf16.msra.mxu0 %v8508_v38  ;;  %6374 = vmatpush1.bf16.msra.mxu1 %v8511_v31  ;;  %v9343_v38 = vld [vmem:[#allocation36_spill] sm:$0xff]  ;;  %v9344_v31 = vld [vmem:[#allocation37_spill] sm:$0xff] }
 0x877   :  { %6312 = vmatprep.subr.bf16.mxu0 %v8516_v62  ;;  %6376 = vmatprep.subr.bf16.mxu1 %v8518_v12  ;;  %v9345_v62 = vld [vmem:[#allocation38_spill] sm:$0xff]  ;;  %v9346_v12 = vld [vmem:[#allocation39_spill] sm:$0xff] }
 0x87a   :  { %6314 = vmatpush1.bf16.msra.mxu0 %v8520_v46  ;;  %6378 = vmatpush1.bf16.msra.mxu1 %v8523_v43  ;;  %v9347_v46 = vld [vmem:[#allocation40_spill] sm:$0xff]  ;;  %v9348_v43 = vld [vmem:[#allocation41_spill] sm:$0xff] }
 0x87b   :  { %6316 = vmatprep.subr.bf16.mxu0 %v8528_v52  ;;  %6380 = vmatprep.subr.bf16.mxu1 %v8530_v6  ;;  %v9349_v52 = vld [vmem:[#allocation42_spill] sm:$0xff]  ;;  %v9350_v6 = vld [vmem:[#allocation43_spill] sm:$0xff] }
 0x87e   :  { %6318 = vmatpush1.bf16.msra.mxu0 %v8532_v49  ;;  %6382 = vmatpush1.bf16.msra.mxu1 %v8535_v23  ;;  %v9351_v49 = vld [vmem:[#allocation44_spill] sm:$0xff]  ;;  %v9352_v23 = vld [vmem:[#allocation45_spill] sm:$0xff] }
 0x87f   :  { %6320 = vmatprep.subr.bf16.mxu0 %v8540_v22  ;;  %6384 = vmatprep.subr.bf16.mxu1 %v8542_v10  ;;  %v9353_v22 = vld [vmem:[#allocation46_spill] sm:$0xff]  ;;  %v9354_v10 = vld [vmem:[#allocation47_spill] sm:$0xff] }
 0x882   :  { %6322 = vmatpush1.bf16.msra.mxu0 %v9327_v48  ;;  %6386 = vmatpush1.bf16.msra.mxu1 %v8547_v33  ;;  %v9355_v33 = vld [vmem:[#allocation48_spill] sm:$0xff] }
 0x883   :  { %6324 = vmatprep.subr.bf16.mxu0 %v8551_v11  ;;  %6388 = vmatprep.subr.bf16.mxu1 %v9328_v32  ;;  %v9356_v11 = vld [vmem:[#allocation49_spill] sm:$0xff] }
 0x886   :  { %6326 = vmatpush1.bf16.msra.mxu0 %v9329_v8  ;;  %6390 = vmatpush1.bf16.msra.mxu1 %v9330_v58 }
 0x887   :  { %6328 = vmatprep.subr.bf16.mxu0 %v9331_v50  ;;  %6392 = vmatprep.subr.bf16.mxu1 %v9332_v61 }
 0x88a   :  { %6330 = vmatpush1.bf16.msra.mxu0 %v9333_v4  ;;  %6394 = vmatpush1.bf16.msra.mxu1 %v9334_v30 }
 0x88b   :  { %6332 = vmatprep.subr.bf16.mxu0 %v9335_v29  ;;  %6396 = vmatprep.subr.bf16.mxu1 %v9336_v37 }
 0x88e   :  { %6334 = vmatpush1.bf16.msra.mxu0 %v9337_v19  ;;  %6398 = vmatpush1.bf16.msra.mxu1 %v9338_v2  ;;  %v9367_v2 = vld [vmem:[#allocation69_spill] sm:$0xff] }
 0x88f   :  { %6336 = vmatprep.subr.bf16.mxu0 %v9339_v24  ;;  %6400 = vmatprep.subr.bf16.mxu1 %v9340_v54 }
 0x892   :  { %6338 = vmatpush1.bf16.msra.mxu0 %v9341_v27  ;;  %6402 = vmatpush1.bf16.msra.mxu1 %v9342_v56 }
 0x893   :  { %6340 = vmatprep.subr.bf16.mxu0 %v9343_v38  ;;  %6404 = vmatprep.subr.bf16.mxu1 %v9344_v31  ;;  %v9368_v38 = vld [vmem:[#allocation70_spill] sm:$0xff] }
 0x896   :  { %6342 = vmatpush1.bf16.msra.mxu0 %v9345_v62  ;;  %6406 = vmatpush1.bf16.msra.mxu1 %v9346_v12 }
 0x897   :  { %6344 = vmatprep.subr.bf16.mxu0 %v9347_v46  ;;  %6408 = vmatprep.subr.bf16.mxu1 %v9348_v43 }
 0x89a   :  { %6346 = vmatpush1.bf16.msra.mxu0 %v9349_v52  ;;  %6410 = vmatpush1.bf16.msra.mxu1 %v9350_v6 }
 0x89b   :  { %6348 = vmatprep.subr.bf16.mxu0 %v9351_v49  ;;  %6412 = vmatprep.subr.bf16.mxu1 %v9352_v23 }
 0x89e   :  { %6350 = vmatpush1.bf16.msra.mxu0 %v9353_v22  ;;  %6414 = vmatpush1.bf16.msra.mxu1 %v9354_v10 }
 0x89f   :  { %6352 = vmatprep.subr.bf16.mxu0 %v9355_v33  ;;  %6416 = vmatprep.subr.bf16.mxu1 %v9356_v11 }
 0x8a2   :  { %6354 = vmatpush1.bf16.msra.mxu0 %v9357_v34  ;;  %6418 = vmatpush1.bf16.msra.mxu1 %v9358_v51  ;;  %v4604_v51 = vld [vmem:[#allocation13 + $0x10] sm:$0xff] }
 0x8a3   :  { %6356 = vmatprep.subr.bf16.mxu0 %v9359_v44  ;;  %6420 = vmatprep.subr.bf16.mxu1 %v9360_v14  ;;  %v4605_v44 = vld [vmem:[#allocation13 + $0x18] sm:$0xff] }
 0x8a6   :  { %6358 = vmatpush1.bf16.msra.mxu0 %v9361_v7  ;;  %6422 = vmatpush1.bf16.msra.mxu1 %v9362_v28  ;;  %v6431_v28 = vpack.c.bf16 %v4605_v44, %v4604_v51 }
 0x8a7   :  { %6360 = vmatprep.subr.bf16.mxu0 %v9363_v18  ;;  %6424 = vmatprep.subr.bf16.mxu1 %v9364_v63  ;;  %v9369_v18 = vld [vmem:[#allocation21_spill] sm:$0xff] }
 0x8a8   :  { %v980_v63 = vmax.f32 %v9369_v18, 0.0 }
 0x8aa   :  { %6362 = vmatpush1.bf16.msra.mxu0 %v9365_v60  ;;  %6426 = vmatpush1.bf16.msra.mxu1 %v9366_v40  ;;  %v4606_v60 = vld [vmem:[#allocation13 + $0x20] sm:$0xff]  ;;  %v4607_v40 = vld [vmem:[#allocation13 + $0x28] sm:$0xff] }
 0x8ab   :  { %6428 = vmatprep.subr.bf16.mxu0 %v8780_v1 }
 0x920   :  { %v3985_v39 = vpop.f32.mrb[26].mxu0  ;;  %v4056_v21 = vpop.f32.mrb[44].mxu1 }
 0x921   :  { %v3986_v47 = vadd.f32 %v8783_v35, %v3985_v39  ;;  %v3987_v26 = vpop.f32.mrb[27].mxu0  ;;  %v4058_v36 = vpop.f32.mrb[45].mxu1  ;;  %v4057_v41 = vadd.f32 %v8789_v17, %v4056_v21  ;;  %v6439_v39 = vpack.c.bf16 %v4609_v16, %v4608_v53  ;;  %v4610_v21 = vld [vmem:[#allocation13 + $0x40] sm:$0xff] }
 0x922   :  { %v3988_v15 = vadd.f32 %v8786_v13, %v3987_v26  ;;  %v4059_v55 = vadd.f32 %v8792_v9, %v4058_v36  ;;  %v4612_v36 = vld [vmem:[#allocation13 + $0x50] sm:$0xff] }
 0x923   :  { %6665 = vtanh.f32 %v3986_v47  ;;  %v4611_v47 = vld [vmem:[#allocation13 + $0x48] sm:$0xff] }
 0x924   :  { %6667 = vtanh.f32 %v3988_v15  ;;  %v6443_v26 = vpack.c.bf16 %v4611_v47, %v4610_v21  ;;  %v4613_v15 = vld [vmem:[#allocation13 + $0x58] sm:$0xff] }
 0x925   :  { %6669 = vtanh.f32 %v4057_v41  ;;  %v6447_v41 = vpack.c.bf16 %v4613_v15, %v4612_v36 }
 0x926   :  { %6671 = vtanh.f32 %v4059_v55  ;;  %v4614_v55 = vld [vmem:[#allocation13 + $0x60] sm:$0xff] }
 0x92d   :  { %v6666_v20 = vpop.eup %6665 }
 0x92e   :  { %v4065_v3 = vmul.f32 0.5, %v6666_v20  ;;  %v6668_v25 = vpop.eup %6667 }
 0x92f   :  { %v4067_v48 = vmul.f32 0.5, %v6668_v25  ;;  %v6670_v32 = vpop.eup %6669  ;;  %v4617_v25 = vld [vmem:[#allocation13 + $0x78] sm:$0xff] }
 0x930   :  { %v4066_v42 = vadd.f32 0.5, %v4065_v3  ;;  %v6672_v4 = vpop.eup %6671  ;;  %v4616_v3 = vld [vmem:[#allocation13 + $0x70] sm:$0xff] }
 0x931   :  { %v4068_v8 = vadd.f32 0.5, %v4067_v48  ;;  %v4069_v30 = vmul.f32 0.5, %v6672_v4  ;;  %v9370_v48 = vld [vmem:[#allocation59_spill] sm:$0xff] }
 0x932   :  { %v4072_v58 = vmul.f32 %v6670_v32, %v4066_v42  ;;  %v6455_v42 = vpack.c.bf16 %v4617_v25, %v4616_v3  ;;  %v1496_v32 = vmax.f32 %v9370_v48, 0.0 }
 0x933   :  { %v4071_v50 = vmul.f32 %v4068_v8, %v8678_v59  ;;  %v4070_v19 = vadd.f32 0.5, %v4069_v30  ;;  %v9371_v8 = vld [vmem:[#allocation60_spill] sm:$0xff]  ;;  %v9373_v30 = vld [vmem:[#allocation62_spill] sm:$0xff] }
 0x935   :  { %v8796_v61 = vadd.f32 %v4072_v58, %v4071_v50  ;;  %v2012_v58 = vmax.f32 %v9371_v8, 0.0  ;;  %v9372_v50 = vld [vmem:[#allocation61_spill] sm:$0xff] }
 0x936   :  { %v2528_v4 = vmax.f32 %v9372_v50, 0.0 }
 0x937   :  { %6673 = vtanh.f32 %v8796_v61 }
 0x940   :  { %v4212_v29 = vpop.f32.mrb[28].mxu0  ;;  %v4283_v37 = vpop.f32.mrb[30].mxu1 }
 0x941   :  { %v4288_v24 = vadd.f32 %v4212_v29, %v9367_v2  ;;  %v4214_v54 = vpop.f32.mrb[29].mxu0  ;;  %v4285_v27 = vpop.f32.mrb[31].mxu1  ;;  %v6505_v62 = vadd.f32 %v4283_v37, %v9107_v5  ;;  %v3044_v29 = vmax.f32 %v9373_v30, 0.0  ;;  %v3560_v37 = vmax.f32 %v8684_v57, 0.0 }
 0x942   :  { %v6674_v56 = vpop.eup %6673  ;;  %v4289_v31 = vadd.f32 %v4214_v54, %v9368_v38  ;;  %v6506_v12 = vadd.f32 %v4285_v27, %v7347_v0 }
 0x943   :  { %6675 = vtanh.f32 %v4288_v24  ;;  %v8802_v59 = vmul.f32 %v6674_v56, %v4070_v19 }
 0x944   :  { %6677 = vtanh.f32 %v4289_v31 }
 0x945   :  { %4499 = vmatprep.mubr.f32.mxu0 %v8802_v59  ;;  %4570 = vmatprep.mubr.f32.mxu1 %v8802_v59  ;;  %6679 = vtanh.f32 %v6505_v62  ;;  %v4076_v19 = vmax.f32 %v8802_v59, 0.0 }
 0x946   :  { %6681 = vtanh.f32 %v6506_v12 }
 0x94d   :  { %v6676_v46 = vpop.eup %6675 }
 0x94e   :  { %v4296_v43 = vmul.f32 0.5, %v6676_v46  ;;  %v6678_v52 = vpop.eup %6677 }
 0x94f   :  { %v4298_v49 = vmul.f32 0.5, %v6678_v52  ;;  %v6680_v23 = vpop.eup %6679 }
 0x950   :  { %v4297_v6 = vadd.f32 0.5, %v4296_v43  ;;  %v6682_v11 = vpop.eup %6681 }
 0x951   :  { %v4299_v22 = vadd.f32 0.5, %v4298_v49  ;;  %v4300_v34 = vmul.f32 0.5, %v6682_v11 }
 0x952   :  { %v4303_v10 = vmul.f32 %v6680_v23, %v4297_v6 }
 0x953   :  { %v4302_v5 = vmul.f32 %v4299_v22, %v8690_v45  ;;  %v4301_v14 = vadd.f32 0.5, %v4300_v34  ;;  %v6435_v45 = vpack.c.bf16 %v4607_v40, %v4606_v60 }
 0x955   :  { %v4304_v33 = vadd.f32 %v4303_v10, %v4302_v5 }
 0x957   :  { %6683 = vtanh.f32 %v4304_v33 }
 0x961   :  { %v6684_v7 = vpop.eup %6683 }
 0x962   :  { %v4306_v0 = vmul.f32 %v6684_v7, %v4301_v14 }
 0x964   :  { %4500 = vmatmul.mubr.f32.vlgmr.msra.gmra.mrb[30].mxu0 %v4306_v0  ;;  %4571 = vmatmul.mubr.f32.vlgmr.msra.gmra.mrb[46].mxu1 %v4306_v0 }
 0x965   :  { %6430 = vmatpush3.bf16.msra.mxu0 %v8780_v1  ;;  %4815 = vmatprep.mubr.f32.mxu0 %v980_v63  ;;  %v4615_v1 = vld [vmem:[#allocation13 + $0x68] sm:$0xff] }
 0x966   :  { %6432 = vmatprep.subr.bf16.mxu0 %v6431_v28  ;;  %v6451_v20 = vpack.c.bf16 %v4615_v1, %v4614_v55 }
 0x969   :  { %6434 = vmatpush3.bf16.msra.mxu0 %v6431_v28 }
 0x96a   :  { %6436 = vmatprep.subr.bf16.mxu0 %v6435_v45 }
 0x96d   :  { %6438 = vmatpush3.bf16.msra.mxu0 %v6435_v45 }
 0x96e   :  { %6440 = vmatprep.subr.bf16.mxu0 %v6439_v39 }
 0x971   :  { %6442 = vmatpush3.bf16.msra.mxu0 %v6439_v39 }
 0x972   :  { %6444 = vmatprep.subr.bf16.mxu0 %v6443_v26 }
 0x975   :  { %6446 = vmatpush3.bf16.msra.mxu0 %v6443_v26 }
 0x976   :  { %6448 = vmatprep.subr.bf16.mxu0 %v6447_v41 }
 0x979   :  { %6450 = vmatpush3.bf16.msra.mxu0 %v6447_v41 }
 0x97a   :  { %6452 = vmatprep.subr.bf16.mxu0 %v6451_v20 }
 0x97d   :  { %6454 = vmatpush3.bf16.msra.mxu0 %v6451_v20 }
 0x97e   :  { %6456 = vmatprep.subr.bf16.mxu0 %v6455_v42 }
 0x981   :  { %6458 = vmatpush3.bf16.msra.mxu0 %v6455_v42 }
 0x984   :  { %4816 = vmatmul.mubr.f32.vlgmr.msra.gmra.mrb[32].mxu0 %v1496_v32 }
 0x985   :  { %4818 = vmatprep.mubr.f32.mxu0 %v2012_v58 }
 0x988   :  { %4819 = vmatmul.mubr.f32.gmra.mrb[34].mxu0 %v2528_v4 }
 0x989   :  { %4821 = vmatprep.mubr.f32.mxu0 %v3044_v29 }
 0x98c   :  { %4822 = vmatmul.mubr.f32.gmra.mrb[36].mxu0 %v3560_v37 }
 0x98d   :  { %4824 = vmatprep.mubr.f32.mxu0 %v4076_v19 }
 0xa37   :  { %v4501_v2 = vpop.f32.mrb[30].mxu0  ;;  %v4572_v24 = vpop.f32.mrb[46].mxu1 }
 0xa38   :  { %v4502_v54 = vadd.f32 %v8783_v35, %v4501_v2  ;;  %v4503_v27 = vpop.f32.mrb[31].mxu0  ;;  %v4574_v56 = vpop.f32.mrb[47].mxu1  ;;  %v4573_v31 = vadd.f32 %v8789_v17, %v4572_v24  ;;  %v4758_v17 = vld [vmem:[%s8846_s7] ss:$0 sm:$0xff]  ;;  %s6882_s7 = smov [#allocation15]  }
 0xa39   :  { %v4504_v38 = vadd.f32 %v8786_v13, %v4503_v27  ;;  %v4575_v62 = vadd.f32 %v8792_v9, %v4574_v56  ;;  %s4743_s12 = sshll.u32 %s6882_s7, 4  ;;  %s4744_s12 = int_to_ptr.vmem [resolvable:$true] %s4743_s12 }
 0xa3a   :  { %6685 = vtanh.f32 %v4502_v54  ;;  %s6839_s13 = scalar_lea.vmem %s4744_s12, 1024  ;;  %p6844_p7 = scmp.lt.s32.totalorder %s4744_s12, %s4744_s12 }
 0xa3b   :  { %6687 = vtanh.f32 %v4504_v38  ;;  %p6840_p6 = scmp.ne.s32.totalorder %s4744_s12, %s6839_s13  ;;  %p6845_p8 = scmp.lt.s32.totalorder %s6839_s13, %s6839_s13 }
 0xa3c   :  { %6689 = vtanh.f32 %v4573_v31 }
 0xa3d   :  { %6691 = vtanh.f32 %v4575_v62  ;;  %p6846_p9 = por %p6845_p8, %p6844_p7 }
 0xa3f   :  { %p6847_p10 = pnand %p6846_p9, %p6840_p6 }
 0xa44   :  { %v6686_v57 = vpop.eup %6685 }
 0xa45   :  { %v4581_v12 = vmul.f32 0.5, %v6686_v57  ;;  %v6688_v59 = vpop.eup %6687 }
 0xa46   :  { %v4583_v43 = vmul.f32 0.5, %v6688_v59  ;;  %v6690_v52 = vpop.eup %6689 }
 0xa47   :  { %v4582_v46 = vadd.f32 0.5, %v4581_v12  ;;  %v6692_v13 = vpop.eup %6691 }
 0xa48   :  { %v4584_v6 = vadd.f32 0.5, %v4583_v43  ;;  %v4585_v22 = vmul.f32 0.5, %v6692_v13 }
 0xa49   :  { %v4588_v35 = vmul.f32 %v6690_v52, %v4582_v46 }
 0xa4a   :  { %v4587_v49 = vmul.f32 %v4584_v6, %v8796_v61  ;;  %v4586_v10 = vadd.f32 0.5, %v4585_v22 }
 0xa4c   :  { %v4589_v23 = vadd.f32 %v4588_v35, %v4587_v49 }
 0xa4e   :  { %6693 = vtanh.f32 %v4589_v23 }
 0xa57   :  { %v4817_v9 = vpop.f32.mrb[32].mxu0 }
 0xa58   :  { %v4697_v5 = vadd.f32 %v4817_v9, %v4758_v17  ;;  %v4691_v33 = vpop.f32.mrb[33].mxu0  ;;  %v6694_v11 = vpop.eup %6693 }
 0xa59   :  { %v4692_v34 = vadd.f32 %v4758_v17, %v4691_v33  ;;  %v4591_v51 = vmul.f32 %v6694_v11, %v4586_v10 }
 0xa5a   :  { %4731 = vst [vmem:[#allocation15 + $0x8] sm:$0xff] %v4697_v5 }
 0xa5b   :  { %4730 = vst [vmem:[#allocation15] sm:$0xff] %v4692_v34  ;;  %v4820_v44 = vpop.f32.mrb[34].mxu0  ;;  %v4592_v7 = vmax.f32 %v4591_v51, 0.0 }
 0xa5c   :  { %v4707_v14 = vadd.f32 %v4820_v44, %v4758_v17  ;;  %v4701_v61 = vpop.f32.mrb[35].mxu0 }
 0xa5d   :  { %v4702_v0 = vadd.f32 %v4758_v17, %v4701_v61  ;;  %4825 = vmatmul.mubr.f32.gmra.mrb[38].mxu0 %v4592_v7 }
 0xa5e   :  { %4733 = vst [vmem:[#allocation15 + $0x18] sm:$0xff] %v4707_v14 }
 0xa5f   :  { %4732 = vst [vmem:[#allocation15 + $0x10] sm:$0xff] %v4702_v0  ;;  %v4823_v28 = vpop.f32.mrb[36].mxu0 }
 0xa60   :  { %v4717_v18 = vadd.f32 %v4823_v28, %v4758_v17  ;;  %v4711_v63 = vpop.f32.mrb[37].mxu0 }
 0xa61   :  { %v4712_v60 = vadd.f32 %v4758_v17, %v4711_v63 }
 0xa62   :  { %4735 = vst [vmem:[#allocation15 + $0x28] sm:$0xff] %v4717_v18 }
 0xa63   :  { %4734 = vst [vmem:[#allocation15 + $0x20] sm:$0xff] %v4712_v60 }
 0xb30   :  { %v4826_v40 = vpop.f32.mrb[38].mxu0 }
 0xb31   :  { %v4727_v45 = vadd.f32 %v4826_v40, %v4758_v17  ;;  %v4721_v53 = vpop.f32.mrb[39].mxu0 }
 0xb32   :  { %v4722_v16 = vadd.f32 %v4758_v17, %v4721_v53 }
 0xb33   :  { %4737 = vst [vmem:[#allocation15 + $0x38] sm:$0xff] %v4727_v45 }
 0xb34   :  { %4736 = vst [vmem:[#allocation15 + $0x30] sm:$0xff] %v4722_v16 }
 0xb35   :  { %6850 = shalt.err (!%p6847_p10)
}
 0xb36   :  { %s6851_s18 = scalar_lea.hbm %s8847_s8, 1024 }
 0xb37   :  { %p6852_p11 = scmp.ne.s32.totalorder %s8847_s8, %s6851_s18  ;;  %p6855_p12 = scmp.lt.u32.totalorder %s6851_s18, %s8847_s8 }
 0xb39   :  { %p6857_p13 = pnand %p6855_p12, %p6852_p11 }
 0xb3b   :  { %6860 = shalt.err (!%p6857_p13)
}
 0xb3c   :  { %4749 = dma.vmem_to_hbm [thread:$0]  %s4744_s12, 1024, %s8847_s8, [#allocation6], %s6876_s4, %s6876_s4, %s6877_s20  }
 0xb3d   :  { %6869 = dma.done.wait [#allocation6], 1024  }
 0xb3e   :  { %6870 = vsyncadd [#allocation6], 4294966272 }
 0xb3f   :  { %4753 = vsyncpa [#allocation5], 1 }
 0xb40   :  { %4754 = vsyncpa [#allocation8], 1 }
 0xb41   :  { %4755 = vsyncpa [#allocation11], 1 }
 0xb42   :  { %4756 = vsyncpa [#allocation14], 1 }
 0xb43   :  { %4757 = vsyncpa [#allocation6], 1 }

</bundles_post_ra>
